<compile_context>
chip_gen: v7x
topology: tpu7x:2x2x1
jax: 0.10.0
libtpu: 0.0.40
codegen_flags: <defaults>
</compile_context>

<pallas_src>
import functools

import jax
import jax.numpy as jnp
from jax.experimental import pallas as pl
from jax.experimental.pallas import tpu as pltpu

LANE = 128


def _round_up(x, m):
    return (x + m - 1) // m * m


# ----------------------------------------------------------------------------
# Fused stage kernel:
#   affine (folded BN; identity on stage 1) -> ReLU -> depthwise KxK conv
#   -> 1x1 conv (MXU matmul over channels) -> partial BN stats.
# Grid: one image per step ("parallel").
# ----------------------------------------------------------------------------
def _fused_stage_kernel(x_ref, scale_ref, shift_ref, dw_ref, pw_ref,
                        y_ref, psum_ref, psq_ref, canvas_ref,
                        *, K, pad, stride, H, W, Ho, Wo):
    Cp = x_ref.shape[-1]

    # Zero the padded canvas every step (cheap; correct even if the grid is
    # split across TensorCores), then write the activated tile into its
    # interior. The pad ring stays exactly 0 -> no validity mask needed.
    canvas_ref[...] = jnp.zeros_like(canvas_ref)
    act = jnp.maximum(x_ref[0] * scale_ref[...] + shift_ref[...], 0.0)
    canvas_ref[pad:pad + H, pad:pad + W, :] = act

    # Depthwise KxK conv: stride-1 accumulation over hoisted weight taps, then a
    # single decimation for stride > 1 (avoids 9 strided relayout slices).
    xc = canvas_ref[...]                         # (Hp, Wp, Cp)
    dwv = dw_ref[...]                            # (K*K, Cp) -- loaded once
    Ho1 = H + 2 * pad - K + 1
    Wo1 = W + 2 * pad - K + 1
    acc = jnp.zeros((Ho1, Wo1, Cp), jnp.float32)
    for dh in range(K):
        for dw in range(K):
            win = xc[dh:dh + Ho1, dw:dw + Wo1, :]
            acc = acc + win * dwv[dh * K + dw:dh * K + dw + 1, :]
    if stride > 1:
        acc = acc[::stride, ::stride, :][:Ho, :Wo, :]

    # 1x1 conv as a lane/MXU-dense matmul, fused in VMEM with the dwconv above.
    a = acc.reshape(Ho * Wo, Cp)
    y = jnp.dot(a, pw_ref[...], preferred_element_type=jnp.float32)  # (Ho*Wo, Cop)
    Cop = y.shape[-1]
    y_ref[0] = y.reshape(Ho, Wo, Cop)

    # Per-image partial sums for the following BatchNorm (reduced in wrapper).
    psum_ref[0] = jnp.sum(y, axis=0, keepdims=True)
    psq_ref[0] = jnp.sum(y * y, axis=0, keepdims=True)


def fused_stage(x, scale, shift, dw, pw, *, K, pad, stride):
    """x: (N, H, W, Cp) NHWC, lane-padded. Returns (y, sum_c, sumsq_c)."""
    N, H, W, Cp = x.shape
    Cop = pw.shape[1]
    Ho = (H + 2 * pad - K) // stride + 1
    Wo = (W + 2 * pad - K) // stride + 1
    Hp, Wp = H + 2 * pad, W + 2 * pad
    kern = functools.partial(_fused_stage_kernel, K=K, pad=pad, stride=stride,
                             H=H, W=W, Ho=Ho, Wo=Wo)
    # TODO(synk): for large H/W (v7x's 64 MiB VMEM) tile over rows with a K-1
    # halo (manual DMA) instead of one image per block; fine at these shapes.
    y, s, ss = pl.pallas_call(
        kern,
        out_shape=(jax.ShapeDtypeStruct((N, Ho, Wo, Cop), jnp.float32),
                   jax.ShapeDtypeStruct((N, 1, Cop), jnp.float32),
                   jax.ShapeDtypeStruct((N, 1, Cop), jnp.float32)),
        grid_spec=pltpu.PrefetchScalarGridSpec(
            num_scalar_prefetch=0,
            grid=(N,),
            in_specs=[
                pl.BlockSpec((1, H, W, Cp), lambda n: (n, 0, 0, 0)),
                pl.BlockSpec((1, Cp), lambda n: (0, 0)),
                pl.BlockSpec((1, Cp), lambda n: (0, 0)),
                pl.BlockSpec((K * K, Cp), lambda n: (0, 0)),
                pl.BlockSpec((Cp, Cop), lambda n: (0, 0)),
            ],
            out_specs=(
                pl.BlockSpec((1, Ho, Wo, Cop), lambda n: (n, 0, 0, 0)),
                pl.BlockSpec((1, 1, Cop), lambda n: (n, 0, 0)),
                pl.BlockSpec((1, 1, Cop), lambda n: (n, 0, 0)),
            ),
            scratch_shapes=[pltpu.VMEM((Hp, Wp, Cp), jnp.float32)],
        ),
        compiler_params=pltpu.CompilerParams(
            dimension_semantics=("parallel",)),
    )(x, scale, shift, dw, pw)
    return y, jnp.sum(s, axis=(0, 1)), jnp.sum(ss, axis=(0, 1))


# ----------------------------------------------------------------------------
# Final BatchNorm applied as a lane-dense per-channel affine (big row tiles,
# in-place via input_output_aliases).
# ----------------------------------------------------------------------------
def _affine_kernel(x_ref, scale_ref, shift_ref, o_ref):
    o_ref[...] = x_ref[...] * scale_ref[...] + shift_ref[...]


def apply_affine(x, scale, shift, *, tm=512):
    M, C = x.shape
    tm = min(tm, _round_up(M, 8))
    return pl.pallas_call(
        _affine_kernel,
        out_shape=jax.ShapeDtypeStruct((M, C), jnp.float32),
        grid_spec=pltpu.PrefetchScalarGridSpec(
            num_scalar_prefetch=0,
            grid=(pl.cdiv(M, tm),),
            in_specs=[pl.BlockSpec((tm, C), lambda i: (i, 0)),
                      pl.BlockSpec((1, C), lambda i: (0, 0)),
                      pl.BlockSpec((1, C), lambda i: (0, 0))],
            out_specs=pl.BlockSpec((tm, C), lambda i: (i, 0)),
        ),
        compiler_params=pltpu.CompilerParams(dimension_semantics=("parallel",)),
        input_output_aliases={0: 0},
    )(x, scale.reshape(1, C), shift.reshape(1, C))


# ----------------------------------------------------------------------------
# Glue: BN folding (tiny per-channel scalar math) + parameter init
# ----------------------------------------------------------------------------
def _bn_fold(s, ss, count, gamma, beta, eps=1e-5):
    mean = s / count
    # Clamp guards the E[x^2]-E[x]^2 cancellation; at very large M a two-pass /
    # Welford accumulation would be preferable.
    var = jnp.maximum(ss / count - mean * mean, 0.0)
    scale = gamma * jax.lax.rsqrt(var + eps)
    shift = beta - mean * scale
    return scale, shift


def init_params(key, cin, cout, K=3):
    k1, k2, k3, k4 = jax.random.split(key, 4)
    return dict(
        # depthwise weights stored as (K*K, C) = PyTorch (C,1,K,K) flattened per tap
        dw1=0.1 * jax.random.normal(k1, (K * K, cin), jnp.float32),
        # pointwise weights stored as (Cin, Cout) = PyTorch (Cout, Cin, 1, 1).T
        pw1=0.1 * jax.random.normal(k2, (cin, cin), jnp.float32),
        bn1_gamma=jnp.ones((cin,), jnp.float32),
        bn1_beta=jnp.zeros((cin,), jnp.float32),
        dw2=0.1 * jax.random.normal(k3, (K * K, cin), jnp.float32),
        pw2=0.1 * jax.random.normal(k4, (cin, cout), jnp.float32),
        bn2_gamma=jnp.ones((cout,), jnp.float32),
        bn2_beta=jnp.zeros((cout,), jnp.float32),
    )


@functools.partial(jax.jit,
                   static_argnames=("kernel_size", "stride", "padding", "eps"))
def separable_conv2d2(x_nchw, params, *, kernel_size=3, stride=1, padding=1,
                      eps=1e-5):
    K = kernel_size
    x = jnp.transpose(x_nchw, (0, 2, 3, 1)).astype(jnp.float32)   # NCHW -> NHWC
    N, H, W, Cin = x.shape
    Cout = params["pw2"].shape[1]
    Cp = _round_up(Cin, LANE)       # lane-dense channel padding
    Cop = _round_up(Cout, LANE)

    # Zero-pad channels of activations/params (tiny; fused with the transpose).
    xpad = jnp.pad(x, ((0, 0), (0, 0), (0, 0), (0, Cp - Cin)))
    dw1 = jnp.pad(params["dw1"], ((0, 0), (0, Cp - Cin)))
    pw1 = jnp.pad(params["pw1"], ((0, Cp - Cin), (0, Cp - Cin)))
    dw2 = jnp.pad(params["dw2"], ((0, 0), (0, Cp - Cin)))
    pw2 = jnp.pad(params["pw2"], ((0, Cp - Cin), (0, Cop - Cout)))
    g1 = jnp.pad(params["bn1_gamma"], (0, Cp - Cin))
    b1 = jnp.pad(params["bn1_beta"], (0, Cp - Cin))
    g2 = jnp.pad(params["bn2_gamma"], (0, Cop - Cout))
    b2 = jnp.pad(params["bn2_beta"], (0, Cop - Cout))

    ones = jnp.ones((1, Cp), jnp.float32)
    zeros = jnp.zeros((1, Cp), jnp.float32)

    # Stage 1: ReLU -> dwconv (stride 1) -> 1x1 conv -> BN1 stats  (one kernel)
    y1, s1, ss1 = fused_stage(xpad, ones, zeros, dw1, pw1,
                              K=K, pad=padding, stride=1)
    N1, H1, W1, _ = y1.shape
    scale1, shift1 = _bn_fold(s1, ss1, N1 * H1 * W1, g1, b1, eps)

    # Stage 2: BN1 (folded affine) -> ReLU -> dwconv (stride) -> 1x1 -> BN2 stats
    y2, s2, ss2 = fused_stage(y1, scale1.reshape(1, Cp), shift1.reshape(1, Cp),
                              dw2, pw2, K=K, pad=padding, stride=stride)
    N2, H2, W2, _ = y2.shape
    M2 = N2 * H2 * W2
    scale2, shift2 = _bn_fold(s2, ss2, M2, g2, b2, eps)

    # BN2 as a per-channel affine (lane-dense, large tiles, in-place alias).
    out = apply_affine(y2.reshape(M2, Cop), scale2, shift2)
    out = out.reshape(N2, H2, W2, Cop)[..., :Cout]
    return jnp.transpose(out, (0, 3, 1, 2))                       # NHWC -> NCHW


# ----------------------------------------------------------------------------
# Pure-JAX reference (PyTorch training-mode semantics) for a correctness check.
# ----------------------------------------------------------------------------
def _reference(x_nchw, params, *, kernel_size=3, stride=1, padding=1, eps=1e-5):
    K = kernel_size
    x = jnp.transpose(x_nchw, (0, 2, 3, 1)).astype(jnp.float32)

    def dwconv(a, w_kk_c, s):
        C = a.shape[-1]
        w = w_kk_c.reshape(K, K, C)[:, :, None, :]          # HWIO, groups=C
        return jax.lax.conv_general_dilated(
            a, w, window_strides=(s, s),
            padding=[(padding, padding), (padding, padding)],
            dimension_numbers=("NHWC", "HWIO", "NHWC"),
            feature_group_count=C)

    def bn_train(y, gamma, beta):
        mean = y.mean(axis=(0, 1, 2))
        var = y.var(axis=(0, 1, 2))                          # biased
        return (y - mean) * (gamma * jax.lax.rsqrt(var + eps)) + beta

    r = jnp.maximum(x, 0.0)
    d1 = dwconv(r, params["dw1"], 1)
    p1 = jnp.einsum("nhwc,cd->nhwd", d1, params["pw1"])
    b1 = bn_train(p1, params["bn1_gamma"], params["bn1_beta"])
    r2 = jnp.maximum(b1, 0.0)
    d2 = dwconv(r2, params["dw2"], stride)
    p2 = jnp.einsum("nhwc,cd->nhwd", d2, params["pw2"])
    b2 = bn_train(p2, params["bn2_gamma"], params["bn2_beta"])
    return jnp.transpose(b2, (0, 3, 1, 2))


if __name__ == "__main__":
    key = jax.random.PRNGKey(0)
    kx, kp = jax.random.split(key)
    in_channels, out_channels = 4, 8
    x = jax.random.normal(kx, (2, in_channels, 16, 16), jnp.float32)  # NCHW
    params = init_params(kp, in_channels, out_channels)

    out = separable_conv2d2(x, params, kernel_size=3, stride=1, padding=1)
    out = jax.block_until_ready(out)
    assert out.shape == (2, out_channels, 16, 16), out.shape
    assert bool(jnp.all(jnp.isfinite(out)))

    ref = _reference(x, params, kernel_size=3, stride=1, padding=1)
    err = float(jnp.max(jnp.abs(out - ref)))
    assert err < 2e-3, f"max abs error vs reference: {err}"
    print("KERNEL_OK")
</pallas_src>

<mosaic_0001>
module attributes {stable_mosaic.version = 11 : i64} {
  func.func @_fused_stage_kernel(%arg0: i32, %arg1: memref<1x16x16x128xf32, #tpu.memory_space<vmem>>, %arg2: memref<1x128xf32, #tpu.memory_space<vmem>>, %arg3: memref<1x128xf32, #tpu.memory_space<vmem>>, %arg4: memref<9x128xf32, #tpu.memory_space<vmem>>, %arg5: memref<128x128xf32, #tpu.memory_space<vmem>>, %arg6: memref<1x16x16x128xf32, #tpu.memory_space<vmem>>, %arg7: memref<1x1x128xf32, #tpu.memory_space<vmem>>, %arg8: memref<1x1x128xf32, #tpu.memory_space<vmem>>, %arg9: memref<18x18x128xf32, #tpu.memory_space<vmem>>) attributes {dimension_semantics = [#tpu.dimension_semantics<parallel>], iteration_bounds = array<i64: 2>, scalar_prefetch = 0 : i64, scratch_operands = 1 : i64, tpu.core_type = #tpu.core_type<tc>, window_params = [{transform_indices = @transform_0, window_bounds = array<i64: 1, 16, 16, 128>}, {pipeline_mode = #tpu.pipeline_mode<synchronous>, transform_indices = @transform_1, window_bounds = array<i64: 1, 128>}, {pipeline_mode = #tpu.pipeline_mode<synchronous>, transform_indices = @transform_2, window_bounds = array<i64: 1, 128>}, {pipeline_mode = #tpu.pipeline_mode<synchronous>, transform_indices = @transform_3, window_bounds = array<i64: 9, 128>}, {pipeline_mode = #tpu.pipeline_mode<synchronous>, transform_indices = @transform_4, window_bounds = array<i64: 128, 128>}, {transform_indices = @transform_5, window_bounds = array<i64: 1, 16, 16, 128>}, {transform_indices = @transform_6, window_bounds = array<i64: 1, 1, 128>}, {transform_indices = @transform_7, window_bounds = array<i64: 1, 1, 128>}]} {
    %cst = arith.constant 0.000000e+00 : f32
    %0 = vector.broadcast %cst : f32 to vector<18x18x128xf32>
    %c0 = arith.constant 0 : index
    %c0_0 = arith.constant 0 : index
    %c0_1 = arith.constant 0 : index
    %1 = vector.load %arg9[%c0, %c0_0, %c0_1] : memref<18x18x128xf32, #tpu.memory_space<vmem>>, vector<18x18x128xf32>
    tpu.vector_store %arg9[%c0, %c0_0, %c0_1], %0 {strides = array<i32>} : memref<18x18x128xf32, #tpu.memory_space<vmem>>, vector<18x18x128xf32>,
    %c0_2 = arith.constant 0 : index
    %c0_3 = arith.constant 0 : index
    %c0_4 = arith.constant 0 : index
    %c0_5 = arith.constant 0 : index
    %2 = vector.load %arg1[%c0_2, %c0_3, %c0_4, %c0_5] : memref<1x16x16x128xf32, #tpu.memory_space<vmem>>, vector<1x16x16x128xf32>
    %3 = vector.shape_cast %2 : vector<1x16x16x128xf32> to vector<16x16x128xf32>
    %c0_6 = arith.constant 0 : index
    %c0_7 = arith.constant 0 : index
    %4 = vector.load %arg2[%c0_6, %c0_7] : memref<1x128xf32, #tpu.memory_space<vmem>>, vector<1x128xf32>
    %5 = vector.shape_cast %4 : vector<1x128xf32> to vector<1x1x128xf32>
    %6 = vector.broadcast %5 : vector<1x1x128xf32> to vector<16x16x128xf32>
    %7 = arith.mulf %3, %6 : vector<16x16x128xf32>
    %c0_8 = arith.constant 0 : index
    %c0_9 = arith.constant 0 : index
    %8 = vector.load %arg3[%c0_8, %c0_9] : memref<1x128xf32, #tpu.memory_space<vmem>>, vector<1x128xf32>
    %9 = vector.shape_cast %8 : vector<1x128xf32> to vector<1x1x128xf32>
    %10 = vector.broadcast %9 : vector<1x1x128xf32> to vector<16x16x128xf32>
    %11 = arith.addf %7, %10 : vector<16x16x128xf32>
    %cst_10 = arith.constant 0.000000e+00 : f32
    %12 = vector.broadcast %cst_10 : f32 to vector<16x16x128xf32>
    %13 = arith.maximumf %11, %12 : vector<16x16x128xf32>
    %c1 = arith.constant 1 : index
    %c1_11 = arith.constant 1 : index
    %c0_12 = arith.constant 0 : index
    %14 = vector.load %arg9[%c1, %c1_11, %c0_12] : memref<18x18x128xf32, #tpu.memory_space<vmem>>, vector<16x16x128xf32>
    tpu.vector_store %arg9[%c1, %c1_11, %c0_12], %13 {strides = array<i32>} : memref<18x18x128xf32, #tpu.memory_space<vmem>>, vector<16x16x128xf32>,
    %c0_13 = arith.constant 0 : index
    %c0_14 = arith.constant 0 : index
    %c0_15 = arith.constant 0 : index
    %15 = vector.load %arg9[%c0_13, %c0_14, %c0_15] : memref<18x18x128xf32, #tpu.memory_space<vmem>>, vector<18x18x128xf32>
    %c0_16 = arith.constant 0 : index
    %c0_17 = arith.constant 0 : index
    %16 = vector.load %arg4[%c0_16, %c0_17] : memref<9x128xf32, #tpu.memory_space<vmem>>, vector<9x128xf32>
    %cst_18 = arith.constant 0.000000e+00 : f32
    %17 = vector.broadcast %cst_18 : f32 to vector<16x16x128xf32>
    %18 = vector.extract_strided_slice %15 {offsets = [0, 0, 0], sizes = [16, 16, 128], strides = [1, 1, 1]} : vector<18x18x128xf32> to vector<16x16x128xf32>
    %19 = vector.extract_strided_slice %16 {offsets = [0, 0], sizes = [1, 128], strides = [1, 1]} : vector<9x128xf32> to vector<1x128xf32>
    %20 = vector.shape_cast %19 : vector<1x128xf32> to vector<1x1x128xf32>
    %21 = vector.broadcast %20 : vector<1x1x128xf32> to vector<16x16x128xf32>
    %22 = arith.mulf %18, %21 : vector<16x16x128xf32>
    %23 = arith.addf %17, %22 : vector<16x16x128xf32>
    %24 = vector.extract_strided_slice %15 {offsets = [0, 1, 0], sizes = [16, 16, 128], strides = [1, 1, 1]} : vector<18x18x128xf32> to vector<16x16x128xf32>
    %25 = vector.extract_strided_slice %16 {offsets = [1, 0], sizes = [1, 128], strides = [1, 1]} : vector<9x128xf32> to vector<1x128xf32>
    %26 = vector.shape_cast %25 : vector<1x128xf32> to vector<1x1x128xf32>
    %27 = vector.broadcast %26 : vector<1x1x128xf32> to vector<16x16x128xf32>
    %28 = arith.mulf %24, %27 : vector<16x16x128xf32>
    %29 = arith.addf %23, %28 : vector<16x16x128xf32>
    %30 = vector.extract_strided_slice %15 {offsets = [0, 2, 0], sizes = [16, 16, 128], strides = [1, 1, 1]} : vector<18x18x128xf32> to vector<16x16x128xf32>
    %31 = vector.extract_strided_slice %16 {offsets = [2, 0], sizes = [1, 128], strides = [1, 1]} : vector<9x128xf32> to vector<1x128xf32>
    %32 = vector.shape_cast %31 : vector<1x128xf32> to vector<1x1x128xf32>
    %33 = vector.broadcast %32 : vector<1x1x128xf32> to vector<16x16x128xf32>
    %34 = arith.mulf %30, %33 : vector<16x16x128xf32>
    %35 = arith.addf %29, %34 : vector<16x16x128xf32>
    %36 = vector.extract_strided_slice %15 {offsets = [1, 0, 0], sizes = [16, 16, 128], strides = [1, 1, 1]} : vector<18x18x128xf32> to vector<16x16x128xf32>
    %37 = vector.extract_strided_slice %16 {offsets = [3, 0], sizes = [1, 128], strides = [1, 1]} : vector<9x128xf32> to vector<1x128xf32>
    %38 = vector.shape_cast %37 : vector<1x128xf32> to vector<1x1x128xf32>
    %39 = vector.broadcast %38 : vector<1x1x128xf32> to vector<16x16x128xf32>
    %40 = arith.mulf %36, %39 : vector<16x16x128xf32>
    %41 = arith.addf %35, %40 : vector<16x16x128xf32>
    %42 = vector.extract_strided_slice %15 {offsets = [1, 1, 0], sizes = [16, 16, 128], strides = [1, 1, 1]} : vector<18x18x128xf32> to vector<16x16x128xf32>
    %43 = vector.extract_strided_slice %16 {offsets = [4, 0], sizes = [1, 128], strides = [1, 1]} : vector<9x128xf32> to vector<1x128xf32>
    %44 = vector.shape_cast %43 : vector<1x128xf32> to vector<1x1x128xf32>
    %45 = vector.broadcast %44 : vector<1x1x128xf32> to vector<16x16x128xf32>
    %46 = arith.mulf %42, %45 : vector<16x16x128xf32>
    %47 = arith.addf %41, %46 : vector<16x16x128xf32>
    %48 = vector.extract_strided_slice %15 {offsets = [1, 2, 0], sizes = [16, 16, 128], strides = [1, 1, 1]} : vector<18x18x128xf32> to vector<16x16x128xf32>
    %49 = vector.extract_strided_slice %16 {offsets = [5, 0], sizes = [1, 128], strides = [1, 1]} : vector<9x128xf32> to vector<1x128xf32>
    %50 = vector.shape_cast %49 : vector<1x128xf32> to vector<1x1x128xf32>
    %51 = vector.broadcast %50 : vector<1x1x128xf32> to vector<16x16x128xf32>
    %52 = arith.mulf %48, %51 : vector<16x16x128xf32>
    %53 = arith.addf %47, %52 : vector<16x16x128xf32>
    %54 = vector.extract_strided_slice %15 {offsets = [2, 0, 0], sizes = [16, 16, 128], strides = [1, 1, 1]} : vector<18x18x128xf32> to vector<16x16x128xf32>
    %55 = vector.extract_strided_slice %16 {offsets = [6, 0], sizes = [1, 128], strides = [1, 1]} : vector<9x128xf32> to vector<1x128xf32>
    %56 = vector.shape_cast %55 : vector<1x128xf32> to vector<1x1x128xf32>
    %57 = vector.broadcast %56 : vector<1x1x128xf32> to vector<16x16x128xf32>
    %58 = arith.mulf %54, %57 : vector<16x16x128xf32>
    %59 = arith.addf %53, %58 : vector<16x16x128xf32>
    %60 = vector.extract_strided_slice %15 {offsets = [2, 1, 0], sizes = [16, 16, 128], strides = [1, 1, 1]} : vector<18x18x128xf32> to vector<16x16x128xf32>
    %61 = vector.extract_strided_slice %16 {offsets = [7, 0], sizes = [1, 128], strides = [1, 1]} : vector<9x128xf32> to vector<1x128xf32>
    %62 = vector.shape_cast %61 : vector<1x128xf32> to vector<1x1x128xf32>
    %63 = vector.broadcast %62 : vector<1x1x128xf32> to vector<16x16x128xf32>
    %64 = arith.mulf %60, %63 : vector<16x16x128xf32>
    %65 = arith.addf %59, %64 : vector<16x16x128xf32>
    %66 = vector.extract_strided_slice %15 {offsets = [2, 2, 0], sizes = [16, 16, 128], strides = [1, 1, 1]} : vector<18x18x128xf32> to vector<16x16x128xf32>
    %67 = vector.extract_strided_slice %16 {offsets = [8, 0], sizes = [1, 128], strides = [1, 1]} : vector<9x128xf32> to vector<1x128xf32>
    %68 = vector.shape_cast %67 : vector<1x128xf32> to vector<1x1x128xf32>
    %69 = vector.broadcast %68 : vector<1x1x128xf32> to vector<16x16x128xf32>
    %70 = arith.mulf %66, %69 : vector<16x16x128xf32>
    %71 = arith.addf %65, %70 : vector<16x16x128xf32>
    %72 = vector.shape_cast %71 : vector<16x16x128xf32> to vector<256x128xf32>
    %c0_19 = arith.constant 0 : index
    %c0_20 = arith.constant 0 : index
    %73 = vector.load %arg5[%c0_19, %c0_20] : memref<128x128xf32, #tpu.memory_space<vmem>>, vector<128x128xf32>
    %cst_21 = arith.constant dense<0.000000e+00> : vector<256x128xf32>
    %74 = tpu.matmul %72, %73, %cst_21 {dimension_numbers = #tpu.dot_dimension_numbers<[1], [0], [0], [1], [0, 0, 1, 1], [], []>} : vector<256x128xf32>, vector<128x128xf32>, vector<256x128xf32> -> vector<256x128xf32>
    %75 = vector.shape_cast %74 : vector<256x128xf32> to vector<16x16x128xf32>
    %c0_22 = arith.constant 0 : index
    %c0_23 = arith.constant 0 : index
    %c0_24 = arith.constant 0 : index
    %c0_25 = arith.constant 0 : index
    %76 = vector.load %arg6[%c0_22, %c0_23, %c0_24, %c0_25] : memref<1x16x16x128xf32, #tpu.memory_space<vmem>>, vector<1x16x16x128xf32>
    %77 = vector.shape_cast %76 : vector<1x16x16x128xf32> to vector<16x16x128xf32>
    %78 = vector.shape_cast %75 : vector<16x16x128xf32> to vector<1x16x16x128xf32>
    tpu.vector_store %arg6[%c0_22, %c0_23, %c0_24, %c0_25], %78 {strides = array<i32>} : memref<1x16x16x128xf32, #tpu.memory_space<vmem>>, vector<1x16x16x128xf32>,
    %cst_26 = arith.constant dense<0.000000e+00> : vector<128xf32>
    %79 = vector.multi_reduction <add>, %74, %cst_26 [0] : vector<256x128xf32> to vector<128xf32>
    %80 = vector.shape_cast %79 : vector<128xf32> to vector<1x128xf32>
    %c0_27 = arith.constant 0 : index
    %c0_28 = arith.constant 0 : index
    %c0_29 = arith.constant 0 : index
    %81 = vector.load %arg7[%c0_27, %c0_28, %c0_29] : memref<1x1x128xf32, #tpu.memory_space<vmem>>, vector<1x1x128xf32>
    %82 = vector.shape_cast %81 : vector<1x1x128xf32> to vector<1x128xf32>
    %83 = vector.shape_cast %80 : vector<1x128xf32> to vector<1x1x128xf32>
    tpu.vector_store %arg7[%c0_27, %c0_28, %c0_29], %83 {strides = array<i32>} : memref<1x1x128xf32, #tpu.memory_space<vmem>>, vector<1x1x128xf32>,
    %84 = arith.mulf %74, %74 : vector<256x128xf32>
    %cst_30 = arith.constant dense<0.000000e+00> : vector<128xf32>
    %85 = vector.multi_reduction <add>, %84, %cst_30 [0] : vector<256x128xf32> to vector<128xf32>
    %86 = vector.shape_cast %85 : vector<128xf32> to vector<1x128xf32>
    %c0_31 = arith.constant 0 : index
    %c0_32 = arith.constant 0 : index
    %c0_33 = arith.constant 0 : index
    %87 = vector.load %arg8[%c0_31, %c0_32, %c0_33] : memref<1x1x128xf32, #tpu.memory_space<vmem>>, vector<1x1x128xf32>
    %88 = vector.shape_cast %87 : vector<1x1x128xf32> to vector<1x128xf32>
    %89 = vector.shape_cast %86 : vector<1x128xf32> to vector<1x1x128xf32>
    tpu.vector_store %arg8[%c0_31, %c0_32, %c0_33], %89 {strides = array<i32>} : memref<1x1x128xf32, #tpu.memory_space<vmem>>, vector<1x1x128xf32>,
    return
  }
  func.func @transform_0(%arg0: i32) -> (i32, i32, i32, i32) {
    %c0_i32 = arith.constant 0 : i32
    %c0_i32_0 = arith.constant 0 : i32
    %c0_i32_1 = arith.constant 0 : i32
    %c0_i32_2 = arith.constant 0 : i32
    return %arg0, %c0_i32, %c0_i32_0, %c0_i32_1 : i32, i32, i32, i32
  }
  func.func @transform_1(%arg0: i32) -> (i32, i32) {
    %c0_i32 = arith.constant 0 : i32
    %c0_i32_0 = arith.constant 0 : i32
    %c0_i32_1 = arith.constant 0 : i32
    return %c0_i32, %c0_i32_0 : i32, i32
  }
  func.func @transform_2(%arg0: i32) -> (i32, i32) {
    %c0_i32 = arith.constant 0 : i32
    %c0_i32_0 = arith.constant 0 : i32
    %c0_i32_1 = arith.constant 0 : i32
    return %c0_i32, %c0_i32_0 : i32, i32
  }
  func.func @transform_3(%arg0: i32) -> (i32, i32) {
    %c0_i32 = arith.constant 0 : i32
    %c0_i32_0 = arith.constant 0 : i32
    %c0_i32_1 = arith.constant 0 : i32
    return %c0_i32, %c0_i32_0 : i32, i32
  }
  func.func @transform_4(%arg0: i32) -> (i32, i32) {
    %c0_i32 = arith.constant 0 : i32
    %c0_i32_0 = arith.constant 0 : i32
    %c0_i32_1 = arith.constant 0 : i32
    return %c0_i32, %c0_i32_0 : i32, i32
  }
  func.func @transform_5(%arg0: i32) -> (i32, i32, i32, i32) {
    %c0_i32 = arith.constant 0 : i32
    %c0_i32_0 = arith.constant 0 : i32
    %c0_i32_1 = arith.constant 0 : i32
    %c0_i32_2 = arith.constant 0 : i32
    return %arg0, %c0_i32, %c0_i32_0, %c0_i32_1 : i32, i32, i32, i32
  }
  func.func @transform_6(%arg0: i32) -> (i32, i32, i32) {
    %c0_i32 = arith.constant 0 : i32
    %c0_i32_0 = arith.constant 0 : i32
    %c0_i32_1 = arith.constant 0 : i32
    return %arg0, %c0_i32, %c0_i32_0 : i32, i32, i32
  }
  func.func @transform_7(%arg0: i32) -> (i32, i32, i32) {
    %c0_i32 = arith.constant 0 : i32
    %c0_i32_0 = arith.constant 0 : i32
    %c0_i32_1 = arith.constant 0 : i32
    return %arg0, %c0_i32, %c0_i32_0 : i32, i32, i32
  }
}

module attributes {stable_mosaic.version = 11 : i64} {
  func.func @_affine_kernel(%arg0: i32, %arg1: memref<512x128xf32, #tpu.memory_space<vmem>>, %arg2: memref<1x128xf32, #tpu.memory_space<vmem>>, %arg3: memref<1x128xf32, #tpu.memory_space<vmem>>, %arg4: memref<512x128xf32, #tpu.memory_space<vmem>>) attributes {dimension_semantics = [#tpu.dimension_semantics<parallel>], iteration_bounds = array<i64: 1>, scalar_prefetch = 0 : i64, scratch_operands = 0 : i64, tpu.core_type = #tpu.core_type<tc>, window_params = [{transform_indices = @transform_0, window_bounds = array<i64: 512, 128>}, {pipeline_mode = #tpu.pipeline_mode<synchronous>, transform_indices = @transform_1, window_bounds = array<i64: 1, 128>}, {pipeline_mode = #tpu.pipeline_mode<synchronous>, transform_indices = @transform_2, window_bounds = array<i64: 1, 128>}, {transform_indices = @transform_3, window_bounds = array<i64: 512, 128>}]} {
    %c0 = arith.constant 0 : index
    %c0_0 = arith.constant 0 : index
    %0 = vector.load %arg1[%c0, %c0_0] : memref<512x128xf32, #tpu.memory_space<vmem>>, vector<512x128xf32>
    %c0_1 = arith.constant 0 : index
    %c0_2 = arith.constant 0 : index
    %1 = vector.load %arg2[%c0_1, %c0_2] : memref<1x128xf32, #tpu.memory_space<vmem>>, vector<1x128xf32>
    %2 = vector.broadcast %1 : vector<1x128xf32> to vector<512x128xf32>
    %3 = arith.mulf %0, %2 : vector<512x128xf32>
    %c0_3 = arith.constant 0 : index
    %c0_4 = arith.constant 0 : index
    %4 = vector.load %arg3[%c0_3, %c0_4] : memref<1x128xf32, #tpu.memory_space<vmem>>, vector<1x128xf32>
    %5 = vector.broadcast %4 : vector<1x128xf32> to vector<512x128xf32>
    %6 = arith.addf %3, %5 : vector<512x128xf32>
    %c0_5 = arith.constant 0 : index
    %c0_6 = arith.constant 0 : index
    %7 = vector.load %arg4[%c0_5, %c0_6] : memref<512x128xf32, #tpu.memory_space<vmem>>, vector<512x128xf32>
    tpu.vector_store %arg4[%c0_5, %c0_6], %6 {strides = array<i32>} : memref<512x128xf32, #tpu.memory_space<vmem>>, vector<512x128xf32>,
    return
  }
  func.func @transform_0(%arg0: i32) -> (i32, i32) {
    %c0_i32 = arith.constant 0 : i32
    %c0_i32_0 = arith.constant 0 : i32
    return %arg0, %c0_i32 : i32, i32
  }
  func.func @transform_1(%arg0: i32) -> (i32, i32) {
    %c0_i32 = arith.constant 0 : i32
    %c0_i32_0 = arith.constant 0 : i32
    %c0_i32_1 = arith.constant 0 : i32
    return %c0_i32, %c0_i32_0 : i32, i32
  }
  func.func @transform_2(%arg0: i32) -> (i32, i32) {
    %c0_i32 = arith.constant 0 : i32
    %c0_i32_0 = arith.constant 0 : i32
    %c0_i32_1 = arith.constant 0 : i32
    return %c0_i32, %c0_i32_0 : i32, i32
  }
  func.func @transform_3(%arg0: i32) -> (i32, i32) {
    %c0_i32 = arith.constant 0 : i32
    %c0_i32_0 = arith.constant 0 : i32
    return %arg0, %c0_i32 : i32, i32
  }
}

</mosaic_0001>

<bundles_post_ra>
// kernel: separable_conv2d2.5
= control target key start
LH: loop header
LB: loop body
LE: loop exit
PB: predicated region body
PF: predicated region fallthrough
CT: control target
= control target key end

     0   :  { %s832_s0 = inlined_call_operand.vmem [shape: f32[512,128], index: 0, kind: input, shape index: {}, may-alias: {0,3}]   ;;  %s833_s1 = inlined_call_operand.vmem [shape: f32[1,128], index: 1, kind: input, shape index: {}]   ;;  %s834_s2 = inlined_call_operand.vmem [shape: f32[1,128], index: 2, kind: input, shape index: {}]   ;;  %s835_s3 = inlined_call_operand.vmem [shape: f32[512,128], index: 3, kind: output, shape index: {}, may-alias: {0,3}]  }
   0x1   :  { %v14_v0 = vld [vmem:[%s832_s0] sm:$0xff]  ;;  %v15_v4 = vld [vmem:[%s832_s0 + $0x8] sm:$0xff]  ;;  %v16_v5 = vld [vmem:[%s832_s0 + $0x10] sm:$0xff] }
   0x2   :  { %v316_v1 = vld [vmem:[%s833_s1] ss:$0 sm:$0xff]  ;;  %v17_v6 = vld [vmem:[%s832_s0 + $0x18] sm:$0xff]  ;;  %v19_v11 = vld [vmem:[%s832_s0 + $0x28] sm:$0xff] }
   0x3   :  { %v321_v2 = vld [vmem:[%s834_s2] ss:$0 sm:$0xff]  ;;  %v85_v3 = vmul.f32 %v316_v1, %v14_v0  ;;  %v86_v7 = vmul.f32 %v316_v1, %v15_v4  ;;  %v87_v8 = vmul.f32 %v316_v1, %v16_v5  ;;  %v88_v9 = vmul.f32 %v316_v1, %v17_v6  ;;  %v20_v12 = vld [vmem:[%s832_s0 + $0x30] sm:$0xff]  ;;  %v21_v17 = vld [vmem:[%s832_s0 + $0x38] sm:$0xff] }
   0x4   :  { %v18_v10 = vld [vmem:[%s832_s0 + $0x20] sm:$0xff]  ;;  %v90_v15 = vmul.f32 %v316_v1, %v19_v11  ;;  %v91_v16 = vmul.f32 %v316_v1, %v20_v12  ;;  %v23_v19 = vld [vmem:[%s832_s0 + $0x48] sm:$0xff]  ;;  %v92_v23 = vmul.f32 %v316_v1, %v21_v17  ;;  %v24_v24 = vld [vmem:[%s832_s0 + $0x50] sm:$0xff] }
   0x5   :  { %v156_v13 = vadd.f32 %v321_v2, %v85_v3  ;;  %v89_v14 = vmul.f32 %v316_v1, %v18_v10  ;;  %v22_v18 = vld [vmem:[%s832_s0 + $0x40] sm:$0xff]  ;;  %v157_v20 = vadd.f32 %v321_v2, %v86_v7  ;;  %v158_v21 = vadd.f32 %v321_v2, %v87_v8  ;;  %v25_v25 = vld [vmem:[%s832_s0 + $0x58] sm:$0xff] }
   0x6   :  { %v159_v22 = vadd.f32 %v321_v2, %v88_v9  ;;  %v26_v26 = vld [vmem:[%s832_s0 + $0x60] sm:$0xff]  ;;  %v161_v28 = vadd.f32 %v321_v2, %v90_v15  ;;  %v162_v29 = vadd.f32 %v321_v2, %v91_v16  ;;  %v93_v30 = vmul.f32 %v316_v1, %v22_v18 }
   0x7   :  { %220 = vst [vmem:[%s835_s3] sm:$0xff] %v156_v13  ;;  %v160_v27 = vadd.f32 %v321_v2, %v89_v14  ;;  %v163_v34 = vadd.f32 %v321_v2, %v92_v23  ;;  %v94_v35 = vmul.f32 %v316_v1, %v23_v19  ;;  %v95_v36 = vmul.f32 %v316_v1, %v24_v24 }
   0x8   :  { %v96_v37 = vmul.f32 %v316_v1, %v25_v25  ;;  %v164_v39 = vadd.f32 %v321_v2, %v93_v30  ;;  %v97_v40 = vmul.f32 %v316_v1, %v26_v26 }
   0x9   :  { %v165_v46 = vadd.f32 %v321_v2, %v94_v35  ;;  %v166_v47 = vadd.f32 %v321_v2, %v95_v36 }
   0xa   :  { %v167_v48 = vadd.f32 %v321_v2, %v96_v37  ;;  %v168_v53 = vadd.f32 %v321_v2, %v97_v40 }
   0xe   :  { %v27_v31 = vld [vmem:[%s832_s0 + $0x68] sm:$0xff]  ;;  %v28_v32 = vld [vmem:[%s832_s0 + $0x70] sm:$0xff]  ;;  %v29_v33 = vld [vmem:[%s832_s0 + $0x78] sm:$0xff] }
   0xf   :  { %221 = vst [vmem:[%s835_s3 + $0x8] sm:$0xff] %v157_v20  ;;  %222 = vst [vmem:[%s835_s3 + $0x10] sm:$0xff] %v158_v21  ;;  %v98_v41 = vmul.f32 %v316_v1, %v27_v31  ;;  %v99_v42 = vmul.f32 %v316_v1, %v28_v32  ;;  %v100_v49 = vmul.f32 %v316_v1, %v29_v33 }
  0x10   :  { %223 = vst [vmem:[%s835_s3 + $0x18] sm:$0xff] %v159_v22 }
  0x11   :  { %v169_v54 = vadd.f32 %v321_v2, %v98_v41  ;;  %v170_v55 = vadd.f32 %v321_v2, %v99_v42  ;;  %v171_v58 = vadd.f32 %v321_v2, %v100_v49 }
  0x17   :  { %v30_v38 = vld [vmem:[%s832_s0 + $0x80] sm:$0xff] }
  0x18   :  { %224 = vst [vmem:[%s835_s3 + $0x20] sm:$0xff] %v160_v27  ;;  %225 = vst [vmem:[%s835_s3 + $0x28] sm:$0xff] %v161_v28  ;;  %v101_v56 = vmul.f32 %v316_v1, %v30_v38 }
  0x19   :  { %226 = vst [vmem:[%s835_s3 + $0x30] sm:$0xff] %v162_v29 }
  0x1a   :  { %v172_v63 = vadd.f32 %v321_v2, %v101_v56 }
  0x20   :  { %v31_v43 = vld [vmem:[%s832_s0 + $0x88] sm:$0xff]  ;;  %v32_v44 = vld [vmem:[%s832_s0 + $0x90] sm:$0xff]  ;;  %v33_v45 = vld [vmem:[%s832_s0 + $0x98] sm:$0xff] }
  0x21   :  { %227 = vst [vmem:[%s835_s3 + $0x38] sm:$0xff] %v163_v34  ;;  %v102_v59 = vmul.f32 %v316_v1, %v31_v43  ;;  %v103_v60 = vmul.f32 %v316_v1, %v32_v44  ;;  %v104_v61 = vmul.f32 %v316_v1, %v33_v45 }
  0x23   :  { %v173_v8 = vadd.f32 %v321_v2, %v102_v59  ;;  %v174_v9 = vadd.f32 %v321_v2, %v103_v60  ;;  %v175_v10 = vadd.f32 %v321_v2, %v104_v61 }
  0x28   :  { %v34_v50 = vld [vmem:[%s832_s0 + $0xa0] sm:$0xff]  ;;  %v35_v51 = vld [vmem:[%s832_s0 + $0xa8] sm:$0xff]  ;;  %v36_v52 = vld [vmem:[%s832_s0 + $0xb0] sm:$0xff] }
  0x29   :  { %228 = vst [vmem:[%s835_s3 + $0x40] sm:$0xff] %v164_v39  ;;  %v105_v0 = vmul.f32 %v316_v1, %v34_v50  ;;  %v106_v3 = vmul.f32 %v316_v1, %v35_v51  ;;  %v107_v4 = vmul.f32 %v316_v1, %v36_v52 }
  0x2b   :  { %v176_v15 = vadd.f32 %v321_v2, %v105_v0  ;;  %v177_v16 = vadd.f32 %v321_v2, %v106_v3  ;;  %v178_v17 = vadd.f32 %v321_v2, %v107_v4 }
  0x30   :  { %v37_v57 = vld [vmem:[%s832_s0 + $0xb8] sm:$0xff] }
  0x31   :  { %229 = vst [vmem:[%s835_s3 + $0x48] sm:$0xff] %v165_v46  ;;  %230 = vst [vmem:[%s835_s3 + $0x50] sm:$0xff] %v166_v47  ;;  %v108_v11 = vmul.f32 %v316_v1, %v37_v57 }
  0x32   :  { %231 = vst [vmem:[%s835_s3 + $0x58] sm:$0xff] %v167_v48 }
  0x33   :  { %v179_v20 = vadd.f32 %v321_v2, %v108_v11 }
  0x39   :  { %v38_v62 = vld [vmem:[%s832_s0 + $0xc0] sm:$0xff] }
  0x3a   :  { %232 = vst [vmem:[%s835_s3 + $0x60] sm:$0xff] %v168_v53  ;;  %233 = vst [vmem:[%s835_s3 + $0x68] sm:$0xff] %v169_v54  ;;  %v109_v18 = vmul.f32 %v316_v1, %v38_v62 }
  0x3b   :  { %234 = vst [vmem:[%s835_s3 + $0x70] sm:$0xff] %v170_v55 }
  0x3c   :  { %v180_v25 = vadd.f32 %v321_v2, %v109_v18 }
  0x42   :  { %v39_v5 = vld [vmem:[%s832_s0 + $0xc8] sm:$0xff]  ;;  %v40_v6 = vld [vmem:[%s832_s0 + $0xd0] sm:$0xff]  ;;  %v41_v7 = vld [vmem:[%s832_s0 + $0xd8] sm:$0xff] }
  0x43   :  { %235 = vst [vmem:[%s835_s3 + $0x78] sm:$0xff] %v171_v58  ;;  %v110_v21 = vmul.f32 %v316_v1, %v39_v5  ;;  %v111_v22 = vmul.f32 %v316_v1, %v40_v6  ;;  %v112_v23 = vmul.f32 %v316_v1, %v41_v7 }
  0x45   :  { %v181_v32 = vadd.f32 %v321_v2, %v110_v21  ;;  %v182_v33 = vadd.f32 %v321_v2, %v111_v22  ;;  %v183_v34 = vadd.f32 %v321_v2, %v112_v23 }
  0x4a   :  { %v42_v12 = vld [vmem:[%s832_s0 + $0xe0] sm:$0xff]  ;;  %v43_v13 = vld [vmem:[%s832_s0 + $0xe8] sm:$0xff]  ;;  %v44_v14 = vld [vmem:[%s832_s0 + $0xf0] sm:$0xff] }
  0x4b   :  { %236 = vst [vmem:[%s835_s3 + $0x80] sm:$0xff] %v172_v63  ;;  %v113_v26 = vmul.f32 %v316_v1, %v42_v12  ;;  %v114_v27 = vmul.f32 %v316_v1, %v43_v13  ;;  %v115_v28 = vmul.f32 %v316_v1, %v44_v14 }
  0x4d   :  { %v184_v39 = vadd.f32 %v321_v2, %v113_v26  ;;  %v185_v40 = vadd.f32 %v321_v2, %v114_v27  ;;  %v186_v41 = vadd.f32 %v321_v2, %v115_v28 }
  0x52   :  { %v45_v19 = vld [vmem:[%s832_s0 + $0xf8] sm:$0xff] }
  0x53   :  { %237 = vst [vmem:[%s835_s3 + $0x88] sm:$0xff] %v173_v8  ;;  %238 = vst [vmem:[%s835_s3 + $0x90] sm:$0xff] %v174_v9  ;;  %v116_v35 = vmul.f32 %v316_v1, %v45_v19 }
  0x54   :  { %239 = vst [vmem:[%s835_s3 + $0x98] sm:$0xff] %v175_v10 }
  0x55   :  { %v187_v44 = vadd.f32 %v321_v2, %v116_v35 }
  0x5b   :  { %v46_v24 = vld [vmem:[%s832_s0 + $0x100] sm:$0xff] }
  0x5c   :  { %240 = vst [vmem:[%s835_s3 + $0xa0] sm:$0xff] %v176_v15  ;;  %241 = vst [vmem:[%s835_s3 + $0xa8] sm:$0xff] %v177_v16  ;;  %v117_v42 = vmul.f32 %v316_v1, %v46_v24 }
  0x5d   :  { %242 = vst [vmem:[%s835_s3 + $0xb0] sm:$0xff] %v178_v17 }
  0x5e   :  { %v188_v49 = vadd.f32 %v321_v2, %v117_v42 }
  0x64   :  { %v47_v29 = vld [vmem:[%s832_s0 + $0x108] sm:$0xff]  ;;  %v48_v30 = vld [vmem:[%s832_s0 + $0x110] sm:$0xff]  ;;  %v49_v31 = vld [vmem:[%s832_s0 + $0x118] sm:$0xff] }
  0x65   :  { %243 = vst [vmem:[%s835_s3 + $0xb8] sm:$0xff] %v179_v20  ;;  %v118_v45 = vmul.f32 %v316_v1, %v47_v29  ;;  %v119_v46 = vmul.f32 %v316_v1, %v48_v30  ;;  %v120_v47 = vmul.f32 %v316_v1, %v49_v31 }
  0x67   :  { %v189_v56 = vadd.f32 %v321_v2, %v118_v45  ;;  %v190_v57 = vadd.f32 %v321_v2, %v119_v46  ;;  %v191_v58 = vadd.f32 %v321_v2, %v120_v47 }
  0x6c   :  { %v50_v36 = vld [vmem:[%s832_s0 + $0x120] sm:$0xff]  ;;  %v51_v37 = vld [vmem:[%s832_s0 + $0x128] sm:$0xff]  ;;  %v52_v38 = vld [vmem:[%s832_s0 + $0x130] sm:$0xff] }
  0x6d   :  { %244 = vst [vmem:[%s835_s3 + $0xc0] sm:$0xff] %v180_v25  ;;  %v121_v50 = vmul.f32 %v316_v1, %v50_v36  ;;  %v122_v51 = vmul.f32 %v316_v1, %v51_v37  ;;  %v123_v52 = vmul.f32 %v316_v1, %v52_v38 }
  0x6f   :  { %v192_v63 = vadd.f32 %v321_v2, %v121_v50  ;;  %v193_v0 = vadd.f32 %v321_v2, %v122_v51  ;;  %v194_v3 = vadd.f32 %v321_v2, %v123_v52 }
  0x74   :  { %v53_v43 = vld [vmem:[%s832_s0 + $0x138] sm:$0xff] }
  0x75   :  { %245 = vst [vmem:[%s835_s3 + $0xc8] sm:$0xff] %v181_v32  ;;  %246 = vst [vmem:[%s835_s3 + $0xd0] sm:$0xff] %v182_v33  ;;  %v124_v59 = vmul.f32 %v316_v1, %v53_v43 }
  0x76   :  { %247 = vst [vmem:[%s835_s3 + $0xd8] sm:$0xff] %v183_v34 }
  0x77   :  { %v195_v6 = vadd.f32 %v321_v2, %v124_v59 }
  0x7d   :  { %v54_v48 = vld [vmem:[%s832_s0 + $0x140] sm:$0xff] }
  0x7e   :  { %248 = vst [vmem:[%s835_s3 + $0xe0] sm:$0xff] %v184_v39  ;;  %249 = vst [vmem:[%s835_s3 + $0xe8] sm:$0xff] %v185_v40  ;;  %v125_v4 = vmul.f32 %v316_v1, %v54_v48 }
  0x7f   :  { %250 = vst [vmem:[%s835_s3 + $0xf0] sm:$0xff] %v186_v41 }
  0x80   :  { %v196_v11 = vadd.f32 %v321_v2, %v125_v4 }
  0x86   :  { %v55_v53 = vld [vmem:[%s832_s0 + $0x148] sm:$0xff]  ;;  %v56_v54 = vld [vmem:[%s832_s0 + $0x150] sm:$0xff]  ;;  %v57_v55 = vld [vmem:[%s832_s0 + $0x158] sm:$0xff] }
  0x87   :  { %251 = vst [vmem:[%s835_s3 + $0xf8] sm:$0xff] %v187_v44  ;;  %v126_v7 = vmul.f32 %v316_v1, %v55_v53  ;;  %v127_v8 = vmul.f32 %v316_v1, %v56_v54  ;;  %v128_v9 = vmul.f32 %v316_v1, %v57_v55 }
  0x89   :  { %v197_v18 = vadd.f32 %v321_v2, %v126_v7  ;;  %v198_v19 = vadd.f32 %v321_v2, %v127_v8  ;;  %v199_v20 = vadd.f32 %v321_v2, %v128_v9 }
  0x8e   :  { %v58_v60 = vld [vmem:[%s832_s0 + $0x160] sm:$0xff]  ;;  %v59_v61 = vld [vmem:[%s832_s0 + $0x168] sm:$0xff]  ;;  %v60_v62 = vld [vmem:[%s832_s0 + $0x170] sm:$0xff] }
  0x8f   :  { %252 = vst [vmem:[%s835_s3 + $0x100] sm:$0xff] %v188_v49  ;;  %v129_v12 = vmul.f32 %v316_v1, %v58_v60  ;;  %v130_v13 = vmul.f32 %v316_v1, %v59_v61  ;;  %v131_v14 = vmul.f32 %v316_v1, %v60_v62 }
  0x91   :  { %v200_v25 = vadd.f32 %v321_v2, %v129_v12  ;;  %v201_v26 = vadd.f32 %v321_v2, %v130_v13  ;;  %v202_v27 = vadd.f32 %v321_v2, %v131_v14 }
  0x96   :  { %v61_v5 = vld [vmem:[%s832_s0 + $0x178] sm:$0xff] }
  0x97   :  { %253 = vst [vmem:[%s835_s3 + $0x108] sm:$0xff] %v189_v56  ;;  %254 = vst [vmem:[%s835_s3 + $0x110] sm:$0xff] %v190_v57  ;;  %v132_v21 = vmul.f32 %v316_v1, %v61_v5 }
  0x98   :  { %255 = vst [vmem:[%s835_s3 + $0x118] sm:$0xff] %v191_v58 }
  0x99   :  { %v203_v30 = vadd.f32 %v321_v2, %v132_v21 }
  0x9f   :  { %v62_v10 = vld [vmem:[%s832_s0 + $0x180] sm:$0xff] }
  0xa0   :  { %256 = vst [vmem:[%s835_s3 + $0x120] sm:$0xff] %v192_v63  ;;  %257 = vst [vmem:[%s835_s3 + $0x128] sm:$0xff] %v193_v0  ;;  %v133_v28 = vmul.f32 %v316_v1, %v62_v10 }
  0xa1   :  { %258 = vst [vmem:[%s835_s3 + $0x130] sm:$0xff] %v194_v3 }
  0xa2   :  { %v204_v35 = vadd.f32 %v321_v2, %v133_v28 }
  0xa8   :  { %v63_v15 = vld [vmem:[%s832_s0 + $0x188] sm:$0xff]  ;;  %v64_v16 = vld [vmem:[%s832_s0 + $0x190] sm:$0xff]  ;;  %v65_v17 = vld [vmem:[%s832_s0 + $0x198] sm:$0xff] }
  0xa9   :  { %259 = vst [vmem:[%s835_s3 + $0x138] sm:$0xff] %v195_v6  ;;  %v134_v31 = vmul.f32 %v316_v1, %v63_v15  ;;  %v135_v32 = vmul.f32 %v316_v1, %v64_v16  ;;  %v136_v33 = vmul.f32 %v316_v1, %v65_v17 }
  0xab   :  { %v205_v42 = vadd.f32 %v321_v2, %v134_v31  ;;  %v206_v43 = vadd.f32 %v321_v2, %v135_v32  ;;  %v207_v44 = vadd.f32 %v321_v2, %v136_v33 }
  0xb0   :  { %v66_v22 = vld [vmem:[%s832_s0 + $0x1a0] sm:$0xff]  ;;  %v67_v23 = vld [vmem:[%s832_s0 + $0x1a8] sm:$0xff]  ;;  %v68_v24 = vld [vmem:[%s832_s0 + $0x1b0] sm:$0xff] }
  0xb1   :  { %260 = vst [vmem:[%s835_s3 + $0x140] sm:$0xff] %v196_v11  ;;  %v137_v36 = vmul.f32 %v316_v1, %v66_v22  ;;  %v138_v37 = vmul.f32 %v316_v1, %v67_v23  ;;  %v139_v38 = vmul.f32 %v316_v1, %v68_v24 }
  0xb3   :  { %v208_v49 = vadd.f32 %v321_v2, %v137_v36  ;;  %v209_v50 = vadd.f32 %v321_v2, %v138_v37  ;;  %v210_v51 = vadd.f32 %v321_v2, %v139_v38 }
  0xb8   :  { %v69_v29 = vld [vmem:[%s832_s0 + $0x1b8] sm:$0xff] }
  0xb9   :  { %261 = vst [vmem:[%s835_s3 + $0x148] sm:$0xff] %v197_v18  ;;  %262 = vst [vmem:[%s835_s3 + $0x150] sm:$0xff] %v198_v19  ;;  %v140_v45 = vmul.f32 %v316_v1, %v69_v29 }
  0xba   :  { %263 = vst [vmem:[%s835_s3 + $0x158] sm:$0xff] %v199_v20 }
  0xbb   :  { %v211_v54 = vadd.f32 %v321_v2, %v140_v45 }
  0xc1   :  { %v70_v34 = vld [vmem:[%s832_s0 + $0x1c0] sm:$0xff] }
  0xc2   :  { %264 = vst [vmem:[%s835_s3 + $0x160] sm:$0xff] %v200_v25  ;;  %265 = vst [vmem:[%s835_s3 + $0x168] sm:$0xff] %v201_v26  ;;  %v141_v52 = vmul.f32 %v316_v1, %v70_v34 }
  0xc3   :  { %266 = vst [vmem:[%s835_s3 + $0x170] sm:$0xff] %v202_v27 }
  0xc4   :  { %v212_v58 = vadd.f32 %v321_v2, %v141_v52 }
  0xca   :  { %v71_v39 = vld [vmem:[%s832_s0 + $0x1c8] sm:$0xff]  ;;  %v72_v40 = vld [vmem:[%s832_s0 + $0x1d0] sm:$0xff]  ;;  %v73_v41 = vld [vmem:[%s832_s0 + $0x1d8] sm:$0xff] }
  0xcb   :  { %267 = vst [vmem:[%s835_s3 + $0x178] sm:$0xff] %v203_v30  ;;  %v142_v55 = vmul.f32 %v316_v1, %v71_v39  ;;  %v143_v56 = vmul.f32 %v316_v1, %v72_v40  ;;  %v144_v57 = vmul.f32 %v316_v1, %v73_v41 }
  0xcd   :  { %v213_v62 = vadd.f32 %v321_v2, %v142_v55  ;;  %v214_v63 = vadd.f32 %v321_v2, %v143_v56  ;;  %v215_v0 = vadd.f32 %v321_v2, %v144_v57 }
  0xd2   :  { %v74_v46 = vld [vmem:[%s832_s0 + $0x1e0] sm:$0xff]  ;;  %v75_v47 = vld [vmem:[%s832_s0 + $0x1e8] sm:$0xff]  ;;  %v76_v48 = vld [vmem:[%s832_s0 + $0x1f0] sm:$0xff] }
  0xd3   :  { %268 = vst [vmem:[%s835_s3 + $0x180] sm:$0xff] %v204_v35  ;;  %v145_v59 = vmul.f32 %v316_v1, %v74_v46  ;;  %v146_v60 = vmul.f32 %v316_v1, %v75_v47  ;;  %v147_v61 = vmul.f32 %v316_v1, %v76_v48 }
  0xd5   :  { %v216_v4 = vadd.f32 %v321_v2, %v145_v59  ;;  %v217_v5 = vadd.f32 %v321_v2, %v146_v60  ;;  %v218_v6 = vadd.f32 %v321_v2, %v147_v61 }
  0xda   :  { %v77_v53 = vld [vmem:[%s832_s0 + $0x1f8] sm:$0xff] }
  0xdb   :  { %269 = vst [vmem:[%s835_s3 + $0x188] sm:$0xff] %v205_v42  ;;  %270 = vst [vmem:[%s835_s3 + $0x190] sm:$0xff] %v206_v43  ;;  %v148_v3 = vmul.f32 %v316_v1, %v77_v53 }
  0xdc   :  { %271 = vst [vmem:[%s835_s3 + $0x198] sm:$0xff] %v207_v44  ;;  %272 = vst [vmem:[%s835_s3 + $0x1a0] sm:$0xff] %v208_v49 }
  0xdd   :  { %273 = vst [vmem:[%s835_s3 + $0x1a8] sm:$0xff] %v209_v50  ;;  %274 = vst [vmem:[%s835_s3 + $0x1b0] sm:$0xff] %v210_v51  ;;  %v219_v1 = vadd.f32 %v321_v2, %v148_v3 }
  0xde   :  { %275 = vst [vmem:[%s835_s3 + $0x1b8] sm:$0xff] %v211_v54  ;;  %276 = vst [vmem:[%s835_s3 + $0x1c0] sm:$0xff] %v212_v58 }
  0xdf   :  { %277 = vst [vmem:[%s835_s3 + $0x1c8] sm:$0xff] %v213_v62  ;;  %278 = vst [vmem:[%s835_s3 + $0x1d0] sm:$0xff] %v214_v63 }
  0xe0   :  { %279 = vst [vmem:[%s835_s3 + $0x1d8] sm:$0xff] %v215_v0  ;;  %280 = vst [vmem:[%s835_s3 + $0x1e0] sm:$0xff] %v216_v4 }
  0xe1   :  { %281 = vst [vmem:[%s835_s3 + $0x1e8] sm:$0xff] %v217_v5  ;;  %282 = vst [vmem:[%s835_s3 + $0x1f0] sm:$0xff] %v218_v6 }
  0xe2   :  { %283 = vst [vmem:[%s835_s3 + $0x1f8] sm:$0xff] %v219_v1 }

// kernel: separable_conv2d2.3
= control target key start
LH: loop header
LB: loop body
LE: loop exit
PB: predicated region body
PF: predicated region fallthrough
CT: control target
= control target key end

     0   :  { %s2994_s24 = smov 0   ;;  %s4420_s0 = inlined_call_operand.vmem [shape: f32[2,16,16,128], index: 0, kind: input, shape index: {}]   ;;  %s4421_s1 = inlined_call_operand.vmem [shape: f32[1,128], index: 1, kind: input, shape index: {}]   ;;  %s4422_s2 = inlined_call_operand.vmem [shape: f32[1,128], index: 2, kind: input, shape index: {}]   ;;  %s4423_s3 = inlined_call_operand.vmem [shape: f32[9,128], index: 3, kind: input, shape index: {}]   ;;  %s4424_s4 = inlined_call_operand.vmem [shape: f32[128,128], index: 4, kind: input, shape index: {}]   ;;  %s4425_s5 = inlined_call_operand.vmem [shape: f32[2,16,16,128], index: 5, kind: output, shape index: {0}]   ;;  %s4426_s6 = inlined_call_operand.vmem [shape: f32[2,1,128], index: 6, kind: output, shape index: {1}]   ;;  %s4427_s7 = inlined_call_operand.vmem [shape: f32[2,1,128], index: 7, kind: output, shape index: {2}]  }
   0x1 LB: > { %s2737_s25 = sadd.s32 4294967295, %s2951_s24   ;;  %p2741_p0 = scmp.ge.s32.totalorder %s2951_s24, 1  ;;  %s2951_s24 = sphi %s2994_s24, %s18_s24  }
   0x2   : > { %p242_p1 = scmp.lt.s32.totalorder %s2951_s24, 3 }
   0x4   : > { %p243_p2 = pnand %p2741_p0, %p242_p1 }
   0x5   : > { %v2251_v0 = vld [vmem:[%s4424_s4] sm:$0xff] (!%p243_p2)  ;;  %v2252_v1 = vld [vmem:[%s4424_s4 + $0x8] sm:$0xff] (!%p243_p2)  ;;  %v2253_v2 = vld [vmem:[%s4424_s4 + $0x10] sm:$0xff] (!%p243_p2)  ;;  %p3013_p3 = scmp.lt.s32.totalorder (!%p243_p2), %s2737_s25, 1  ;;  %v581_v3 = vlaneseq (!%p243_p2)  ;;  %v2953_v8 = vmov (!%p243_p2), 0.0   ;;  %vm749_vm0 = vcmask (!%p243_p2), 1046528  }
   0x6   : > { %246 = sbr.rel (%p243_p2) target bundleno = 573 (0x23d), region = 40  ;;  %v3017_v4 = vpack.c.bf16 (!%p243_p2), %v2252_v1, %v2251_v0  ;;  %v2254_v5 = vld [vmem:[%s4424_s4 + $0x18] sm:$0xff] (!%p243_p2)  ;;  %v3025_v6 = vld [vmem:[%s4424_s4 + $0x20] sm:$0xff] (!%p243_p2)  ;;  %v3030_v7 = vld [vmem:[%s4424_s4 + $0x28] sm:$0xff] (!%p243_p2)  ;;  %296 = vst [vmem:[#allocation2] sm:$0xff] (!%p243_p2), %v2953_v8  ;;  %vm994_vm1 = vcmask (!%p243_p2), 1045504  }
   0x7   : > { %299 = vst [vmem:[#allocation2 + $0x18] sm:$0xff] (!%p243_p2), %v2953_v8  ;;  %300 = vst [vmem:[#allocation2 + $0x20] sm:$0xff] (!%p243_p2), %v2953_v8  ;;  %v2885_v9 = vpack.c.bf16 (!%p243_p2), %v2254_v5, %v2253_v2  ;;  %v2257_v10 = vld [vmem:[%s4424_s4 + $0x30] sm:$0xff] (!%p243_p2)  ;;  %v2258_v11 = vld [vmem:[%s4424_s4 + $0x38] sm:$0xff] (!%p243_p2)  ;;  %v3047_v13 = vshrl.u32 (!%p243_p2), %v581_v3, 7  ;;  %v3063_v17 = vpack.c.bf16 (!%p243_p2), %v3030_v7, %v3025_v6 }
   0x8   : > { %301 = vst [vmem:[#allocation2 + $0x28] sm:$0x3] (!%p243_p2), %v2953_v8  ;;  %302 = vst [vmem:[#allocation2 + $0x30] sm:$0xff] (!%p243_p2), %v2953_v8  ;;  %v2259_v12 = vld [vmem:[%s4424_s4 + $0x40] sm:$0xff] (!%p243_p2)  ;;  %2882 = vmatprep.subr.bf16.mxu0 (!%p243_p2), %v3017_v4  ;;  %v2260_v14 = vld [vmem:[%s4424_s4 + $0x48] sm:$0xff] (!%p243_p2)  ;;  %2913 = vmatprep.subr.bf16.mxu1 (!%p243_p2), %v3017_v4  ;;  %v3065_v18 = vpack.c.bf16 (!%p243_p2), %v2258_v11, %v2257_v10 }
   0x9   : > { %303 = vst [vmem:[#allocation2 + $0x38] sm:$0xff] (!%p243_p2), %v2953_v8  ;;  %304 = vst [vmem:[#allocation2 + $0x40] sm:$0x3] (!%p243_p2), %v2953_v8  ;;  %v2261_v15 = vld [vmem:[%s4424_s4 + $0x50] sm:$0xff] (!%p243_p2)  ;;  %v2262_v16 = vld [vmem:[%s4424_s4 + $0x58] sm:$0xff] (!%p243_p2)  ;;  %2884 = vmatpush3.bf16.msra.mxu0 (!%p243_p2), %v3017_v4  ;;  %v583_v22 = vsub.s32 (!%p243_p2), 0, %v3047_v13  ;;  %2921 = vmatpush3.bf16.msra.mxu1 (!%p243_p2), %v3017_v4  ;;  %v3080_v24 = vpack.c.bf16 (!%p243_p2), %v2260_v14, %v2259_v12 }
   0xa   : > { %298 = vst [vmem:[#allocation2 + $0x10] sm:$0x3] (!%p243_p2), %v2953_v8  ;;  %305 = vst [vmem:[#allocation2 + $0x48] sm:$0xff] (!%p243_p2), %v2953_v8  ;;  %v2263_v19 = vld [vmem:[%s4424_s4 + $0x60] sm:$0xff] (!%p243_p2)  ;;  %v2264_v20 = vld [vmem:[%s4424_s4 + $0x68] sm:$0xff] (!%p243_p2)  ;;  %v651_v23 = vsub.s32 (!%p243_p2), 1, %v3047_v13  ;;  %2886 = vmatprep.subr.bf16.mxu0 (!%p243_p2), %v2885_v9  ;;  %v3082_v25 = vpack.c.bf16 (!%p243_p2), %v2262_v16, %v2261_v15  ;;  %2914 = vmatprep.subr.bf16.mxu1 (!%p243_p2), %v2885_v9 }
   0xb   : > { %306 = vst [vmem:[#allocation2 + $0x50] sm:$0xff] (!%p243_p2), %v2953_v8  ;;  %307 = vst [vmem:[#allocation2 + $0x58] sm:$0x3] (!%p243_p2), %v2953_v8  ;;  %v2265_v21 = vld [vmem:[%s4424_s4 + $0x70] sm:$0xff] (!%p243_p2)  ;;  %v3084_v26 = vpack.c.bf16 (!%p243_p2), %v2264_v20, %v2263_v19  ;;  %v2266_v27 = vld [vmem:[%s4424_s4 + $0x78] sm:$0xff] (!%p243_p2)  ;;  %v896_v30 = vsub.s32 (!%p243_p2), 2, %v3047_v13 }
   0xc   : > { %308 = vst [vmem:[#allocation2 + $0x60] sm:$0xff] (!%p243_p2), %v2953_v8  ;;  %309 = vst [vmem:[#allocation2 + $0x68] sm:$0xff] (!%p243_p2), %v2953_v8  ;;  %v3099_v28 = vld [vmem:[%s4421_s1] ss:$0 sm:$0xff] (!%p243_p2)  ;;  %v3107_v31 = vpack.c.bf16 (!%p243_p2), %v2266_v27, %v2265_v21  ;;  %v1141_v35 = vsub.s32 (!%p243_p2), 3, %v3047_v13  ;;  %v1209_v36 = vsub.s32 (!%p243_p2), 4, %v3047_v13 }
   0xd   : > { %310 = vst [vmem:[#allocation2 + $0x70] sm:$0x3] %v2953_v8  ;;  %311 = vst [vmem:[#allocation2 + $0x78] sm:$0xff] %v2953_v8  ;;  %s4430_s25 = smov (!%p3013_p3, %s2737_s25), 1  ;;  %v3104_v29 = vld [vmem:[%s4422_s2] ss:$0 sm:$0xff]  ;;  %2888 = vmatpush3.bf16.msra.mxu0 %v2885_v9  ;;  %2922 = vmatpush3.bf16.msra.mxu1 %v2885_v9 }
   0xe   : > { %312 = vst [vmem:[#allocation2 + $0x80] sm:$0xff] %v2953_v8  ;;  %313 = vst [vmem:[#allocation2 + $0x88] sm:$0x3] %v2953_v8  ;;  %s2751_s13 = sshll.u32 %s4430_s25, 8  ;;  %v1453_v37 = vsub.s32 5, %v3047_v13  ;;  %v579_v42 = vld [vmem:[%s4423_s3] sm:$0xff]  ;;  %2890 = vmatprep.subr.bf16.mxu0 %v3063_v17  ;;  %2915 = vmatprep.subr.bf16.mxu1 %v3063_v17  ;;  %s292_s23 = scalar_lea.vmem %s4426_s6, %s4430_s25 }
   0xf   : > { %314 = vst [vmem:[#allocation2 + $0x90] sm:$0xff] %v2953_v8  ;;  %315 = vst [vmem:[#allocation2 + $0x98] sm:$0xff] %v2953_v8  ;;  %s3094_s18 = scalar_lea.vmem %s4420_s0, %s2751_s13  ;;  %v1697_v43 = vsub.s32 6, %v3047_v13  ;;  %v3124_v45 = vrot.slane %v579_v42, %v583_v22  ;;  %v3126_v46 = vrot.slane %v579_v42, %v651_v23  ;;  %v3128_v47 = vrot.slane %v579_v42, %v896_v30  ;;  %s4137_s20 = scalar_lea.vmem %s4425_s5, %s2751_s13 }
  0x10   : > { %316 = vst [vmem:[#allocation2 + $0xa0] sm:$0x3] %v2953_v8  ;;  %317 = vst [vmem:[#allocation2 + $0xa8] sm:$0xff] %v2953_v8  ;;  %v350_v32 = vld [vmem:[%s3094_s18] sm:$0xff]  ;;  %v351_v33 = vld [vmem:[%s3094_s18 + $0x8] sm:$0xff]  ;;  %v3134_v51 = vrot.slane %v579_v42, %v1141_v35  ;;  %v3140_v60 = vrot.slane %v579_v42, %v1209_v36  ;;  %v3146_v2 = vrot.slane %v579_v42, %v1453_v37  ;;  %v1765_v4 = vsub.s32 7, %v3047_v13  ;;  %s295_s28 = scalar_lea.vmem %s4427_s7, %s4430_s25 }
  0x11   : > { %318 = vst [vmem:[#allocation2 + $0xb0] sm:$0xff] %v2953_v8  ;;  %319 = vst [vmem:[#allocation2 + $0xb8] sm:$0x3] %v2953_v8  ;;  %v352_v34 = vld [vmem:[%s3094_s18 + $0x10] sm:$0xff]  ;;  %v353_v38 = vld [vmem:[%s3094_s18 + $0x18] sm:$0xff]  ;;  %v389_v39 = vmul.f32 %v3099_v28, %v350_v32  ;;  %v390_v40 = vmul.f32 %v3099_v28, %v351_v33  ;;  %v585_v53 = vmul.f32 0.0, %v3124_v45  ;;  %2892 = vmatpush3.bf16.msra.mxu0 %v3063_v17  ;;  %2923 = vmatpush3.bf16.msra.mxu1 %v3063_v17 }
  0x12   : > { %320 = vst [vmem:[#allocation2 + $0xc0] sm:$0xff] %v2953_v8  ;;  %321 = vst [vmem:[#allocation2 + $0xc8] sm:$0xff] %v2953_v8  ;;  %v391_v41 = vmul.f32 %v3099_v28, %v352_v34  ;;  %v392_v44 = vmul.f32 %v3099_v28, %v353_v38  ;;  %v653_v54 = vmul.f32 0.0, %v3126_v46  ;;  %v898_v55 = vmul.f32 0.0, %v3128_v47  ;;  %v527_v56 = vld [vmem:[#allocation2 + $0x10] sm:$0x3]  ;;  %2894 = vmatprep.subr.bf16.mxu0 %v3065_v18 }
  0x13   : > { %322 = vst [vmem:[#allocation2 + $0xd0] sm:$0x3] %v2953_v8  ;;  %323 = vst [vmem:[#allocation2 + $0xd8] sm:$0xff] %v2953_v8  ;;  %v428_v48 = vadd.f32 %v3104_v29, %v389_v39  ;;  %v429_v49 = vadd.f32 %v3104_v29, %v390_v40  ;;  %v354_v61 = vld [vmem:[%s3094_s18 + $0x20] sm:$0xff]  ;;  %v355_v62 = vld [vmem:[%s3094_s18 + $0x28] sm:$0xff]  ;;  %v3149_v3 = vrot.slane %v579_v42, %v1697_v43  ;;  %2916 = vmatprep.subr.bf16.mxu1 %v3065_v18 }
  0x14   : > { %324 = vst [vmem:[#allocation2 + $0xe0] sm:$0xff] %v2953_v8  ;;  %325 = vst [vmem:[#allocation2 + $0xe8] sm:$0x3] %v2953_v8  ;;  %v430_v50 = vadd.f32 %v3104_v29, %v391_v41  ;;  %v431_v52 = vadd.f32 %v3104_v29, %v392_v44  ;;  %v750_v0 = vrot.slane %v653_v54, 1  ;;  %v995_v1 = vrot.slane %v898_v55, 2  ;;  %v356_v7 = vld [vmem:[%s3094_s18 + $0x30] sm:$0xff] }
  0x15   : > { %326 = vst [vmem:[#allocation2 + $0xf0] sm:$0xff] %v2953_v8  ;;  %327 = vst [vmem:[#allocation2 + $0xf8] sm:$0xff] %v2953_v8  ;;  %v460_v57 = vmax.f32 %v428_v48, 0.0  ;;  %v461_v58 = vmax.f32 %v429_v49, 0.0  ;;  %v655_v5 = vmul.f32 %v3126_v46, %v527_v56  ;;  %v900_v6 = vmul.f32 %v3128_v47, %v527_v56  ;;  %v358_v11 = vld [vmem:[%s3094_s18 + $0x40] sm:$0xff]  ;;  %2896 = vmatpush3.bf16.msra.mxu0 %v3065_v18  ;;  %v359_v21 = vld [vmem:[%s3094_s18 + $0x48] sm:$0xff] }
  0x16   : > { %328 = vst [vmem:[#allocation2 + $0x100] sm:$0x3] %v2953_v8  ;;  %329 = vst [vmem:[#allocation2 + $0x108] sm:$0xff] %v2953_v8  ;;  %v462_v59 = vmax.f32 %v430_v50, 0.0  ;;  %v463_v63 = vmax.f32 %v431_v52, 0.0  ;;  %v393_v9 = vmul.f32 %v3099_v28, %v354_v61  ;;  %v394_v10 = vmul.f32 %v3099_v28, %v355_v62  ;;  %v360_v22 = vld [vmem:[%s3094_s18 + $0x50] sm:$0xff]  ;;  %2898 = vmatprep.subr.bf16.mxu0 %v3080_v24 }
  0x17   : > { %330 = vst [vmem:[#allocation2 + $0x110] sm:$0xff] %v2953_v8  ;;  %331 = vst [vmem:[#allocation2 + $0x118] sm:$0x3] %v2953_v8  ;;  %v862_v12 = vadd.f32 %v750_v0, %v585_v53  ;;  %v3160_v14 = vrot.slane %v579_v42, %v1765_v4  ;;  %v753_v13 = vrot.slane %v655_v5, 1  ;;  %v998_v15 = vrot.slane %v900_v6, 2  ;;  %v361_v33 = vld [vmem:[%s3094_s18 + $0x58] sm:$0xff]  ;;  %2924 = vmatpush3.bf16.msra.mxu1 %v3065_v18 }
  0x18   : > { %332 = vst [vmem:[#allocation2 + $0x120] sm:$0xff] %v2953_v8  ;;  %333 = vst [vmem:[#allocation2 + $0x128] sm:$0xff] %v2953_v8  ;;  %v432_v16 = vadd.f32 %v3104_v29, %v393_v9  ;;  %v433_v19 = vadd.f32 %v3104_v29, %v394_v10  ;;  %v395_v20 = vmul.f32 %v3099_v28, %v356_v7  ;;  %v362_v34 = vld [vmem:[%s3094_s18 + $0x60] sm:$0xff]  ;;  %2917 = vmatprep.subr.bf16.mxu1 %v3080_v24  ;;  %v3210_v54 = vld [vmem:[%s4423_s3 + $0x8] ss:$0 sm:$0xff] }
  0x19   : > { %334 = vst [vmem:[#allocation2 + $0x130] sm:$0x3] %v2953_v8  ;;  %335 = vst [vmem:[#allocation2 + $0x138] sm:$0xff] %v2953_v8  ;;  %v1107_v23 = vadd.f32 %v995_v1, %v862_v12  ;;  %v754_v27 = vsel %vm749_vm0, %v750_v0, %v753_v13  ;;  %v999_v30 = vsel %vm994_vm1, %v995_v1, %v998_v15  ;;  %2900 = vmatpush3.bf16.msra.mxu0 %v3080_v24 }
  0x1a   : > { %336 = vst [vmem:[#allocation2 + $0x140] sm:$0xff] %v2953_v8  ;;  %337 = vst [vmem:[#allocation2 + $0x148] sm:$0x3] %v2953_v8  ;;  %v397_v32 = vmul.f32 %v3099_v28, %v358_v11  ;;  %v863_v35 = vadd.f32 %v754_v27, %v585_v53  ;;  %v464_v36 = vmax.f32 %v432_v16, 0.0  ;;  %v465_v37 = vmax.f32 %v433_v19, 0.0  ;;  %2902 = vmatprep.subr.bf16.mxu0 %v3082_v25 }
  0x1b   : > { %338 = vst [vmem:[#allocation2 + $0x150] sm:$0xff] %v2953_v8  ;;  %339 = vst [vmem:[#allocation2 + $0x158] sm:$0xff] %v2953_v8  ;;  %v434_v38 = vadd.f32 %v3104_v29, %v395_v20  ;;  %v3182_v40 = vmul.f32 %v3099_v28, %v359_v21  ;;  %v3189_v42 = vmul.f32 %v3099_v28, %v360_v22  ;;  %2925 = vmatpush3.bf16.msra.mxu1 %v3080_v24 }
  0x1c   : > { %340 = vst [vmem:[#allocation2 + $0x160] sm:$0x3] %v2953_v8  ;;  %341 = vst [vmem:[#allocation2 + $0x168] sm:$0xff] %v2953_v8  ;;  %v3185_v41 = vadd.f32 %v3104_v29, %v397_v32  ;;  %v1108_v18 = vadd.f32 %v999_v30, %v863_v35  ;;  %v3197_v49 = vmul.f32 %v3099_v28, %v361_v33  ;;  %2918 = vmatprep.subr.bf16.mxu1 %v3082_v25 }
  0x1d   : > { %342 = vst [vmem:[#allocation2 + $0x170] sm:$0xff] %v2953_v8  ;;  %343 = vst [vmem:[#allocation2 + $0x178] sm:$0x3] %v2953_v8  ;;  %v466_v48 = vmax.f32 %v434_v38, 0.0  ;;  %v3200_v50 = vmul.f32 %v3099_v28, %v362_v34  ;;  %2904 = vmatpush3.bf16.msra.mxu0 %v3082_v25 }
  0x1e   : > { %344 = vst [vmem:[#allocation2 + $0x180] sm:$0xff] %v2953_v8  ;;  %345 = vst [vmem:[#allocation2 + $0x188] sm:$0xff] %v2953_v8  ;;  %2906 = vmatprep.subr.bf16.mxu0 %v3084_v26 }
  0x1f   : > { %346 = vst [vmem:[#allocation2 + $0x190] sm:$0x3] %v2953_v8  ;;  %349 = vst [vmem:[#allocation2 + $0x1a8] sm:$0x3] %v2953_v8  ;;  %v357_v8 = vld [vmem:[%s3094_s18 + $0x38] sm:$0xff]  ;;  %2926 = vmatpush3.bf16.msra.mxu1 %v3082_v25 }
  0x20   : > { %493 = vst [vmem:[#allocation2 + $0x19] sm:$0xff] %v460_v57  ;;  %494 = vst [vmem:[#allocation2 + $0x21] sm:$0xff] %v461_v58  ;;  %v396_v17 = vmul.f32 %v3099_v28, %v357_v8  ;;  %2919 = vmatprep.subr.bf16.mxu1 %v3084_v26 }
  0x21   : > { %495 = vst [vmem:[#allocation2 + $0x31] sm:$0xff] %v462_v59  ;;  %496 = vst [vmem:[#allocation2 + $0x39] sm:$0xff] %v463_v63  ;;  %2908 = vmatpush3.bf16.msra.mxu0 %v3084_v26 }
  0x22   : > { %v3179_v39 = vadd.f32 %v3104_v29, %v396_v17  ;;  %497 = vst [vmem:[#allocation2 + $0x49] sm:$0xff] %v464_v36  ;;  %498 = vst [vmem:[#allocation2 + $0x51] sm:$0xff] %v465_v37  ;;  %2910 = vmatprep.subr.bf16.mxu0 %v3107_v31 }
  0x23   : > { %499 = vst [vmem:[#allocation2 + $0x61] sm:$0xff] %v466_v48  ;;  %2927 = vmatpush3.bf16.msra.mxu1 %v3084_v26 }
  0x24   : > { %2920 = vmatprep.subr.bf16.mxu1 %v3107_v31 }
  0x25   : > { %2912 = vmatpush3.bf16.msra.mxu0 %v3107_v31 }
  0x27   : > { %v3192_v43 = vld [vmem:[#allocation2 + $0x18] sm:$0xff]  ;;  %v3194_v44 = vld [vmem:[#allocation2 + $0x20] sm:$0xff]  ;;  %v3228_v0 = vld [vmem:[#allocation2 + $0x28] sm:$0x3]  ;;  %2928 = vmatpush3.bf16.msra.mxu1 %v3107_v31 }
  0x28   : > { %v3203_v52 = vld [vmem:[#allocation2 + $0x30] sm:$0xff]  ;;  %v3205_v53 = vld [vmem:[#allocation2 + $0x38] sm:$0xff]  ;;  %v1143_v55 = vmul.f32 %v3134_v51, %v3192_v43  ;;  %v1211_v56 = vmul.f32 %v3140_v60, %v3192_v43  ;;  %v1212_v57 = vmul.f32 %v3140_v60, %v3194_v44  ;;  %v1455_v58 = vmul.f32 %v3146_v2, %v3192_v43  ;;  %v3246_v21 = vld [vmem:[#allocation2 + $0x40] sm:$0x3] }
  0x29   : > { %v1456_v59 = vmul.f32 %v3146_v2, %v3194_v44  ;;  %v1699_v61 = vmul.f32 %v3149_v3, %v3203_v52  ;;  %v1767_v62 = vmul.f32 %v3160_v14, %v3203_v52  ;;  %v1768_v63 = vmul.f32 %v3160_v14, %v3205_v53 }
  0x2a   : > { %v1175_v1 = vadd.f32 %v1143_v55, %v1107_v23  ;;  %v1307_v4 = vrot.slane %v1211_v56, 1  ;;  %v1308_v5 = vrot.slane %v1212_v57, 1  ;;  %v1551_v6 = vrot.slane %v1455_v58, 2 }
  0x2b   : > { %v1552_v7 = vrot.slane %v1456_v59, 2  ;;  %v1863_v8 = vrot.slane %v1767_v62, 1  ;;  %v1864_v9 = vrot.slane %v1768_v63, 1  ;;  %v2011_v10 = vmul.f32 %v3210_v54, %v3203_v52 }
  0x2c   : > { %v1309_v11 = vsel %vm749_vm0, %v1307_v4, %v1308_v5  ;;  %v2012_v24 = vmul.f32 %v3210_v54, %v3205_v53  ;;  %v1144_v12 = vmul.f32 %v3134_v51, %v3194_v44  ;;  %v1213_v13 = vmul.f32 %v3140_v60, %v3228_v0 }
  0x2d   : > { %v1419_v15 = vadd.f32 %v1309_v11, %v1175_v1  ;;  %v1553_v16 = vsel %vm994_vm1, %v1551_v6, %v1552_v7  ;;  %v1865_v19 = vsel %vm749_vm0, %v1863_v8, %v1864_v9  ;;  %v2107_v20 = vrot.slane %v2011_v10, 2 }
  0x2e   : > { %v2108_v17 = vrot.slane %v2012_v24, 2  ;;  %v1176_v22 = vadd.f32 %v1144_v12, %v1108_v18  ;;  %v1310_v23 = vrot.slane %v1213_v13, 1  ;;  %v1457_v27 = vmul.f32 %v3146_v2, %v3228_v0 }
  0x2f   : > { %v1663_v30 = vadd.f32 %v1553_v16, %v1419_v15  ;;  %v1700_v32 = vmul.f32 %v3149_v3, %v3205_v53  ;;  %v1769_v33 = vmul.f32 %v3160_v14, %v3246_v21  ;;  %v2013_v25 = vmul.f32 %v3210_v54, %v3246_v21  ;;  %v3290_v15 = vld [vmem:[#allocation2 + $0x48] sm:$0xff] }
  0x30   : > { %v2109_v34 = vsel %vm994_vm1, %v2107_v20, %v2108_v17  ;;  %v1311_v35 = vsel %vm749_vm0, %v1308_v5, %v1310_v23  ;;  %v1554_v36 = vrot.slane %v1457_v27, 2  ;;  %v587_v37 = vmul.f32 %v3124_v45, %v3192_v43 }
  0x31   : > { %v1731_v38 = vadd.f32 %v1699_v61, %v1663_v30  ;;  %v1420_v18 = vadd.f32 %v1311_v35, %v1176_v22  ;;  %v1866_v48 = vrot.slane %v1769_v33, 1  ;;  %v2110_v55 = vrot.slane %v2013_v25, 2  ;;  %v3297_v30 = vld [vmem:[#allocation2 + $0x50] sm:$0xff] }
  0x32   : > { %v1555_v56 = vsel %vm994_vm1, %v1552_v7, %v1554_v36  ;;  %v656_v57 = vmul.f32 %v3126_v46, %v3192_v43  ;;  %v3269_v58 = vmul.f32 %v3126_v46, %v3194_v44  ;;  %v901_v59 = vmul.f32 %v3128_v47, %v3192_v43 }
  0x33   : > { %v1975_v61 = vadd.f32 %v1865_v19, %v1731_v38  ;;  %v1664_v62 = vadd.f32 %v1555_v56, %v1420_v18  ;;  %v1867_v26 = vsel %vm749_vm0, %v1864_v9, %v1866_v48  ;;  %v2111_v63 = vsel %vm994_vm1, %v2108_v17, %v2110_v55 }
  0x34   : > { %v755_v1 = vrot.slane %v656_v57, 1  ;;  %v756_v4 = vrot.slane %v3269_v58, 1  ;;  %v902_v5 = vmul.f32 %v3128_v47, %v3194_v44  ;;  %v1000_v6 = vrot.slane %v901_v59, 2 }
  0x35   : > { %v2219_v7 = vadd.f32 %v2109_v34, %v1975_v61  ;;  %v1732_v8 = vadd.f32 %v1700_v32, %v1664_v62  ;;  %v1145_v43 = vmul.f32 %v3134_v51, %v3203_v52  ;;  %v1214_v10 = vmul.f32 %v3140_v60, %v3203_v52 }
  0x36   : > { %v757_v9 = vsel %vm749_vm0, %v755_v1, %v756_v4  ;;  %v1001_v11 = vrot.slane %v902_v5, 2  ;;  %v1215_v24 = vmul.f32 %v3140_v60, %v3205_v53  ;;  %v1458_v12 = vmul.f32 %v3146_v2, %v3203_v52 }
  0x37   : > { %2833 = vmatprep.mubr.f32.mxu0 %v2219_v7  ;;  %v1976_v13 = vadd.f32 %v1867_v26, %v1732_v8  ;;  %v864_v16 = vadd.f32 %v757_v9, %v587_v37  ;;  %v1312_v19 = vrot.slane %v1214_v10, 1  ;;  %v1459_v20 = vmul.f32 %v3146_v2, %v3205_v53  ;;  %v3323_v8 = vld [vmem:[#allocation2 + $0x58] sm:$0x3] }
  0x38   : > { %v1002_v31 = vsel %vm994_vm1, %v1000_v6, %v1001_v11  ;;  %v1313_v17 = vrot.slane %v1215_v24, 1  ;;  %v1556_v22 = vrot.slane %v1458_v12, 2  ;;  %v1701_v23 = vmul.f32 %v3149_v3, %v3290_v15 }
  0x39   : > { %v2220_v27 = vadd.f32 %v2111_v63, %v1976_v13  ;;  %v1109_v32 = vadd.f32 %v1002_v31, %v864_v16  ;;  %v1557_v33 = vrot.slane %v1459_v20, 2  ;;  %v1770_v25 = vmul.f32 %v3160_v14, %v3290_v15 }
  0x3a   : > { %v1314_v34 = vsel %vm749_vm0, %v1312_v19, %v1313_v17  ;;  %v1771_v35 = vmul.f32 %v3160_v14, %v3297_v30  ;;  %v2014_v36 = vmul.f32 %v3210_v54, %v3290_v15  ;;  %v2015_v37 = vmul.f32 %v3210_v54, %v3297_v30 }
  0x3b   : > { %2834 = vmatmul.mubr.f32.vlgmr.msra.gmra.mrb[0].mxu0 %v2220_v27  ;;  %v1177_v38 = vadd.f32 %v1145_v43, %v1109_v32  ;;  %v1558_v18 = vsel %vm994_vm1, %v1556_v22, %v1557_v33  ;;  %v1868_v48 = vrot.slane %v1770_v25, 1  ;;  %v588_v55 = vmul.f32 %v3124_v45, %v3194_v44 }
  0x3c   : > { %v1869_v56 = vrot.slane %v1771_v35, 1  ;;  %v2112_v57 = vrot.slane %v2014_v36, 2  ;;  %v2113_v58 = vrot.slane %v2015_v37, 2  ;;  %v658_v59 = vmul.f32 %v3126_v46, %v3228_v0 }
  0x3d   : > { %v1421_v61 = vadd.f32 %v1314_v34, %v1177_v38  ;;  %v903_v62 = vmul.f32 %v3128_v47, %v3228_v0  ;;  %v1146_v26 = vmul.f32 %v3134_v51, %v3205_v53  ;;  %v1216_v63 = vmul.f32 %v3140_v60, %v3246_v21 }
  0x3e   : > { %v1870_v1 = vsel %vm749_vm0, %v1868_v48, %v1869_v56  ;;  %v2114_v44 = vsel %vm994_vm1, %v2112_v57, %v2113_v58  ;;  %v758_v5 = vrot.slane %v658_v59, 1  ;;  %v1460_v6 = vmul.f32 %v3146_v2, %v3246_v21  ;;  %v3352_v59 = vld [vmem:[#allocation2 + $0x60] sm:$0xff] }
  0x3f   : > { %v1665_v7 = vadd.f32 %v1558_v18, %v1421_v61  ;;  %v1003_v43 = vrot.slane %v903_v62, 2  ;;  %v1315_v10 = vrot.slane %v1216_v63, 1  ;;  %v1702_v0 = vmul.f32 %v3149_v3, %v3297_v30 }
  0x40   : > { %v759_v9 = vsel %vm749_vm0, %v756_v4, %v758_v5  ;;  %v1559_v24 = vrot.slane %v1460_v6, 2  ;;  %v1772_v12 = vmul.f32 %v3160_v14, %v3323_v8  ;;  %v2016_v13 = vmul.f32 %v3210_v54, %v3323_v8 }
  0x41   : > { %v1733_v16 = vadd.f32 %v1701_v23, %v1665_v7  ;;  %v865_v19 = vadd.f32 %v759_v9, %v588_v55  ;;  %v1004_v20 = vsel %vm994_vm1, %v1001_v11, %v1003_v43  ;;  %v1316_v31 = vsel %vm749_vm0, %v1313_v17, %v1315_v10 }
  0x42   : > { %v1560_v22 = vsel %vm994_vm1, %v1557_v33, %v1559_v24  ;;  %v1871_v27 = vrot.slane %v1772_v12, 1  ;;  %v2115_v32 = vrot.slane %v2016_v13, 2  ;;  %v467_v25 = vmax.f32 %v3179_v39, 0.0 }
  0x43   : > { %v1977_v4 = vadd.f32 %v1870_v1, %v1733_v16  ;;  %v1110_v34 = vadd.f32 %v1004_v20, %v865_v19  ;;  %v589_v35 = vmul.f32 %v3124_v45, %v3203_v52  ;;  %v659_v36 = vmul.f32 %v3126_v46, %v3203_v52 }
  0x44   : > { %v1872_v23 = vsel %vm749_vm0, %v1869_v56, %v1871_v27  ;;  %v2116_v11 = vsel %vm994_vm1, %v2113_v58, %v2115_v32  ;;  %500 = vst [vmem:[#allocation2 + $0x69] sm:$0xff] %v467_v25  ;;  %v660_v17 = vmul.f32 %v3126_v46, %v3205_v53  ;;  %v904_v33 = vmul.f32 %v3128_v47, %v3203_v52 }
  0x45   : > { %v2221_v39 = vadd.f32 %v2114_v44, %v1977_v4  ;;  %v1178_v37 = vadd.f32 %v1146_v26, %v1110_v34  ;;  %v760_v38 = vrot.slane %v659_v36, 1  ;;  %v905_v18 = vmul.f32 %v3128_v47, %v3205_v53 }
  0x46   : > { %v761_v48 = vrot.slane %v660_v17, 1  ;;  %v1005_v55 = vrot.slane %v904_v33, 2  ;;  %v1147_v56 = vmul.f32 %v3134_v51, %v3290_v15  ;;  %v1217_v57 = vmul.f32 %v3140_v60, %v3290_v15 }
  0x47   : > { %2836 = vmatprep.mubr.f32.mxu0 %v2221_v39  ;;  %v1422_v58 = vadd.f32 %v1316_v31, %v1178_v37  ;;  %v1006_v61 = vrot.slane %v905_v18, 2  ;;  %v1218_v52 = vmul.f32 %v3140_v60, %v3297_v30  ;;  %v1461_v62 = vmul.f32 %v3146_v2, %v3290_v15 }
  0x48   : > { %v762_v26 = vsel %vm749_vm0, %v760_v38, %v761_v48  ;;  %v1317_v63 = vrot.slane %v1217_v57, 1  ;;  %v1462_v1 = vmul.f32 %v3146_v2, %v3297_v30  ;;  %v1703_v44 = vmul.f32 %v3149_v3, %v3352_v59 }
  0x49   : > { %v1666_v5 = vadd.f32 %v1560_v22, %v1422_v58  ;;  %v866_v6 = vadd.f32 %v762_v26, %v589_v35  ;;  %v1007_v7 = vsel %vm994_vm1, %v1005_v55, %v1006_v61  ;;  %v1318_v43 = vrot.slane %v1218_v52, 1 }
  0x4a   : > { %v1561_v10 = vrot.slane %v1461_v62, 2  ;;  %v1562_v9 = vrot.slane %v1462_v1, 2  ;;  %v1773_v24 = vmul.f32 %v3160_v14, %v3352_v59  ;;  %v2017_v12 = vmul.f32 %v3210_v54, %v3352_v59 }
  0x4b   : > { %v1734_v13 = vadd.f32 %v1702_v0, %v1666_v5  ;;  %v3368_v16 = vld [vmem:[#allocation2 + $0x68] sm:$0xff]  ;;  %v1111_v19 = vadd.f32 %v1007_v7, %v866_v6  ;;  %v1319_v20 = vsel %vm749_vm0, %v1317_v63, %v1318_v43  ;;  %v590_v31 = vmul.f32 %v3124_v45, %v3205_v53 }
  0x4c   : > { %v1563_v22 = vsel %vm994_vm1, %v1561_v10, %v1562_v9  ;;  %v1774_v27 = vmul.f32 %v3160_v14, %v3368_v16  ;;  %v1873_v32 = vrot.slane %v1773_v24, 1  ;;  %v2018_v25 = vmul.f32 %v3210_v54, %v3368_v16 }
  0x4d   : > { %v1978_v4 = vadd.f32 %v1872_v23, %v1734_v13  ;;  %v1179_v34 = vadd.f32 %v1147_v56, %v1111_v19  ;;  %v2117_v0 = vrot.slane %v2017_v12, 2  ;;  %v661_v35 = vmul.f32 %v3126_v46, %v3246_v21 }
  0x4e   : > { %v1874_v36 = vrot.slane %v1774_v27, 1  ;;  %v2118_v17 = vrot.slane %v2018_v25, 2  ;;  %v906_v53 = vmul.f32 %v3128_v47, %v3246_v21  ;;  %v1148_v33 = vmul.f32 %v3134_v51, %v3297_v30  ;;  %v3390_v21 = vld [vmem:[#allocation2 + $0x70] sm:$0x3] }
  0x4f   : > { %v2222_v39 = vadd.f32 %v2116_v11, %v1978_v4  ;;  %v1423_v37 = vadd.f32 %v1319_v20, %v1179_v34  ;;  %v763_v38 = vrot.slane %v661_v35, 1  ;;  %v1219_v18 = vmul.f32 %v3140_v60, %v3323_v8 }
  0x50   : > { %v1875_v23 = vsel %vm749_vm0, %v1873_v32, %v1874_v36  ;;  %v2119_v55 = vsel %vm994_vm1, %v2117_v0, %v2118_v17  ;;  %v1008_v56 = vrot.slane %v906_v53, 2  ;;  %v1463_v57 = vmul.f32 %v3146_v2, %v3323_v8 }
  0x51   : > { %2837 = vmatmul.mubr.f32.gmra.mrb[2].mxu0 %v2222_v39  ;;  %v1667_v58 = vadd.f32 %v1563_v22, %v1423_v37  ;;  %v764_v52 = vsel %vm749_vm0, %v761_v48, %v763_v38  ;;  %v1320_v11 = vrot.slane %v1219_v18, 1  ;;  %v1704_v62 = vmul.f32 %v3149_v3, %v3368_v16 }
  0x52   : > { %v867_v26 = vadd.f32 %v764_v52, %v590_v31  ;;  %v1009_v63 = vsel %vm994_vm1, %v1006_v61, %v1008_v56  ;;  %v1564_v1 = vrot.slane %v1463_v57, 2  ;;  %v1775_v5 = vmul.f32 %v3160_v14, %v3390_v21 }
  0x53   : > { %v1735_v6 = vadd.f32 %v1703_v44, %v1667_v58  ;;  %v1321_v7 = vsel %vm749_vm0, %v1318_v43, %v1320_v11  ;;  %v2019_v10 = vmul.f32 %v3210_v54, %v3390_v21  ;;  %v437_v48 = vadd.f32 %v3104_v29, %v3182_v40 }
  0x54   : > { %v1112_v24 = vadd.f32 %v1009_v63, %v867_v26  ;;  %v1565_v12 = vsel %vm994_vm1, %v1562_v9, %v1564_v1  ;;  %v1876_v13 = vrot.slane %v1775_v5, 1  ;;  %v468_v19 = vmax.f32 %v3185_v41, 0.0 }
  0x55   : > { %v1979_v61 = vadd.f32 %v1875_v23, %v1735_v6  ;;  %v2120_v20 = vrot.slane %v2019_v10, 2  ;;  %v469_v31 = vmax.f32 %v437_v48, 0.0  ;;  %v591_v44 = vmul.f32 %v3124_v45, %v3290_v15 }
  0x56   : > { %v1180_v22 = vadd.f32 %v1148_v33, %v1112_v24  ;;  %v1877_v43 = vsel %vm749_vm0, %v1874_v36, %v1876_v13  ;;  %501 = vst [vmem:[#allocation2 + $0x79] sm:$0xff] %v468_v19  ;;  %v662_v27 = vmul.f32 %v3126_v46, %v3290_v15  ;;  %v663_v40 = vmul.f32 %v3126_v46, %v3297_v30 }
  0x57   : > { %v2223_v9 = vadd.f32 %v2119_v55, %v1979_v61  ;;  %v2121_v32 = vsel %vm994_vm1, %v2118_v17, %v2120_v20  ;;  %502 = vst [vmem:[#allocation2 + $0x81] sm:$0xff] %v469_v31  ;;  %v907_v41 = vmul.f32 %v3128_v47, %v3290_v15  ;;  %v908_v25 = vmul.f32 %v3128_v47, %v3297_v30 }
  0x58   : > { %v1424_v4 = vadd.f32 %v1321_v7, %v1180_v22  ;;  %v765_v34 = vrot.slane %v662_v27, 1  ;;  %v766_v0 = vrot.slane %v663_v40, 1  ;;  %v1149_v35 = vmul.f32 %v3134_v51, %v3352_v59 }
  0x59   : > { %2839 = vmatprep.mubr.f32.mxu0 %v2223_v9  ;;  %v1010_v36 = vrot.slane %v907_v41, 2  ;;  %v1011_v53 = vrot.slane %v908_v25, 2  ;;  %v1220_v33 = vmul.f32 %v3140_v60, %v3352_v59  ;;  %v1221_v17 = vmul.f32 %v3140_v60, %v3368_v16 }
  0x5a   : > { %v1668_v39 = vadd.f32 %v1565_v12, %v1424_v4  ;;  %v767_v15 = vsel %vm749_vm0, %v765_v34, %v766_v0  ;;  %v1464_v37 = vmul.f32 %v3146_v2, %v3352_v59  ;;  %v1465_v38 = vmul.f32 %v3146_v2, %v3368_v16 }
  0x5b   : > { %v868_v18 = vadd.f32 %v767_v15, %v591_v44  ;;  %v1012_v23 = vsel %vm994_vm1, %v1010_v36, %v1011_v53  ;;  %v1322_v55 = vrot.slane %v1220_v33, 1  ;;  %v1323_v56 = vrot.slane %v1221_v17, 1 }
  0x5c   : > { %v1736_v57 = vadd.f32 %v1704_v62, %v1668_v39  ;;  %v1566_v58 = vrot.slane %v1464_v37, 2  ;;  %v1567_v52 = vrot.slane %v1465_v38, 2  ;;  %v592_v11 = vmul.f32 %v3124_v45, %v3297_v30 }
  0x5d   : > { %v3431_v26 = vld [vmem:[#allocation2 + $0x78] sm:$0xff]  ;;  %v1113_v63 = vadd.f32 %v1012_v23, %v868_v18  ;;  %v1324_v1 = vsel %vm749_vm0, %v1322_v55, %v1323_v56  ;;  %v664_v5 = vmul.f32 %v3126_v46, %v3323_v8  ;;  %v909_v6 = vmul.f32 %v3128_v47, %v3323_v8 }
  0x5e   : > { %v1980_v7 = vadd.f32 %v1877_v43, %v1736_v57  ;;  %v3438_v10 = vld [vmem:[#allocation2 + $0x80] sm:$0xff]  ;;  %v1568_v62 = vsel %vm994_vm1, %v1566_v58, %v1567_v52  ;;  %v1705_v48 = vmul.f32 %v3149_v3, %v3431_v26  ;;  %v1776_v30 = vmul.f32 %v3160_v14, %v3431_v26 }
  0x5f   : > { %v1181_v24 = vadd.f32 %v1149_v35, %v1113_v63  ;;  %v1777_v12 = vmul.f32 %v3160_v14, %v3438_v10  ;;  %v2020_v13 = vmul.f32 %v3210_v54, %v3431_v26  ;;  %v2021_v8 = vmul.f32 %v3210_v54, %v3438_v10  ;;  %v3459_v35 = vld [vmem:[#allocation2 + $0x88] sm:$0x3] }
  0x60   : > { %v2224_v19 = vadd.f32 %v2121_v32, %v1980_v7  ;;  %v1878_v61 = vrot.slane %v1776_v30, 1  ;;  %v768_v20 = vrot.slane %v664_v5, 1  ;;  %v1013_v31 = vrot.slane %v909_v6, 2 }
  0x61   : > { %v1425_v44 = vadd.f32 %v1324_v1, %v1181_v24  ;;  %v1879_v22 = vrot.slane %v1777_v12, 1  ;;  %v2122_v43 = vrot.slane %v2020_v13, 2  ;;  %v2123_v27 = vrot.slane %v2021_v8, 2 }
  0x62   : > { %2840 = vmatmul.mubr.f32.gmra.mrb[4].mxu0 %v2224_v19  ;;  %v769_v40 = vsel %vm749_vm0, %v766_v0, %v768_v20  ;;  %v1014_v9 = vsel %vm994_vm1, %v1011_v53, %v1013_v31  ;;  %v1150_v41 = vmul.f32 %v3134_v51, %v3368_v16  ;;  %v1222_v25 = vmul.f32 %v3140_v60, %v3390_v21 }
  0x63   : > { %v1669_v4 = vadd.f32 %v1568_v62, %v1425_v44  ;;  %v1880_v32 = vsel %vm749_vm0, %v1878_v61, %v1879_v22  ;;  %v2124_v34 = vsel %vm994_vm1, %v2122_v43, %v2123_v27  ;;  %v869_v36 = vadd.f32 %v769_v40, %v592_v11 }
  0x64   : > { %v1325_v33 = vrot.slane %v1222_v25, 1  ;;  %v1466_v0 = vmul.f32 %v3146_v2, %v3390_v21  ;;  %v1706_v53 = vmul.f32 %v3149_v3, %v3438_v10  ;;  %v1778_v17 = vmul.f32 %v3160_v14, %v3459_v35 }
  0x65   : > { %v1737_v39 = vadd.f32 %v1705_v48, %v1669_v4  ;;  %v1114_v15 = vadd.f32 %v1014_v9, %v869_v36  ;;  %v2022_v37 = vmul.f32 %v3210_v54, %v3459_v35  ;;  %v438_v38 = vadd.f32 %v3104_v29, %v3189_v42 }
  0x66   : > { %v1326_v18 = vsel %vm749_vm0, %v1323_v56, %v1325_v33  ;;  %v1569_v23 = vrot.slane %v1466_v0, 2  ;;  %v1881_v55 = vrot.slane %v1778_v17, 1  ;;  %v439_v57 = vadd.f32 %v3104_v29, %v3197_v49 }
  0x67   : > { %v1981_v58 = vadd.f32 %v1880_v32, %v1737_v39  ;;  %v1182_v11 = vadd.f32 %v1150_v41, %v1114_v15  ;;  %v2125_v63 = vrot.slane %v2022_v37, 2  ;;  %v470_v1 = vmax.f32 %v438_v38, 0.0 }
  0x68   : > { %v1570_v5 = vsel %vm994_vm1, %v1567_v52, %v1569_v23  ;;  %v1882_v6 = vsel %vm749_vm0, %v1879_v22, %v1881_v55  ;;  %v471_v7 = vmax.f32 %v439_v57, 0.0  ;;  %v593_v62 = vmul.f32 %v3124_v45, %v3352_v59 }
  0x69   : > { %v2225_v42 = vadd.f32 %v2124_v34, %v1981_v58  ;;  %v1426_v48 = vadd.f32 %v1326_v18, %v1182_v11  ;;  %v2126_v56 = vsel %vm994_vm1, %v2123_v27, %v2125_v63  ;;  %503 = vst [vmem:[#allocation2 + $0x91] sm:$0xff] %v470_v1  ;;  %v665_v49 = vmul.f32 %v3126_v46, %v3352_v59 }
  0x6a   : > { %504 = vst [vmem:[#allocation2 + $0x99] sm:$0xff] %v471_v7  ;;  %v666_v30 = vmul.f32 %v3126_v46, %v3368_v16  ;;  %v910_v52 = vmul.f32 %v3128_v47, %v3352_v59  ;;  %v911_v24 = vmul.f32 %v3128_v47, %v3368_v16  ;;  %v1151_v12 = vmul.f32 %v3134_v51, %v3431_v26 }
  0x6b   : > { %2842 = vmatprep.mubr.f32.mxu0 %v2225_v42  ;;  %v1670_v13 = vadd.f32 %v1570_v5, %v1426_v48  ;;  %v770_v8 = vrot.slane %v665_v49, 1  ;;  %v1223_v19 = vmul.f32 %v3140_v60, %v3431_v26  ;;  %v1224_v61 = vmul.f32 %v3140_v60, %v3438_v10 }
  0x6c   : > { %v771_v20 = vrot.slane %v666_v30, 1  ;;  %v1015_v31 = vrot.slane %v910_v52, 2  ;;  %v1016_v44 = vrot.slane %v911_v24, 2  ;;  %v1467_v59 = vmul.f32 %v3146_v2, %v3431_v26  ;;  %v363_v52 = vld [vmem:[%s3094_s18 + $0x68] sm:$0xff] }
  0x6d   : > { %v1738_v22 = vadd.f32 %v1706_v53, %v1670_v13  ;;  %v1327_v43 = vrot.slane %v1223_v19, 1  ;;  %v1328_v27 = vrot.slane %v1224_v61, 1  ;;  %v1468_v40 = vmul.f32 %v3146_v2, %v3438_v10 }
  0x6e   : > { %v772_v9 = vsel %vm749_vm0, %v770_v8, %v771_v20  ;;  %v1017_v41 = vsel %vm994_vm1, %v1015_v31, %v1016_v44  ;;  %v1571_v25 = vrot.slane %v1467_v59, 2  ;;  %v594_v4 = vmul.f32 %v3124_v45, %v3368_v16 }
  0x6f   : > { %v1982_v32 = vadd.f32 %v1882_v6, %v1738_v22  ;;  %v870_v34 = vadd.f32 %v772_v9, %v593_v62  ;;  %v1329_v36 = vsel %vm749_vm0, %v1327_v43, %v1328_v27  ;;  %v1572_v33 = vrot.slane %v1468_v40, 2 }
  0x70   : > { %v3502_v0 = vld [vmem:[#allocation2 + $0x90] sm:$0xff]  ;;  %v667_v53 = vmul.f32 %v3126_v46, %v3390_v21  ;;  %v912_v17 = vmul.f32 %v3128_v47, %v3390_v21  ;;  %v1152_v39 = vmul.f32 %v3134_v51, %v3438_v10  ;;  %v1225_v15 = vmul.f32 %v3140_v60, %v3459_v35 }
  0x71   : > { %v2226_v16 = vadd.f32 %v2126_v56, %v1982_v32  ;;  %v3512_v37 = vld [vmem:[#allocation2 + $0x98] sm:$0xff]  ;;  %v1115_v38 = vadd.f32 %v1017_v41, %v870_v34  ;;  %v1573_v18 = vsel %vm994_vm1, %v1571_v25, %v1572_v33  ;;  %v1707_v23 = vmul.f32 %v3149_v3, %v3502_v0 }
  0x72   : > { %v1779_v55 = vmul.f32 %v3160_v14, %v3502_v0  ;;  %v1780_v21 = vmul.f32 %v3160_v14, %v3512_v37  ;;  %v2023_v57 = vmul.f32 %v3210_v54, %v3502_v0  ;;  %v2024_v58 = vmul.f32 %v3210_v54, %v3512_v37 }
  0x73   : > { %2843 = vmatmul.mubr.f32.gmra.mrb[6].mxu0 %v2226_v16  ;;  %v1183_v11 = vadd.f32 %v1151_v12, %v1115_v38  ;;  %v773_v63 = vrot.slane %v667_v53, 1  ;;  %v1018_v1 = vrot.slane %v912_v17, 2  ;;  %v1330_v5 = vrot.slane %v1225_v15, 1  ;;  %v3531_v12 = vld [vmem:[#allocation2 + $0xa0] sm:$0x3] }
  0x74   : > { %v1883_v6 = vrot.slane %v1779_v55, 1  ;;  %v1884_v7 = vrot.slane %v1780_v21, 1  ;;  %v2127_v62 = vrot.slane %v2023_v57, 2  ;;  %v2128_v42 = vrot.slane %v2024_v58, 2 }
  0x75   : > { %v1427_v48 = vadd.f32 %v1329_v36, %v1183_v11  ;;  %v774_v56 = vsel %vm749_vm0, %v771_v20, %v773_v63  ;;  %v1019_v49 = vsel %vm994_vm1, %v1016_v44, %v1018_v1  ;;  %v1331_v30 = vsel %vm749_vm0, %v1328_v27, %v1330_v5 }
  0x76   : > { %v1885_v24 = vsel %vm749_vm0, %v1883_v6, %v1884_v7  ;;  %v2129_v13 = vsel %vm994_vm1, %v2127_v62, %v2128_v42  ;;  %v871_v8 = vadd.f32 %v774_v56, %v594_v4  ;;  %v1469_v19 = vmul.f32 %v3146_v2, %v3459_v35 }
  0x77   : > { %v1671_v61 = vadd.f32 %v1573_v18, %v1427_v48  ;;  %v1708_v31 = vmul.f32 %v3149_v3, %v3512_v37  ;;  %v1781_v20 = vmul.f32 %v3160_v14, %v3531_v12  ;;  %v2025_v44 = vmul.f32 %v3210_v54, %v3531_v12 }
  0x78   : > { %v1116_v59 = vadd.f32 %v1019_v49, %v871_v8  ;;  %v1574_v22 = vrot.slane %v1469_v19, 2  ;;  %v402_v43 = vmul.f32 %v3099_v28, %v363_v52  ;;  %v440_v27 = vadd.f32 %v3104_v29, %v3200_v50 }
  0x79   : > { %v1739_v40 = vadd.f32 %v1707_v23, %v1671_v61  ;;  %v1886_v9 = vrot.slane %v1781_v20, 1  ;;  %v2130_v41 = vrot.slane %v2025_v44, 2  ;;  %v595_v25 = vmul.f32 %v3124_v45, %v3431_v26 }
  0x7a   : > { %v1184_v4 = vadd.f32 %v1152_v39, %v1116_v59  ;;  %v1575_v32 = vsel %vm994_vm1, %v1572_v33, %v1574_v22  ;;  %v441_v34 = vadd.f32 %v3104_v29, %v402_v43  ;;  %v472_v36 = vmax.f32 %v440_v27, 0.0 }
  0x7b   : > { %v1983_v53 = vadd.f32 %v1885_v24, %v1739_v40  ;;  %v1887_v17 = vsel %vm749_vm0, %v1884_v7, %v1886_v9  ;;  %v2131_v28 = vsel %vm994_vm1, %v2128_v42, %v2130_v41  ;;  %v668_v50 = vmul.f32 %v3126_v46, %v3431_v26 }
  0x7c   : > { %v1428_v15 = vadd.f32 %v1331_v30, %v1184_v4  ;;  %v473_v16 = vmax.f32 %v441_v34, 0.0  ;;  %505 = vst [vmem:[#allocation2 + $0xa9] sm:$0xff] %v472_v36  ;;  %v669_v38 = vmul.f32 %v3126_v46, %v3438_v10  ;;  %v913_v33 = vmul.f32 %v3128_v47, %v3431_v26 }
  0x7d   : > { %v2227_v39 = vadd.f32 %v2129_v13, %v1983_v53  ;;  %v775_v29 = vrot.slane %v668_v50, 1  ;;  %v914_v18 = vmul.f32 %v3128_v47, %v3438_v10  ;;  %v1153_v23 = vmul.f32 %v3134_v51, %v3502_v0 }
  0x7e   : > { %v1672_v55 = vadd.f32 %v1575_v32, %v1428_v15  ;;  %506 = vst [vmem:[#allocation2 + $0xb1] sm:$0xff] %v473_v16  ;;  %v776_v21 = vrot.slane %v669_v38, 1  ;;  %v1020_v57 = vrot.slane %v913_v33, 2  ;;  %v1226_v58 = vmul.f32 %v3140_v60, %v3502_v0  ;;  %v364_v33 = vld [vmem:[%s3094_s18 + $0x70] sm:$0xff] }
  0x7f   : > { %2845 = vmatprep.mubr.f32.mxu0 %v2227_v39  ;;  %v1021_v11 = vrot.slane %v914_v18, 2  ;;  %v1227_v26 = vmul.f32 %v3140_v60, %v3512_v37  ;;  %v1470_v63 = vmul.f32 %v3146_v2, %v3502_v0  ;;  %v3568_v1 = vmul.f32 %v3146_v2, %v3512_v37 }
  0x80   : > { %v1740_v5 = vadd.f32 %v1708_v31, %v1672_v55  ;;  %v777_v6 = vsel %vm749_vm0, %v775_v29, %v776_v21  ;;  %v1332_v7 = vrot.slane %v1226_v58, 1  ;;  %v596_v62 = vmul.f32 %v3124_v45, %v3438_v10  ;;  %v365_v55 = vld [vmem:[%s3094_s18 + $0x78] sm:$0xff] }
  0x81   : > { %v872_v42 = vadd.f32 %v777_v6, %v595_v25  ;;  %v1022_v48 = vsel %vm994_vm1, %v1020_v57, %v1021_v11  ;;  %v1333_v56 = vrot.slane %v1227_v26, 1  ;;  %v1576_v49 = vrot.slane %v1470_v63, 2 }
  0x82   : > { %v1984_v30 = vadd.f32 %v1887_v17, %v1740_v5  ;;  %v1577_v52 = vrot.slane %v3568_v1, 2  ;;  %v670_v24 = vmul.f32 %v3126_v46, %v3459_v35  ;;  %v915_v13 = vmul.f32 %v3128_v47, %v3459_v35  ;;  %v3619_v5 = vld [vmem:[%s4421_s1] ss:$0 sm:$0xff] }
  0x83   : > { %v3579_v8 = vld [vmem:[#allocation2 + $0xa8] sm:$0xff]  ;;  %v1117_v19 = vadd.f32 %v1022_v48, %v872_v42  ;;  %v1334_v61 = vsel %vm749_vm0, %v1332_v7, %v1333_v56  ;;  %v1154_v10 = vmul.f32 %v3134_v51, %v3512_v37  ;;  %v1228_v31 = vmul.f32 %v3140_v60, %v3531_v12 }
  0x84   : > { %v2228_v20 = vadd.f32 %v2131_v28, %v1984_v30  ;;  %v1578_v44 = vsel %vm994_vm1, %v1576_v49, %v1577_v52  ;;  %v1709_v59 = vmul.f32 %v3149_v3, %v3579_v8  ;;  %v1782_v35 = vmul.f32 %v3160_v14, %v3579_v8  ;;  %v3630_v30 = vld [vmem:[%s4422_s2] ss:$0 sm:$0xff] }
  0x85   : > { %v3591_v22 = vld [vmem:[#allocation2 + $0xb0] sm:$0xff]  ;;  %v1185_v43 = vadd.f32 %v1153_v23, %v1117_v19  ;;  %v2026_v27 = vmul.f32 %v3210_v54, %v3579_v8  ;;  %v778_v40 = vrot.slane %v670_v24, 1  ;;  %v1023_v9 = vrot.slane %v915_v13, 2  ;;  %v3601_v15 = vld [vmem:[#allocation2 + $0xb8] sm:$0x3] }
  0x86   : > { %2846 = vmatmul.mubr.f32.gmra.mrb[8].mxu0 %v2228_v20  ;;  %v1783_v41 = vmul.f32 %v3160_v14, %v3591_v22  ;;  %v1888_v25 = vrot.slane %v1782_v35, 1  ;;  %v2027_v4 = vmul.f32 %v3210_v54, %v3591_v22  ;;  %v1335_v32 = vrot.slane %v1228_v31, 1 }
  0x87   : > { %v1429_v34 = vadd.f32 %v1334_v61, %v1185_v43  ;;  %v2132_v36 = vrot.slane %v2026_v27, 2  ;;  %v779_v53 = vsel %vm749_vm0, %v776_v21, %v778_v40  ;;  %v1024_v17 = vsel %vm994_vm1, %v1021_v11, %v1023_v9 }
  0x88   : > { %v1889_v28 = vrot.slane %v1783_v41, 1  ;;  %v2133_v50 = vrot.slane %v2027_v4, 2  ;;  %v873_v16 = vadd.f32 %v779_v53, %v596_v62  ;;  %v1336_v38 = vsel %vm749_vm0, %v1333_v56, %v1335_v32 }
  0x89   : > { %v1673_v39 = vadd.f32 %v1578_v44, %v1429_v34  ;;  %v1472_v29 = vmul.f32 %v3146_v2, %v3531_v12  ;;  %v1710_v18 = vmul.f32 %v3149_v3, %v3591_v22  ;;  %v1784_v23 = vmul.f32 %v3160_v14, %v3601_v15 }
  0x8a   : > { %v1890_v21 = vsel %vm749_vm0, %v1888_v25, %v1889_v28  ;;  %v2134_v57 = vsel %vm994_vm1, %v2132_v36, %v2133_v50  ;;  %v1118_v58 = vadd.f32 %v1024_v17, %v873_v16  ;;  %v2028_v11 = vmul.f32 %v3210_v54, %v3601_v15 }
  0x8b   : > { %v1741_v26 = vadd.f32 %v1709_v59, %v1673_v39  ;;  %v1579_v63 = vrot.slane %v1472_v29, 2  ;;  %v1891_v1 = vrot.slane %v1784_v23, 1  ;;  %v403_v6 = vmul.f32 %v3619_v5, %v364_v33 }
  0x8c   : > { %v1186_v7 = vadd.f32 %v1154_v10, %v1118_v58  ;;  %v2135_v62 = vrot.slane %v2028_v11, 2  ;;  %v404_v42 = vmul.f32 %v3619_v5, %v365_v55  ;;  %v597_v48 = vmul.f32 %v3124_v45, %v3502_v0  ;;  %v366_v55 = vld [vmem:[%s3094_s18 + $0x80] sm:$0xff] }
  0x8d   : > { %v1985_v56 = vadd.f32 %v1890_v21, %v1741_v26  ;;  %v1580_v54 = vsel %vm994_vm1, %v1577_v52, %v1579_v63  ;;  %v1892_v49 = vsel %vm749_vm0, %v1889_v28, %v1891_v1  ;;  %v442_v24 = vadd.f32 %v3630_v30, %v403_v6  ;;  %v367_v21 = vld [vmem:[%s3094_s18 + $0x88] sm:$0xff] }
  0x8e   : > { %v1430_v13 = vadd.f32 %v1336_v38, %v1186_v7  ;;  %v2136_v19 = vsel %vm994_vm1, %v2133_v50, %v2135_v62  ;;  %v443_v61 = vadd.f32 %v3630_v30, %v404_v42  ;;  %v671_v10 = vmul.f32 %v3126_v46, %v3502_v0 }
  0x8f   : > { %v2229_v31 = vadd.f32 %v2134_v57, %v1985_v56  ;;  %v474_v20 = vmax.f32 %v442_v24, 0.0  ;;  %v672_v52 = vmul.f32 %v3126_v46, %v3512_v37  ;;  %v916_v44 = vmul.f32 %v3128_v47, %v3502_v0  ;;  %v3684_v24 = vld [vmem:[%s4423_s3 + $0x8] ss:$0 sm:$0xff] }
  0x90   : > { %v1674_v59 = vadd.f32 %v1580_v54, %v1430_v13  ;;  %v475_v35 = vmax.f32 %v443_v61, 0.0  ;;  %v780_v43 = vrot.slane %v671_v10, 1  ;;  %v917_v27 = vmul.f32 %v3128_v47, %v3512_v37 }
  0x91   : > { %2848 = vmatprep.mubr.f32.mxu0 %v2229_v31  ;;  %507 = vst [vmem:[#allocation2 + $0xc1] sm:$0xff] %v474_v20  ;;  %v781_v40 = vrot.slane %v672_v52, 1  ;;  %v1025_v9 = vrot.slane %v916_v44, 2  ;;  %v1155_v41 = vmul.f32 %v3134_v51, %v3579_v8  ;;  %v1229_v25 = vmul.f32 %v3140_v60, %v3579_v8 }
  0x92   : > { %v1742_v4 = vadd.f32 %v1710_v18, %v1674_v59  ;;  %508 = vst [vmem:[#allocation2 + $0xc9] sm:$0xff] %v475_v35  ;;  %v1026_v0 = vrot.slane %v917_v27, 2  ;;  %v1230_v32 = vmul.f32 %v3140_v60, %v3591_v22  ;;  %v1473_v34 = vmul.f32 %v3146_v2, %v3579_v8 }
  0x93   : > { %v782_v36 = vsel %vm749_vm0, %v780_v43, %v781_v40  ;;  %v1337_v53 = vrot.slane %v1229_v25, 1  ;;  %v1474_v17 = vmul.f32 %v3146_v2, %v3591_v22  ;;  %v598_v28 = vmul.f32 %v3124_v45, %v3512_v37 }
  0x94   : > { %v1986_v50 = vadd.f32 %v1892_v49, %v1742_v4  ;;  %v874_v16 = vadd.f32 %v782_v36, %v597_v48  ;;  %v1027_v38 = vsel %vm994_vm1, %v1025_v9, %v1026_v0  ;;  %v1338_v33 = vrot.slane %v1230_v32, 1 }
  0x95   : > { %v1581_v39 = vrot.slane %v1473_v34, 2  ;;  %v1582_v29 = vrot.slane %v1474_v17, 2  ;;  %v673_v18 = vmul.f32 %v3126_v46, %v3531_v12  ;;  %v918_v23 = vmul.f32 %v3128_v47, %v3531_v12 }
  0x96   : > { %v2230_v57 = vadd.f32 %v2136_v19, %v1986_v50  ;;  %v1119_v58 = vadd.f32 %v1027_v38, %v874_v16  ;;  %v1339_v11 = vsel %vm749_vm0, %v1337_v53, %v1338_v33  ;;  %v1156_v37 = vmul.f32 %v3134_v51, %v3591_v22 }
  0x97   : > { %v1583_v26 = vsel %vm994_vm1, %v1581_v39, %v1582_v29  ;;  %v783_v63 = vrot.slane %v673_v18, 1  ;;  %v1028_v1 = vrot.slane %v918_v23, 2  ;;  %v1231_v6 = vmul.f32 %v3140_v60, %v3601_v15 }
  0x98   : > { %2849 = vmatmul.mubr.f32.gmra.mrb[10].mxu0 %v2230_v57  ;;  %v3669_v7 = vld [vmem:[#allocation2 + $0xc0] sm:$0xff]  ;;  %v1187_v12 = vadd.f32 %v1155_v41, %v1119_v58  ;;  %v1475_v62 = vmul.f32 %v3146_v2, %v3601_v15  ;;  %v405_v42 = vmul.f32 %v3619_v5, %v366_v55  ;;  %v406_v48 = vmul.f32 %v3619_v5, %v367_v21 }
  0x99   : > { %v3675_v56 = vld [vmem:[#allocation2 + $0xc8] sm:$0xff]  ;;  %v1711_v54 = vmul.f32 %v3149_v3, %v3669_v7  ;;  %v1785_v49 = vmul.f32 %v3160_v14, %v3669_v7  ;;  %v2029_v13 = vmul.f32 %v3684_v24, %v3669_v7  ;;  %v784_v19 = vsel %vm749_vm0, %v781_v40, %v783_v63  ;;  %v3694_v41 = vld [vmem:[#allocation2 + $0xd0] sm:$0x3] }
  0x9a   : > { %v1431_v61 = vadd.f32 %v1339_v11, %v1187_v12  ;;  %v1786_v10 = vmul.f32 %v3160_v14, %v3675_v56  ;;  %v2030_v31 = vmul.f32 %v3684_v24, %v3675_v56  ;;  %v875_v20 = vadd.f32 %v784_v19, %v598_v28 }
  0x9b   : > { %v1893_v52 = vrot.slane %v1785_v49, 1  ;;  %v2137_v44 = vrot.slane %v2029_v13, 2  ;;  %v1029_v59 = vsel %vm994_vm1, %v1026_v0, %v1028_v1  ;;  %v1340_v35 = vrot.slane %v1231_v6, 1 }
  0x9c   : > { %v1675_v43 = vadd.f32 %v1583_v26, %v1431_v61  ;;  %v1894_v27 = vrot.slane %v1786_v10, 1  ;;  %v2138_v9 = vrot.slane %v2030_v31, 2  ;;  %v1120_v25 = vadd.f32 %v1029_v59, %v875_v20 }
  0x9d   : > { %v1341_v40 = vsel %vm749_vm0, %v1338_v33, %v1340_v35  ;;  %v1584_v4 = vrot.slane %v1475_v62, 2  ;;  %v1712_v32 = vmul.f32 %v3149_v3, %v3675_v56  ;;  %v1787_v34 = vmul.f32 %v3160_v14, %v3694_v41 }
  0x9e   : > { %v1743_v36 = vadd.f32 %v1711_v54, %v1675_v43  ;;  %v1895_v53 = vsel %vm749_vm0, %v1893_v52, %v1894_v27  ;;  %v2139_v0 = vsel %vm994_vm1, %v2137_v44, %v2138_v9  ;;  %v1188_v17 = vadd.f32 %v1156_v37, %v1120_v25 }
  0x9f   : > { %v1585_v28 = vsel %vm994_vm1, %v1582_v29, %v1584_v4  ;;  %v1896_v50 = vrot.slane %v1787_v34, 1  ;;  %v2031_v16 = vmul.f32 %v3684_v24, %v3694_v41  ;;  %v444_v38 = vadd.f32 %v3630_v30, %v405_v42 }
  0xa0   : > { %v1987_v33 = vadd.f32 %v1895_v53, %v1743_v36  ;;  %v1432_v39 = vadd.f32 %v1341_v40, %v1188_v17  ;;  %v445_v18 = vadd.f32 %v3630_v30, %v406_v48  ;;  %v599_v23 = vmul.f32 %v3124_v45, %v3579_v8 }
  0xa1   : > { %v1897_v55 = vsel %vm749_vm0, %v1894_v27, %v1896_v50  ;;  %v2140_v21 = vrot.slane %v2031_v16, 2  ;;  %v476_v57 = vmax.f32 %v444_v38, 0.0  ;;  %v674_v29 = vmul.f32 %v3126_v46, %v3579_v8 }
  0xa2   : > { %v2231_v58 = vadd.f32 %v2139_v0, %v1987_v33  ;;  %v1676_v11 = vadd.f32 %v1585_v28, %v1432_v39  ;;  %v477_v37 = vmax.f32 %v445_v18, 0.0  ;;  %v675_v26 = vmul.f32 %v3126_v46, %v3591_v22 }
  0xa3   : > { %v2141_v63 = vsel %vm994_vm1, %v2138_v9, %v2140_v21  ;;  %509 = vst [vmem:[#allocation2 + $0xd9] sm:$0xff] %v476_v57  ;;  %v785_v1 = vrot.slane %v674_v29, 1  ;;  %v919_v6 = vmul.f32 %v3128_v47, %v3579_v8  ;;  %v920_v12 = vmul.f32 %v3128_v47, %v3591_v22 }
  0xa4   : > { %2851 = vmatprep.mubr.f32.mxu0 %v2231_v58  ;;  %v1744_v62 = vadd.f32 %v1712_v32, %v1676_v11  ;;  %510 = vst [vmem:[#allocation2 + $0xe1] sm:$0xff] %v477_v37  ;;  %v786_v42 = vrot.slane %v675_v26, 1  ;;  %v1157_v48 = vmul.f32 %v3134_v51, %v3669_v7  ;;  %v1232_v54 = vmul.f32 %v3140_v60, %v3669_v7 }
  0xa5   : > { %v1030_v49 = vrot.slane %v919_v6, 2  ;;  %v1031_v13 = vrot.slane %v920_v12, 2  ;;  %v1233_v19 = vmul.f32 %v3140_v60, %v3675_v56  ;;  %v1476_v8 = vmul.f32 %v3146_v2, %v3669_v7 }
  0xa6   : > { %v1988_v61 = vadd.f32 %v1897_v55, %v1744_v62  ;;  %v787_v10 = vsel %vm749_vm0, %v785_v1, %v786_v42  ;;  %v1342_v31 = vrot.slane %v1232_v54, 1  ;;  %v1477_v20 = vmul.f32 %v3146_v2, %v3675_v56 }
  0xa7   : > { %v876_v52 = vadd.f32 %v787_v10, %v599_v23  ;;  %v1032_v44 = vsel %vm994_vm1, %v1030_v49, %v1031_v13  ;;  %v1343_v59 = vrot.slane %v1233_v19, 1  ;;  %v1586_v35 = vrot.slane %v1476_v8, 2 }
  0xa8   : > { %v2232_v43 = vadd.f32 %v2141_v63, %v1988_v61  ;;  %v1587_v27 = vrot.slane %v1477_v20, 2  ;;  %v600_v9 = vmul.f32 %v3124_v45, %v3591_v22  ;;  %v676_v25 = vmul.f32 %v3126_v46, %v3601_v15 }
  0xa9   : > { %v1121_v40 = vadd.f32 %v1032_v44, %v876_v52  ;;  %v1344_v4 = vsel %vm749_vm0, %v1342_v31, %v1343_v59  ;;  %v921_v32 = vmul.f32 %v3128_v47, %v3601_v15  ;;  %v1158_v34 = vmul.f32 %v3134_v51, %v3675_v56 }
  0xaa   : > { %2852 = vmatmul.mubr.f32.gmra.mrb[12].mxu0 %v2232_v43  ;;  %v3741_v36 = vld [vmem:[#allocation2 + $0xd8] sm:$0xff]  ;;  %v1588_v53 = vsel %vm994_vm1, %v1586_v35, %v1587_v27  ;;  %v788_v0 = vrot.slane %v676_v25, 1  ;;  %v1234_v22 = vmul.f32 %v3140_v60, %v3694_v41  ;;  %v1478_v17 = vmul.f32 %v3146_v2, %v3694_v41 }
  0xab   : > { %v3748_v28 = vld [vmem:[#allocation2 + $0xe0] sm:$0xff]  ;;  %v1189_v50 = vadd.f32 %v1157_v48, %v1121_v40  ;;  %v1713_v15 = vmul.f32 %v3149_v3, %v3741_v36  ;;  %v1788_v16 = vmul.f32 %v3160_v14, %v3741_v36  ;;  %v2032_v38 = vmul.f32 %v3684_v24, %v3741_v36  ;;  %v3762_v1 = vld [vmem:[#allocation2 + $0xe8] sm:$0x3]  ;;  %v369_v48 = vld [vmem:[%s3094_s18 + $0x98] sm:$0xff] }
  0xac   : > { %v1789_v33 = vmul.f32 %v3160_v14, %v3748_v28  ;;  %v2033_v39 = vmul.f32 %v3684_v24, %v3748_v28  ;;  %v789_v18 = vsel %vm749_vm0, %v786_v42, %v788_v0  ;;  %v1033_v23 = vrot.slane %v921_v32, 2  ;;  %v368_v42 = vld [vmem:[%s3094_s18 + $0x90] sm:$0xff] }
  0xad   : > { %v1433_v55 = vadd.f32 %v1344_v4, %v1189_v50  ;;  %v1898_v21 = vrot.slane %v1788_v16, 1  ;;  %v2142_v57 = vrot.slane %v2032_v38, 2  ;;  %v877_v29 = vadd.f32 %v789_v18, %v600_v9 }
  0xae   : > { %v1899_v58 = vrot.slane %v1789_v33, 1  ;;  %v2143_v11 = vrot.slane %v2033_v39, 2  ;;  %v1034_v37 = vsel %vm994_vm1, %v1031_v13, %v1033_v23  ;;  %v1345_v26 = vrot.slane %v1234_v22, 1 }
  0xaf   : > { %v1677_v63 = vadd.f32 %v1588_v53, %v1433_v55  ;;  %v1122_v6 = vadd.f32 %v1034_v37, %v877_v29  ;;  %v1589_v12 = vrot.slane %v1478_v17, 2  ;;  %v1714_v62 = vmul.f32 %v3149_v3, %v3748_v28 }
  0xb0   : > { %v1900_v54 = vsel %vm749_vm0, %v1898_v21, %v1899_v58  ;;  %v2144_v49 = vsel %vm994_vm1, %v2142_v57, %v2143_v11  ;;  %v1346_v19 = vsel %vm749_vm0, %v1343_v59, %v1345_v26  ;;  %v1790_v13 = vmul.f32 %v3160_v14, %v3762_v1 }
  0xb1   : > { %v1745_v8 = vadd.f32 %v1713_v15, %v1677_v63  ;;  %v1190_v61 = vadd.f32 %v1158_v34, %v1122_v6  ;;  %v1590_v10 = vsel %vm994_vm1, %v1587_v27, %v1589_v12  ;;  %v2034_v31 = vmul.f32 %v3684_v24, %v3762_v1 }
  0xb2   : > { %v1901_v20 = vrot.slane %v1790_v13, 1  ;;  %v407_v52 = vmul.f32 %v3619_v5, %v368_v42  ;;  %v408_v44 = vmul.f32 %v3619_v5, %v369_v48  ;;  %v601_v35 = vmul.f32 %v3124_v45, %v3669_v7 }
  0xb3   : > { %v1989_v43 = vadd.f32 %v1900_v54, %v1745_v8  ;;  %v1434_v59 = vadd.f32 %v1346_v19, %v1190_v61  ;;  %v2145_v9 = vrot.slane %v2034_v31, 2  ;;  %v677_v25 = vmul.f32 %v3126_v46, %v3669_v7  ;;  %v370_v54 = vld [vmem:[%s3094_s18 + $0xa0] sm:$0xff] }
  0xb4   : > { %v1902_v40 = vsel %vm749_vm0, %v1899_v58, %v1901_v20  ;;  %v446_v27 = vadd.f32 %v3630_v30, %v407_v52  ;;  %v447_v4 = vadd.f32 %v3630_v30, %v408_v44  ;;  %v678_v32 = vmul.f32 %v3126_v46, %v3675_v56 }
  0xb5   : > { %v2233_v34 = vadd.f32 %v2144_v49, %v1989_v43  ;;  %v1678_v53 = vadd.f32 %v1590_v10, %v1434_v59  ;;  %v2146_v0 = vsel %vm994_vm1, %v2143_v11, %v2145_v9  ;;  %v790_v22 = vrot.slane %v677_v25, 1  ;;  %v371_v49 = vld [vmem:[%s3094_s18 + $0xa8] sm:$0xff] }
  0xb6   : > { %v478_v17 = vmax.f32 %v446_v27, 0.0  ;;  %v479_v50 = vmax.f32 %v447_v4, 0.0  ;;  %v791_v15 = vrot.slane %v678_v32, 1  ;;  %v922_v16 = vmul.f32 %v3128_v47, %v3669_v7 }
  0xb7   : > { %2854 = vmatprep.mubr.f32.mxu0 %v2233_v34  ;;  %v1746_v38 = vadd.f32 %v1714_v62, %v1678_v53  ;;  %v923_v33 = vmul.f32 %v3128_v47, %v3675_v56  ;;  %v1159_v39 = vmul.f32 %v3134_v51, %v3741_v36  ;;  %v1235_v18 = vmul.f32 %v3140_v60, %v3741_v36 }
  0xb8   : > { %511 = vst [vmem:[#allocation2 + $0xf1] sm:$0xff] %v478_v17  ;;  %512 = vst [vmem:[#allocation2 + $0xf9] sm:$0xff] %v479_v50  ;;  %v792_v23 = vsel %vm749_vm0, %v790_v22, %v791_v15  ;;  %v1035_v55 = vrot.slane %v922_v16, 2  ;;  %v1236_v7 = vmul.f32 %v3140_v60, %v3748_v28  ;;  %v1479_v21 = vmul.f32 %v3146_v2, %v3741_v36 }
  0xb9   : > { %v1990_v57 = vadd.f32 %v1902_v40, %v1746_v38  ;;  %v878_v29 = vadd.f32 %v792_v23, %v601_v35  ;;  %v1036_v58 = vrot.slane %v923_v33, 2  ;;  %v1347_v11 = vrot.slane %v1235_v18, 1 }
  0xba   : > { %v1348_v37 = vrot.slane %v1236_v7, 1  ;;  %v1480_v26 = vmul.f32 %v3146_v2, %v3748_v28  ;;  %v1591_v63 = vrot.slane %v1479_v21, 2  ;;  %v602_v6 = vmul.f32 %v3124_v45, %v3675_v56 }
  0xbb   : > { %v2234_v12 = vadd.f32 %v2146_v0, %v1990_v57  ;;  %v1037_v62 = vsel %vm994_vm1, %v1035_v55, %v1036_v58  ;;  %v679_v42 = vmul.f32 %v3126_v46, %v3694_v41  ;;  %v924_v48 = vmul.f32 %v3128_v47, %v3694_v41 }
  0xbc   : > { %v1123_v19 = vadd.f32 %v1037_v62, %v878_v29  ;;  %v1349_v13 = vsel %vm749_vm0, %v1347_v11, %v1348_v37  ;;  %v1592_v8 = vrot.slane %v1480_v26, 2  ;;  %v1160_v61 = vmul.f32 %v3134_v51, %v3748_v28 }
  0xbd   : > { %2855 = vmatmul.mubr.f32.gmra.mrb[14].mxu0 %v2234_v12  ;;  %v793_v56 = vrot.slane %v679_v42, 1  ;;  %v1038_v10 = vrot.slane %v924_v48, 2  ;;  %v1237_v31 = vmul.f32 %v3140_v60, %v3762_v1  ;;  %v1481_v20 = vmul.f32 %v3146_v2, %v3762_v1 }
  0xbe   : > { %v1191_v52 = vadd.f32 %v1159_v39, %v1123_v19  ;;  %v1593_v41 = vsel %vm994_vm1, %v1591_v63, %v1592_v8  ;;  %v409_v44 = vmul.f32 %v3619_v5, %v370_v54  ;;  %v410_v35 = vmul.f32 %v3619_v5, %v371_v49 }
  0xbf   : > { %v3822_v43 = vld [vmem:[#allocation2 + $0xf0] sm:$0xff]  ;;  %v3824_v59 = vld [vmem:[#allocation2 + $0xf8] sm:$0xff]  ;;  %v794_v9 = vsel %vm749_vm0, %v791_v15, %v793_v56  ;;  %v1039_v25 = vsel %vm994_vm1, %v1036_v58, %v1038_v10  ;;  %v1350_v40 = vrot.slane %v1237_v31, 1  ;;  %v1594_v27 = vrot.slane %v1481_v20, 2  ;;  %v3840_v23 = vld [vmem:[#allocation2 + $0x100] sm:$0x3] }
  0xc0   : > { %v1435_v4 = vadd.f32 %v1349_v13, %v1191_v52  ;;  %v1715_v32 = vmul.f32 %v3149_v3, %v3822_v43  ;;  %v1791_v34 = vmul.f32 %v3160_v14, %v3822_v43  ;;  %v1792_v53 = vmul.f32 %v3160_v14, %v3824_v59 }
  0xc1   : > { %v2035_v0 = vmul.f32 %v3684_v24, %v3822_v43  ;;  %v2036_v22 = vmul.f32 %v3684_v24, %v3824_v59  ;;  %v879_v17 = vadd.f32 %v794_v9, %v602_v6  ;;  %v1351_v50 = vsel %vm749_vm0, %v1348_v37, %v1350_v40 }
  0xc2   : > { %v1679_v15 = vadd.f32 %v1593_v41, %v1435_v4  ;;  %v1903_v16 = vrot.slane %v1791_v34, 1  ;;  %v1904_v38 = vrot.slane %v1792_v53, 1  ;;  %v1595_v33 = vsel %vm994_vm1, %v1592_v8, %v1594_v27 }
  0xc3   : > { %v2147_v39 = vrot.slane %v2035_v0, 2  ;;  %v2148_v18 = vrot.slane %v2036_v22, 2  ;;  %v1124_v55 = vadd.f32 %v1039_v25, %v879_v17  ;;  %v1716_v7 = vmul.f32 %v3149_v3, %v3824_v59 }
  0xc4   : > { %v1747_v21 = vadd.f32 %v1715_v32, %v1679_v15  ;;  %v1905_v57 = vsel %vm749_vm0, %v1903_v16, %v1904_v38  ;;  %v1793_v29 = vmul.f32 %v3160_v14, %v3840_v23  ;;  %v2037_v58 = vmul.f32 %v3684_v24, %v3840_v23 }
  0xc5   : > { %v2149_v11 = vsel %vm994_vm1, %v2147_v39, %v2148_v18  ;;  %v1192_v37 = vadd.f32 %v1160_v61, %v1124_v55  ;;  %v448_v26 = vadd.f32 %v3630_v30, %v409_v44  ;;  %v449_v63 = vadd.f32 %v3630_v30, %v410_v35 }
  0xc6   : > { %v1991_v6 = vadd.f32 %v1905_v57, %v1747_v21  ;;  %v1906_v12 = vrot.slane %v1793_v29, 1  ;;  %v2150_v62 = vrot.slane %v2037_v58, 2  ;;  %v603_v42 = vmul.f32 %v3124_v45, %v3741_v36 }
  0xc7   : > { %v1436_v48 = vadd.f32 %v1351_v50, %v1192_v37  ;;  %v480_v54 = vmax.f32 %v448_v26, 0.0  ;;  %v481_v49 = vmax.f32 %v449_v63, 0.0  ;;  %v680_v19 = vmul.f32 %v3126_v46, %v3741_v36 }
  0xc8   : > { %v2235_v13 = vadd.f32 %v2149_v11, %v1991_v6  ;;  %v1907_v8 = vsel %vm749_vm0, %v1904_v38, %v1906_v12  ;;  %v2151_v61 = vsel %vm994_vm1, %v2148_v18, %v2150_v62  ;;  %v681_v56 = vmul.f32 %v3126_v46, %v3748_v28 }
  0xc9   : > { %v1680_v10 = vadd.f32 %v1595_v33, %v1436_v48  ;;  %513 = vst [vmem:[#allocation2 + $0x109] sm:$0xff] %v480_v54  ;;  %514 = vst [vmem:[#allocation2 + $0x111] sm:$0xff] %v481_v49  ;;  %v795_v31 = vrot.slane %v680_v19, 1  ;;  %v925_v20 = vmul.f32 %v3128_v47, %v3741_v36  ;;  %v926_v52 = vmul.f32 %v3128_v47, %v3748_v28 }
  0xca   : > { %2857 = vmatprep.mubr.f32.mxu1 %v2235_v13  ;;  %v796_v41 = vrot.slane %v681_v56, 1  ;;  %v1161_v44 = vmul.f32 %v3134_v51, %v3822_v43  ;;  %v1238_v35 = vmul.f32 %v3140_v60, %v3822_v43  ;;  %v1239_v9 = vmul.f32 %v3140_v60, %v3824_v59 }
  0xcb   : > { %v1748_v25 = vadd.f32 %v1716_v7, %v1680_v10  ;;  %v1040_v40 = vrot.slane %v925_v20, 2  ;;  %v1041_v27 = vrot.slane %v926_v52, 2  ;;  %v1482_v36 = vmul.f32 %v3146_v2, %v3822_v43 }
  0xcc   : > { %v797_v4 = vsel %vm749_vm0, %v795_v31, %v796_v41  ;;  %v1352_v32 = vrot.slane %v1238_v35, 1  ;;  %v1353_v34 = vrot.slane %v1239_v9, 1  ;;  %v1483_v53 = vmul.f32 %v3146_v2, %v3824_v59  ;;  %v372_v35 = vld [vmem:[%s3094_s18 + $0xb0] sm:$0xff] }
  0xcd   : > { %v1992_v0 = vadd.f32 %v1907_v8, %v1748_v25  ;;  %v880_v22 = vadd.f32 %v797_v4, %v603_v42  ;;  %v1042_v17 = vsel %vm994_vm1, %v1040_v40, %v1041_v27  ;;  %v1596_v50 = vrot.slane %v1482_v36, 2 }
  0xce   : > { %v1354_v15 = vsel %vm749_vm0, %v1352_v32, %v1353_v34  ;;  %v1597_v16 = vrot.slane %v1483_v53, 2  ;;  %v604_v38 = vmul.f32 %v3124_v45, %v3748_v28  ;;  %v682_v33 = vmul.f32 %v3126_v46, %v3762_v1 }
  0xcf   : > { %v2236_v39 = vadd.f32 %v2151_v61, %v1992_v0  ;;  %v1125_v18 = vadd.f32 %v1042_v17, %v880_v22  ;;  %v927_v55 = vmul.f32 %v3128_v47, %v3762_v1  ;;  %v1162_v7 = vmul.f32 %v3134_v51, %v3824_v59 }
  0xd0   : > { %v3885_v21 = vld [vmem:[#allocation2 + $0x108] sm:$0xff]  ;;  %v3887_v57 = vld [vmem:[#allocation2 + $0x110] sm:$0xff]  ;;  %v1598_v29 = vsel %vm994_vm1, %v1596_v50, %v1597_v16  ;;  %v798_v58 = vrot.slane %v682_v33, 1  ;;  %v1240_v28 = vmul.f32 %v3140_v60, %v3840_v23  ;;  %v1484_v11 = vmul.f32 %v3146_v2, %v3840_v23  ;;  %v3907_v20 = vld [vmem:[#allocation2 + $0x118] sm:$0x3] }
  0xd1   : > { %2858 = vmatmul.mubr.f32.vlgmr.msra.gmra.mrb[0].mxu1 %v2236_v39  ;;  %v1193_v37 = vadd.f32 %v1161_v44, %v1125_v18  ;;  %v1717_v1 = vmul.f32 %v3149_v3, %v3885_v21  ;;  %v1794_v26 = vmul.f32 %v3160_v14, %v3885_v21  ;;  %v1795_v63 = vmul.f32 %v3160_v14, %v3887_v57 }
  0xd2   : > { %v2038_v6 = vmul.f32 %v3684_v24, %v3885_v21  ;;  %v2039_v12 = vmul.f32 %v3684_v24, %v3887_v57  ;;  %v799_v62 = vsel %vm749_vm0, %v796_v41, %v798_v58  ;;  %v1043_v42 = vrot.slane %v927_v55, 2  ;;  %v373_v41 = vld [vmem:[%s3094_s18 + $0xb8] sm:$0xff] }
  0xd3   : > { %v1437_v48 = vadd.f32 %v1354_v15, %v1193_v37  ;;  %v1908_v54 = vrot.slane %v1794_v26, 1  ;;  %v1909_v49 = vrot.slane %v1795_v63, 1  ;;  %v881_v19 = vadd.f32 %v799_v62, %v604_v38 }
  0xd4   : > { %v2152_v13 = vrot.slane %v2038_v6, 2  ;;  %v2153_v8 = vrot.slane %v2039_v12, 2  ;;  %v1044_v61 = vsel %vm994_vm1, %v1041_v27, %v1043_v42  ;;  %v1355_v56 = vrot.slane %v1240_v28, 1 }
  0xd5   : > { %v1681_v10 = vadd.f32 %v1598_v29, %v1437_v48  ;;  %v1910_v31 = vsel %vm749_vm0, %v1908_v54, %v1909_v49  ;;  %v1126_v52 = vadd.f32 %v1044_v61, %v881_v19  ;;  %v1599_v44 = vrot.slane %v1484_v11, 2 }
  0xd6   : > { %v2154_v9 = vsel %vm994_vm1, %v2152_v13, %v2153_v8  ;;  %v1356_v25 = vsel %vm749_vm0, %v1353_v34, %v1355_v56  ;;  %v1718_v40 = vmul.f32 %v3149_v3, %v3887_v57  ;;  %v1796_v27 = vmul.f32 %v3160_v14, %v3907_v20 }
  0xd7   : > { %v1749_v36 = vadd.f32 %v1717_v1, %v1681_v10  ;;  %v1194_v4 = vadd.f32 %v1162_v7, %v1126_v52  ;;  %v1600_v32 = vsel %vm994_vm1, %v1597_v16, %v1599_v44  ;;  %v2040_v53 = vmul.f32 %v3684_v24, %v3907_v20 }
  0xd8   : > { %v1911_v0 = vrot.slane %v1796_v27, 1  ;;  %v411_v22 = vmul.f32 %v3619_v5, %v372_v35  ;;  %v412_v17 = vmul.f32 %v3619_v5, %v373_v41  ;;  %v605_v34 = vmul.f32 %v3124_v45, %v3822_v43 }
  0xd9   : > { %v1993_v50 = vadd.f32 %v1910_v31, %v1749_v36  ;;  %v1438_v15 = vadd.f32 %v1356_v25, %v1194_v4  ;;  %v2155_v38 = vrot.slane %v2040_v53, 2  ;;  %v683_v33 = vmul.f32 %v3126_v46, %v3822_v43  ;;  %v375_v25 = vld [vmem:[%s3094_s18 + $0xc8] sm:$0xff] }
  0xda   : > { %v1912_v39 = vsel %vm749_vm0, %v1909_v49, %v1911_v0  ;;  %v450_v16 = vadd.f32 %v3630_v30, %v411_v22  ;;  %v451_v18 = vadd.f32 %v3630_v30, %v412_v17  ;;  %v684_v55 = vmul.f32 %v3126_v46, %v3824_v59 }
  0xdb   : > { %v2237_v7 = vadd.f32 %v2154_v9, %v1993_v50  ;;  %v1682_v29 = vadd.f32 %v1600_v32, %v1438_v15  ;;  %v2156_v58 = vsel %vm994_vm1, %v2153_v8, %v2155_v38  ;;  %v800_v28 = vrot.slane %v683_v33, 1  ;;  %v374_v9 = vld [vmem:[%s3094_s18 + $0xc0] sm:$0xff] }
  0xdc   : > { %v482_v11 = vmax.f32 %v450_v16, 0.0  ;;  %v483_v37 = vmax.f32 %v451_v18, 0.0  ;;  %v801_v1 = vrot.slane %v684_v55, 1  ;;  %v928_v26 = vmul.f32 %v3128_v47, %v3822_v43 }
  0xdd   : > { %2860 = vmatprep.mubr.f32.mxu1 %v2237_v7  ;;  %v1750_v63 = vadd.f32 %v1718_v40, %v1682_v29  ;;  %v929_v6 = vmul.f32 %v3128_v47, %v3824_v59  ;;  %v1163_v12 = vmul.f32 %v3134_v51, %v3885_v21  ;;  %v1241_v62 = vmul.f32 %v3140_v60, %v3885_v21 }
  0xde   : > { %515 = vst [vmem:[#allocation2 + $0x121] sm:$0xff] %v482_v11  ;;  %516 = vst [vmem:[#allocation2 + $0x129] sm:$0xff] %v483_v37  ;;  %v802_v42 = vsel %vm749_vm0, %v800_v28, %v801_v1  ;;  %v1045_v48 = vrot.slane %v928_v26, 2  ;;  %v1242_v43 = vmul.f32 %v3140_v60, %v3887_v57  ;;  %v1485_v54 = vmul.f32 %v3146_v2, %v3885_v21 }
  0xdf   : > { %v1994_v49 = vadd.f32 %v1912_v39, %v1750_v63  ;;  %v882_v19 = vadd.f32 %v802_v42, %v605_v34  ;;  %v1046_v13 = vrot.slane %v929_v6, 2  ;;  %v1357_v8 = vrot.slane %v1241_v62, 1 }
  0xe0   : > { %v1358_v61 = vrot.slane %v1242_v43, 1  ;;  %v1486_v56 = vmul.f32 %v3146_v2, %v3887_v57  ;;  %v1601_v10 = vrot.slane %v1485_v54, 2  ;;  %v606_v31 = vmul.f32 %v3124_v45, %v3824_v59 }
  0xe1   : > { %v2238_v52 = vadd.f32 %v2156_v58, %v1994_v49  ;;  %v1047_v44 = vsel %vm994_vm1, %v1045_v48, %v1046_v13  ;;  %v685_v35 = vmul.f32 %v3126_v46, %v3840_v23  ;;  %v930_v41 = vmul.f32 %v3128_v47, %v3840_v23 }
  0xe2   : > { %v1127_v40 = vadd.f32 %v1047_v44, %v882_v19  ;;  %v1359_v27 = vsel %vm749_vm0, %v1357_v8, %v1358_v61  ;;  %v1602_v36 = vrot.slane %v1486_v56, 2  ;;  %v1164_v4 = vmul.f32 %v3134_v51, %v3887_v57 }
  0xe3   : > { %2861 = vmatmul.mubr.f32.gmra.mrb[2].mxu1 %v2238_v52  ;;  %v803_v59 = vrot.slane %v685_v35, 1  ;;  %v1048_v32 = vrot.slane %v930_v41, 2  ;;  %v1243_v53 = vmul.f32 %v3140_v60, %v3907_v20  ;;  %v1487_v0 = vmul.f32 %v3146_v2, %v3907_v20 }
  0xe4   : > { %v1195_v22 = vadd.f32 %v1163_v12, %v1127_v40  ;;  %v1603_v23 = vsel %vm994_vm1, %v1601_v10, %v1602_v36  ;;  %v413_v17 = vmul.f32 %v3619_v5, %v374_v9  ;;  %v414_v34 = vmul.f32 %v3619_v5, %v375_v25 }
  0xe5   : > { %v3966_v50 = vld [vmem:[#allocation2 + $0x120] sm:$0xff]  ;;  %v3968_v15 = vld [vmem:[#allocation2 + $0x128] sm:$0xff]  ;;  %v804_v38 = vsel %vm749_vm0, %v801_v1, %v803_v59  ;;  %v1049_v33 = vsel %vm994_vm1, %v1046_v13, %v1048_v32  ;;  %v1360_v39 = vrot.slane %v1243_v53, 1  ;;  %v1604_v16 = vrot.slane %v1487_v0, 2  ;;  %v3984_v62 = vld [vmem:[#allocation2 + $0x130] sm:$0x3] }
  0xe6   : > { %v1439_v18 = vadd.f32 %v1359_v27, %v1195_v22  ;;  %v1719_v55 = vmul.f32 %v3149_v3, %v3966_v50  ;;  %v1797_v7 = vmul.f32 %v3160_v14, %v3966_v50  ;;  %v1798_v5 = vmul.f32 %v3160_v14, %v3968_v15 }
  0xe7   : > { %v2041_v29 = vmul.f32 %v3684_v24, %v3966_v50  ;;  %v2042_v58 = vmul.f32 %v3684_v24, %v3968_v15  ;;  %v883_v28 = vadd.f32 %v804_v38, %v606_v31  ;;  %v1361_v11 = vsel %vm749_vm0, %v1358_v61, %v1360_v39 }
  0xe8   : > { %v1683_v37 = vadd.f32 %v1603_v23, %v1439_v18  ;;  %v1913_v1 = vrot.slane %v1797_v7, 1  ;;  %v1914_v26 = vrot.slane %v1798_v5, 1  ;;  %v1605_v63 = vsel %vm994_vm1, %v1602_v36, %v1604_v16 }
  0xe9   : > { %v2157_v6 = vrot.slane %v2041_v29, 2  ;;  %v2158_v12 = vrot.slane %v2042_v58, 2  ;;  %v1128_v42 = vadd.f32 %v1049_v33, %v883_v28  ;;  %v1720_v48 = vmul.f32 %v3149_v3, %v3968_v15 }
  0xea   : > { %v1751_v43 = vadd.f32 %v1719_v55, %v1683_v37  ;;  %v1915_v54 = vsel %vm749_vm0, %v1913_v1, %v1914_v26  ;;  %v1799_v49 = vmul.f32 %v3160_v14, %v3984_v62  ;;  %v2043_v19 = vmul.f32 %v3684_v24, %v3984_v62 }
  0xeb   : > { %v2159_v13 = vsel %vm994_vm1, %v2157_v6, %v2158_v12  ;;  %v1196_v8 = vadd.f32 %v1164_v4, %v1128_v42  ;;  %v452_v61 = vadd.f32 %v3630_v30, %v413_v17  ;;  %v453_v56 = vadd.f32 %v3630_v30, %v414_v34 }
  0xec   : > { %v1995_v10 = vadd.f32 %v1915_v54, %v1751_v43  ;;  %v1916_v31 = vrot.slane %v1799_v49, 1  ;;  %v2160_v52 = vrot.slane %v2043_v19, 2  ;;  %v607_v44 = vmul.f32 %v3124_v45, %v3885_v21 }
  0xed   : > { %v1440_v35 = vadd.f32 %v1361_v11, %v1196_v8  ;;  %v484_v41 = vmax.f32 %v452_v61, 0.0  ;;  %v485_v9 = vmax.f32 %v453_v56, 0.0  ;;  %v686_v25 = vmul.f32 %v3126_v46, %v3885_v21 }
  0xee   : > { %v2239_v40 = vadd.f32 %v2159_v13, %v1995_v10  ;;  %v1917_v27 = vsel %vm749_vm0, %v1914_v26, %v1916_v31  ;;  %v2161_v36 = vsel %vm994_vm1, %v2158_v12, %v2160_v52  ;;  %v687_v30 = vmul.f32 %v3126_v46, %v3887_v57 }
  0xef   : > { %v1684_v4 = vadd.f32 %v1605_v63, %v1440_v35  ;;  %517 = vst [vmem:[#allocation2 + $0x139] sm:$0xff] %v484_v41  ;;  %518 = vst [vmem:[#allocation2 + $0x141] sm:$0xff] %v485_v9  ;;  %v805_v59 = vrot.slane %v686_v25, 1  ;;  %v931_v32 = vmul.f32 %v3128_v47, %v3885_v21  ;;  %v932_v53 = vmul.f32 %v3128_v47, %v3887_v57 }
  0xf0   : > { %2863 = vmatprep.mubr.f32.mxu1 %v2239_v40  ;;  %v806_v0 = vrot.slane %v687_v30, 1  ;;  %v1165_v22 = vmul.f32 %v3134_v51, %v3966_v50  ;;  %v1244_v23 = vmul.f32 %v3140_v60, %v3966_v50  ;;  %v1245_v17 = vmul.f32 %v3140_v60, %v3968_v15 }
  0xf1   : > { %v1752_v34 = vadd.f32 %v1720_v48, %v1684_v4  ;;  %v1050_v38 = vrot.slane %v931_v32, 2  ;;  %v1051_v33 = vrot.slane %v932_v53, 2  ;;  %v1488_v21 = vmul.f32 %v3146_v2, %v3966_v50  ;;  %v376_v53 = vld [vmem:[%s3094_s18 + $0xd0] sm:$0xff] }
  0xf2   : > { %v807_v39 = vsel %vm749_vm0, %v805_v59, %v806_v0  ;;  %v1362_v16 = vrot.slane %v1244_v23, 1  ;;  %v1363_v18 = vrot.slane %v1245_v17, 1  ;;  %v1489_v55 = vmul.f32 %v3146_v2, %v3968_v15 }
  0xf3   : > { %v1996_v7 = vadd.f32 %v1917_v27, %v1752_v34  ;;  %v884_v5 = vadd.f32 %v807_v39, %v607_v44  ;;  %v1052_v29 = vsel %vm994_vm1, %v1050_v38, %v1051_v33  ;;  %v1606_v58 = vrot.slane %v1488_v21, 2 }
  0xf4   : > { %v1364_v28 = vsel %vm749_vm0, %v1362_v16, %v1363_v18  ;;  %v1607_v11 = vrot.slane %v1489_v55, 2  ;;  %v608_v37 = vmul.f32 %v3124_v45, %v3887_v57  ;;  %v688_v1 = vmul.f32 %v3126_v46, %v3907_v20  ;;  %v4067_v55 = vld [vmem:[%s4421_s1] ss:$0 sm:$0xff] }
  0xf5   : > { %v2240_v26 = vadd.f32 %v2161_v36, %v1996_v7  ;;  %v1129_v63 = vadd.f32 %v1052_v29, %v884_v5  ;;  %v933_v6 = vmul.f32 %v3128_v47, %v3907_v20  ;;  %v1166_v12 = vmul.f32 %v3134_v51, %v3968_v15 }
  0xf6   : > { %v4029_v42 = vld [vmem:[#allocation2 + $0x138] sm:$0xff]  ;;  %v4031_v48 = vld [vmem:[#allocation2 + $0x140] sm:$0xff]  ;;  %v1608_v43 = vsel %vm994_vm1, %v1606_v58, %v1607_v11  ;;  %v808_v54 = vrot.slane %v688_v1, 1  ;;  %v1246_v57 = vmul.f32 %v3140_v60, %v3984_v62  ;;  %v1490_v49 = vmul.f32 %v3146_v2, %v3984_v62  ;;  %v4051_v4 = vld [vmem:[#allocation2 + $0x148] sm:$0x3] }
  0xf7   : > { %2864 = vmatmul.mubr.f32.gmra.mrb[4].mxu1 %v2240_v26  ;;  %v1197_v19 = vadd.f32 %v1165_v22, %v1129_v63  ;;  %v1721_v20 = vmul.f32 %v3149_v3, %v4029_v42  ;;  %v1800_v13 = vmul.f32 %v3160_v14, %v4029_v42  ;;  %v1801_v8 = vmul.f32 %v3160_v14, %v4031_v48 }
  0xf8   : > { %v2044_v61 = vmul.f32 %v3684_v24, %v4029_v42  ;;  %v2045_v56 = vmul.f32 %v3684_v24, %v4031_v48  ;;  %v809_v10 = vsel %vm749_vm0, %v806_v0, %v808_v54  ;;  %v1053_v31 = vrot.slane %v933_v6, 2  ;;  %v377_v0 = vld [vmem:[%s3094_s18 + $0xd8] sm:$0xff] }
  0xf9   : > { %v1441_v52 = vadd.f32 %v1364_v28, %v1197_v19  ;;  %v1918_v44 = vrot.slane %v1800_v13, 1  ;;  %v1919_v35 = vrot.slane %v1801_v8, 1  ;;  %v885_v41 = vadd.f32 %v809_v10, %v608_v37  ;;  %v4079_v37 = vld [vmem:[%s4422_s2] ss:$0 sm:$0xff] }
  0xfa   : > { %v2162_v9 = vrot.slane %v2044_v61, 2  ;;  %v2163_v25 = vrot.slane %v2045_v56, 2  ;;  %v1054_v40 = vsel %vm994_vm1, %v1051_v33, %v1053_v31  ;;  %v1365_v27 = vrot.slane %v1246_v57, 1 }
  0xfb   : > { %v1685_v36 = vadd.f32 %v1608_v43, %v1441_v52  ;;  %v1920_v30 = vsel %vm749_vm0, %v1918_v44, %v1919_v35  ;;  %v1130_v59 = vadd.f32 %v1054_v40, %v885_v41  ;;  %v1609_v32 = vrot.slane %v1490_v49, 2 }
  0xfc   : > { %v2164_v22 = vsel %vm994_vm1, %v2162_v9, %v2163_v25  ;;  %v1366_v23 = vsel %vm749_vm0, %v1363_v18, %v1365_v27  ;;  %v1722_v17 = vmul.f32 %v3149_v3, %v4031_v48  ;;  %v1802_v34 = vmul.f32 %v3160_v14, %v4051_v4 }
  0xfd   : > { %v1753_v38 = vadd.f32 %v1721_v20, %v1685_v36  ;;  %v1198_v33 = vadd.f32 %v1166_v12, %v1130_v59  ;;  %v1610_v21 = vsel %vm994_vm1, %v1607_v11, %v1609_v32  ;;  %v2046_v39 = vmul.f32 %v3684_v24, %v4051_v4 }
  0xfe   : > { %v1921_v16 = vrot.slane %v1802_v34, 1  ;;  %v415_v18 = vmul.f32 %v4067_v55, %v376_v53  ;;  %v416_v7 = vmul.f32 %v4067_v55, %v377_v0  ;;  %v609_v5 = vmul.f32 %v3124_v45, %v3966_v50  ;;  %v378_v0 = vld [vmem:[%s3094_s18 + $0xe0] sm:$0xff] }
  0xff   : > { %v1997_v29 = vadd.f32 %v1920_v30, %v1753_v38  ;;  %v1442_v58 = vadd.f32 %v1366_v23, %v1198_v33  ;;  %v2165_v28 = vrot.slane %v2046_v39, 2  ;;  %v689_v11 = vmul.f32 %v3126_v46, %v3966_v50 }
 0x100   : > { %v1922_v24 = vsel %vm749_vm0, %v1919_v35, %v1921_v16  ;;  %v454_v1 = vadd.f32 %v4079_v37, %v415_v18  ;;  %v455_v26 = vadd.f32 %v4079_v37, %v416_v7  ;;  %v690_v63 = vmul.f32 %v3126_v46, %v3968_v15 }
 0x101   : > { %v2241_v6 = vadd.f32 %v2164_v22, %v1997_v29  ;;  %v1686_v12 = vadd.f32 %v1610_v21, %v1442_v58  ;;  %v2166_v43 = vsel %vm994_vm1, %v2163_v25, %v2165_v28  ;;  %v810_v54 = vrot.slane %v689_v11, 1  ;;  %v379_v22 = vld [vmem:[%s3094_s18 + $0xe8] sm:$0xff] }
 0x102   : > { %v486_v57 = vmax.f32 %v454_v1, 0.0  ;;  %v487_v49 = vmax.f32 %v455_v26, 0.0  ;;  %v811_v19 = vrot.slane %v690_v63, 1  ;;  %v934_v20 = vmul.f32 %v3128_v47, %v3966_v50 }
 0x103   : > { %2866 = vmatprep.mubr.f32.mxu1 %v2241_v6  ;;  %v1754_v13 = vadd.f32 %v1722_v17, %v1686_v12  ;;  %v935_v8 = vmul.f32 %v3128_v47, %v3968_v15  ;;  %v1167_v61 = vmul.f32 %v3134_v51, %v4029_v42  ;;  %v1247_v56 = vmul.f32 %v3140_v60, %v4029_v42  ;;  %v4142_v12 = vld [vmem:[%s4423_s3 + $0x8] ss:$0 sm:$0xff] }
 0x104   : > { %519 = vst [vmem:[#allocation2 + $0x151] sm:$0xff] %v486_v57  ;;  %520 = vst [vmem:[#allocation2 + $0x159] sm:$0xff] %v487_v49  ;;  %v812_v10 = vsel %vm749_vm0, %v810_v54, %v811_v19  ;;  %v1055_v31 = vrot.slane %v934_v20, 2  ;;  %v1248_v50 = vmul.f32 %v3140_v60, %v4031_v48  ;;  %v1491_v52 = vmul.f32 %v3146_v2, %v4029_v42 }
 0x105   : > { %v1998_v44 = vadd.f32 %v1922_v24, %v1754_v13  ;;  %v886_v35 = vadd.f32 %v812_v10, %v609_v5  ;;  %v1056_v41 = vrot.slane %v935_v8, 2  ;;  %v1367_v9 = vrot.slane %v1247_v56, 1 }
 0x106   : > { %v1368_v25 = vrot.slane %v1248_v50, 1  ;;  %v1492_v40 = vmul.f32 %v3146_v2, %v4031_v48  ;;  %v1611_v27 = vrot.slane %v1491_v52, 2  ;;  %v610_v36 = vmul.f32 %v3124_v45, %v3968_v15 }
 0x107   : > { %v2242_v30 = vadd.f32 %v2166_v43, %v1998_v44  ;;  %v1057_v59 = vsel %vm994_vm1, %v1055_v31, %v1056_v41  ;;  %v691_v32 = vmul.f32 %v3126_v46, %v3984_v62  ;;  %v936_v53 = vmul.f32 %v3128_v47, %v3984_v62 }
 0x108   : > { %v1131_v23 = vadd.f32 %v1057_v59, %v886_v35  ;;  %v1369_v17 = vsel %vm749_vm0, %v1367_v9, %v1368_v25  ;;  %v1612_v34 = vrot.slane %v1492_v40, 2  ;;  %v1168_v38 = vmul.f32 %v3134_v51, %v4031_v48 }
 0x109   : > { %2867 = vmatmul.mubr.f32.gmra.mrb[6].mxu1 %v2242_v30  ;;  %v813_v15 = vrot.slane %v691_v32, 1  ;;  %v1058_v33 = vrot.slane %v936_v53, 2  ;;  %v1249_v21 = vmul.f32 %v3140_v60, %v4051_v4  ;;  %v1493_v39 = vmul.f32 %v3146_v2, %v4051_v4 }
 0x10a   : > { %v1199_v62 = vadd.f32 %v1167_v61, %v1131_v23  ;;  %v1613_v16 = vsel %vm994_vm1, %v1611_v27, %v1612_v34  ;;  %v417_v18 = vmul.f32 %v4067_v55, %v378_v0  ;;  %v418_v7 = vmul.f32 %v4067_v55, %v379_v22 }
 0x10b   : > { %v4120_v5 = vld [vmem:[#allocation2 + $0x150] sm:$0xff]  ;;  %v4122_v29 = vld [vmem:[#allocation2 + $0x158] sm:$0xff]  ;;  %v814_v58 = vsel %vm749_vm0, %v811_v19, %v813_v15  ;;  %v1059_v28 = vsel %vm994_vm1, %v1056_v41, %v1058_v33  ;;  %v1370_v11 = vrot.slane %v1249_v21, 1  ;;  %v1614_v24 = vrot.slane %v1493_v39, 2  ;;  %v4152_v31 = vld [vmem:[#allocation2 + $0x160] sm:$0x3] }
 0x10c   : > { %v1443_v1 = vadd.f32 %v1369_v17, %v1199_v62  ;;  %v1723_v26 = vmul.f32 %v3149_v3, %v4120_v5  ;;  %v1803_v63 = vmul.f32 %v3160_v14, %v4120_v5  ;;  %v1804_v6 = vmul.f32 %v3160_v14, %v4122_v29 }
 0x10d   : > { %v2047_v43 = vmul.f32 %v4142_v12, %v4120_v5  ;;  %v2048_v54 = vmul.f32 %v4142_v12, %v4122_v29  ;;  %v887_v57 = vadd.f32 %v814_v58, %v610_v36  ;;  %v1371_v49 = vsel %vm749_vm0, %v1368_v25, %v1370_v11 }
 0x10e   : > { %v1687_v19 = vadd.f32 %v1613_v16, %v1443_v1  ;;  %v1923_v20 = vrot.slane %v1803_v63, 1  ;;  %v1924_v13 = vrot.slane %v1804_v6, 1  ;;  %v1615_v8 = vsel %vm994_vm1, %v1612_v34, %v1614_v24  ;;  %v4150_v61 = vpop.f32.mrb[0].mxu0 }
 0x10f   : > { %v2167_v56 = vrot.slane %v2047_v43, 2  ;;  %v2168_v10 = vrot.slane %v2048_v54, 2  ;;  %v1132_v50 = vadd.f32 %v1059_v28, %v887_v57  ;;  %v1724_v52 = vmul.f32 %v3149_v3, %v4122_v29  ;;  %2493 = vst [vmem:[%s4137_s20 + $0x8] sm:$0xff] %v4150_v61  ;;  %v4158_v44 = vpop.f32.mrb[1].mxu0 }
 0x110   : > { %v1755_v35 = vadd.f32 %v1723_v26, %v1687_v19  ;;  %v1925_v41 = vsel %vm749_vm0, %v1923_v20, %v1924_v13  ;;  %v1805_v9 = vmul.f32 %v3160_v14, %v4152_v31  ;;  %v2049_v25 = vmul.f32 %v4142_v12, %v4152_v31  ;;  %2492 = vst [vmem:[%s4137_s20] sm:$0xff] %v4158_v44 }
 0x111   : > { %v2169_v40 = vsel %vm994_vm1, %v2167_v56, %v2168_v10  ;;  %v1200_v27 = vadd.f32 %v1168_v38, %v1132_v50  ;;  %v456_v36 = vadd.f32 %v4079_v37, %v417_v18  ;;  %v457_v30 = vadd.f32 %v4079_v37, %v418_v7 }
 0x112   : > { %v1999_v59 = vadd.f32 %v1925_v41, %v1755_v35  ;;  %v1926_v32 = vrot.slane %v1805_v9, 1  ;;  %v2170_v53 = vrot.slane %v2049_v25, 2  ;;  %v611_v0 = vmul.f32 %v3124_v45, %v4029_v42 }
 0x113   : > { %v1444_v22 = vadd.f32 %v1371_v49, %v1200_v27  ;;  %v488_v23 = vmax.f32 %v456_v36, 0.0  ;;  %v489_v17 = vmax.f32 %v457_v30, 0.0  ;;  %v692_v34 = vmul.f32 %v3126_v46, %v4029_v42 }
 0x114   : > { %v2243_v15 = vadd.f32 %v2169_v40, %v1999_v59  ;;  %v1927_v33 = vsel %vm749_vm0, %v1924_v13, %v1926_v32  ;;  %v2171_v38 = vsel %vm994_vm1, %v2168_v10, %v2170_v53  ;;  %v693_v21 = vmul.f32 %v3126_v46, %v4031_v48 }
 0x115   : > { %v1688_v39 = vadd.f32 %v1615_v8, %v1444_v22  ;;  %521 = vst [vmem:[#allocation2 + $0x169] sm:$0xff] %v488_v23  ;;  %522 = vst [vmem:[#allocation2 + $0x171] sm:$0xff] %v489_v17  ;;  %v815_v62 = vrot.slane %v692_v34, 1  ;;  %v937_v16 = vmul.f32 %v3128_v47, %v4029_v42  ;;  %v938_v18 = vmul.f32 %v3128_v47, %v4031_v48 }
 0x116   : > { %2869 = vmatprep.mubr.f32.mxu1 %v2243_v15  ;;  %v816_v7 = vrot.slane %v693_v21, 1  ;;  %v1169_v58 = vmul.f32 %v3134_v51, %v4120_v5  ;;  %v1250_v28 = vmul.f32 %v3140_v60, %v4120_v5  ;;  %v1251_v11 = vmul.f32 %v3140_v60, %v4122_v29 }
 0x117   : > { %v1756_v24 = vadd.f32 %v1724_v52, %v1688_v39  ;;  %v1060_v1 = vrot.slane %v937_v16, 2  ;;  %v1061_v26 = vrot.slane %v938_v18, 2  ;;  %v1494_v42 = vmul.f32 %v3146_v2, %v4120_v5 }
 0x118   : > { %v817_v63 = vsel %vm749_vm0, %v815_v62, %v816_v7  ;;  %v1372_v6 = vrot.slane %v1250_v28, 1  ;;  %v1373_v43 = vrot.slane %v1251_v11, 1  ;;  %v1495_v54 = vmul.f32 %v3146_v2, %v4122_v29  ;;  %v380_v11 = vld [vmem:[%s3094_s18 + $0xf0] sm:$0xff] }
 0x119   : > { %v2000_v57 = vadd.f32 %v1927_v33, %v1756_v24  ;;  %v888_v49 = vadd.f32 %v817_v63, %v611_v0  ;;  %v1062_v19 = vsel %vm994_vm1, %v1060_v1, %v1061_v26  ;;  %v1616_v20 = vrot.slane %v1494_v42, 2  ;;  %v381_v24 = vld [vmem:[%s3094_s18 + $0xf8] sm:$0xff] }
 0x11a   : > { %v1374_v13 = vsel %vm749_vm0, %v1372_v6, %v1373_v43  ;;  %v1617_v8 = vrot.slane %v1495_v54, 2  ;;  %v612_v56 = vmul.f32 %v3124_v45, %v4031_v48  ;;  %v694_v10 = vmul.f32 %v3126_v46, %v4051_v4 }
 0x11b   : > { %v2244_v50 = vadd.f32 %v2171_v38, %v2000_v57  ;;  %v1133_v52 = vadd.f32 %v1062_v19, %v888_v49  ;;  %v939_v35 = vmul.f32 %v3128_v47, %v4051_v4  ;;  %v1170_v41 = vmul.f32 %v3134_v51, %v4122_v29 }
 0x11c   : > { %v4203_v9 = vld [vmem:[#allocation2 + $0x168] sm:$0xff]  ;;  %v4205_v25 = vld [vmem:[#allocation2 + $0x170] sm:$0xff]  ;;  %v1618_v40 = vsel %vm994_vm1, %v1616_v20, %v1617_v8  ;;  %v818_v27 = vrot.slane %v694_v10, 1  ;;  %v1252_v48 = vmul.f32 %v3140_v60, %v4152_v31  ;;  %v1496_v36 = vmul.f32 %v3146_v2, %v4152_v31  ;;  %v4224_v18 = vld [vmem:[#allocation2 + $0x178] sm:$0x3] }
 0x11d   : > { %2870 = vmatmul.mubr.f32.gmra.mrb[8].mxu1 %v2244_v50  ;;  %v1201_v30 = vadd.f32 %v1169_v58, %v1133_v52  ;;  %v1725_v4 = vmul.f32 %v3149_v3, %v4203_v9  ;;  %v1806_v59 = vmul.f32 %v3160_v14, %v4203_v9  ;;  %v1807_v32 = vmul.f32 %v3160_v14, %v4205_v25 }
 0x11e   : > { %v2050_v53 = vmul.f32 %v4142_v12, %v4203_v9  ;;  %v2051_v0 = vmul.f32 %v4142_v12, %v4205_v25  ;;  %v819_v22 = vsel %vm749_vm0, %v816_v7, %v818_v27  ;;  %v1063_v23 = vrot.slane %v939_v35, 2 }
 0x11f   : > { %v1445_v17 = vadd.f32 %v1374_v13, %v1201_v30  ;;  %v1928_v34 = vrot.slane %v1806_v59, 1  ;;  %v1929_v15 = vrot.slane %v1807_v32, 1  ;;  %v889_v33 = vadd.f32 %v819_v22, %v612_v56 }
 0x120   : > { %v2172_v38 = vrot.slane %v2050_v53, 2  ;;  %v2173_v21 = vrot.slane %v2051_v0, 2  ;;  %v1064_v39 = vsel %vm994_vm1, %v1061_v26, %v1063_v23  ;;  %v1375_v62 = vrot.slane %v1252_v48, 1 }
 0x121   : > { %v1689_v16 = vadd.f32 %v1618_v40, %v1445_v17  ;;  %v1134_v58 = vadd.f32 %v1064_v39, %v889_v33  ;;  %v1619_v28 = vrot.slane %v1496_v36, 2  ;;  %v1930_v1 = vsel %vm749_vm0, %v1928_v34, %v1929_v15 }
 0x122   : > { %v2174_v7 = vsel %vm994_vm1, %v2172_v38, %v2173_v21  ;;  %v1376_v42 = vsel %vm749_vm0, %v1373_v43, %v1375_v62  ;;  %v1808_v63 = vmul.f32 %v3160_v14, %v4224_v18  ;;  %v1726_v54 = vmul.f32 %v3149_v3, %v4205_v25 }
 0x123   : > { %v1757_v6 = vadd.f32 %v1725_v4, %v1689_v16  ;;  %v1202_v26 = vadd.f32 %v1170_v41, %v1134_v58  ;;  %v2052_v57 = vmul.f32 %v4142_v12, %v4224_v18  ;;  %v1620_v49 = vsel %vm994_vm1, %v1617_v8, %v1619_v28 }
 0x124   : > { %v1931_v19 = vrot.slane %v1808_v63, 1  ;;  %v419_v20 = vmul.f32 %v4067_v55, %v380_v11  ;;  %v420_v13 = vmul.f32 %v4067_v55, %v381_v24  ;;  %v4240_v43 = vpop.f32.mrb[2].mxu0  ;;  %v695_v52 = vmul.f32 %v3126_v46, %v4120_v5 }
 0x125   : > { %v2001_v56 = vadd.f32 %v1930_v1, %v1757_v6  ;;  %v1446_v10 = vadd.f32 %v1376_v42, %v1202_v26  ;;  %v2175_v50 = vrot.slane %v2052_v57, 2  ;;  %2495 = vst [vmem:[%s4137_s20 + $0x18] sm:$0xff] %v4240_v43  ;;  %v4246_v35 = vpop.f32.mrb[3].mxu0  ;;  %v613_v40 = vmul.f32 %v3124_v45, %v4120_v5 }
 0x126   : > { %v458_v41 = vadd.f32 %v4079_v37, %v419_v20  ;;  %v459_v8 = vadd.f32 %v4079_v37, %v420_v13  ;;  %v696_v55 = vmul.f32 %v3126_v46, %v4122_v29  ;;  %2494 = vst [vmem:[%s4137_s20 + $0x10] sm:$0xff] %v4246_v35  ;;  %v1932_v36 = vsel %vm749_vm0, %v1929_v15, %v1931_v19 }
 0x127   : > { %v2245_v27 = vadd.f32 %v2174_v7, %v2001_v56  ;;  %v1690_v48 = vadd.f32 %v1620_v49, %v1446_v10  ;;  %v820_v30 = vrot.slane %v695_v52, 1  ;;  %v940_v53 = vmul.f32 %v3128_v47, %v4120_v5 }
 0x128   : > { %v490_v4 = vmax.f32 %v458_v41, 0.0  ;;  %v491_v59 = vmax.f32 %v459_v8, 0.0  ;;  %v821_v32 = vrot.slane %v696_v55, 1  ;;  %v2176_v0 = vsel %vm994_vm1, %v2173_v21, %v2175_v50 }
 0x129   : > { %2872 = vmatprep.mubr.f32.mxu1 %v2245_v27  ;;  %v1758_v37 = vadd.f32 %v1726_v54, %v1690_v48  ;;  %v941_v22 = vmul.f32 %v3128_v47, %v4122_v29  ;;  %v1253_v23 = vmul.f32 %v3140_v60, %v4203_v9  ;;  %v1065_v34 = vrot.slane %v940_v53, 2 }
 0x12a   : > { %523 = vst [vmem:[#allocation2 + $0x181] sm:$0xff] %v490_v4  ;;  %524 = vst [vmem:[#allocation2 + $0x189] sm:$0xff] %v491_v59  ;;  %v822_v17 = vsel %vm749_vm0, %v820_v30, %v821_v32  ;;  %v1254_v15 = vmul.f32 %v3140_v60, %v4205_v25  ;;  %v1497_v5 = vmul.f32 %v3146_v2, %v4203_v9 }
 0x12b   : > { %v2002_v33 = vadd.f32 %v1932_v36, %v1758_v37  ;;  %v890_v38 = vadd.f32 %v822_v17, %v613_v40  ;;  %v1066_v21 = vrot.slane %v941_v22, 2  ;;  %v1377_v39 = vrot.slane %v1253_v23, 1 }
 0x12c   : > { %v1171_v62 = vmul.f32 %v3134_v51, %v4203_v9  ;;  %v1378_v16 = vrot.slane %v1254_v15, 1  ;;  %v1498_v58 = vmul.f32 %v3146_v2, %v4205_v25  ;;  %v1621_v28 = vrot.slane %v1497_v5, 2 }
 0x12d   : > { %v2246_v11 = vadd.f32 %v2176_v0, %v2002_v33  ;;  %v1067_v24 = vsel %vm994_vm1, %v1065_v34, %v1066_v21  ;;  %v697_v1 = vmul.f32 %v3126_v46, %v4152_v31  ;;  %v942_v7 = vmul.f32 %v3128_v47, %v4152_v31 }
 0x12e   : > { %v1135_v42 = vadd.f32 %v1067_v24, %v890_v38  ;;  %v1379_v63 = vsel %vm749_vm0, %v1377_v39, %v1378_v16  ;;  %v1622_v6 = vrot.slane %v1498_v58, 2  ;;  %v614_v26 = vmul.f32 %v3124_v45, %v4122_v29 }
 0x12f   : > { %2873 = vmatmul.mubr.f32.gmra.mrb[10].mxu1 %v2246_v11  ;;  %v823_v54 = vrot.slane %v697_v1, 1  ;;  %v1068_v57 = vrot.slane %v942_v7, 2  ;;  %v1255_v49 = vmul.f32 %v3140_v60, %v4224_v18  ;;  %v1499_v19 = vmul.f32 %v3146_v2, %v4224_v18 }
 0x130   : > { %v1203_v20 = vadd.f32 %v1171_v62, %v1135_v42  ;;  %v1623_v13 = vsel %vm994_vm1, %v1621_v28, %v1622_v6  ;;  %v1172_v31 = vmul.f32 %v3134_v51, %v4205_v25  ;;  %v615_v56 = vmul.f32 %v3124_v45, %v4203_v9 }
 0x131   : > { %v573_v10 = vld [vmem:[#allocation2 + $0x180] sm:$0xff]  ;;  %v4290_v29 = vld [vmem:[#allocation2 + $0x188] sm:$0xff]  ;;  %v824_v50 = vsel %vm749_vm0, %v821_v32, %v823_v54  ;;  %v1069_v52 = vsel %vm994_vm1, %v1066_v21, %v1068_v57  ;;  %v1380_v41 = vrot.slane %v1255_v49, 1  ;;  %v1624_v8 = vrot.slane %v1499_v19, 2  ;;  %v4304_v17 = vld [vmem:[#allocation2 + $0x190] sm:$0x3] }
 0x132   : > { %v1447_v40 = vadd.f32 %v1379_v63, %v1203_v20  ;;  %v1727_v55 = vmul.f32 %v3149_v3, %v573_v10  ;;  %v1809_v27 = vmul.f32 %v3160_v14, %v573_v10  ;;  %v1810_v48 = vmul.f32 %v3160_v14, %v4290_v29 }
 0x133   : > { %v2053_v36 = vmul.f32 %v4142_v12, %v573_v10  ;;  %v2054_v30 = vmul.f32 %v4142_v12, %v4290_v29  ;;  %v891_v4 = vadd.f32 %v824_v50, %v614_v26  ;;  %v698_v59 = vmul.f32 %v3126_v46, %v4203_v9 }
 0x134   : > { %v1691_v32 = vadd.f32 %v1623_v13, %v1447_v40  ;;  %v1933_v53 = vrot.slane %v1809_v27, 1  ;;  %v1934_v37 = vrot.slane %v1810_v48, 1  ;;  %v1381_v0 = vsel %vm749_vm0, %v1378_v16, %v1380_v41 }
 0x135   : > { %v2177_v22 = vrot.slane %v2053_v36, 2  ;;  %v2178_v23 = vrot.slane %v2054_v30, 2  ;;  %v1136_v34 = vadd.f32 %v1069_v52, %v891_v4  ;;  %v1625_v15 = vsel %vm994_vm1, %v1622_v6, %v1624_v8  ;;  %v4307_v5 = vpop.f32.mrb[4].mxu0 }
 0x136   : > { %v1759_v33 = vadd.f32 %v1727_v55, %v1691_v32  ;;  %v1935_v38 = vsel %vm749_vm0, %v1933_v53, %v1934_v37  ;;  %v1811_v21 = vmul.f32 %v3160_v14, %v4304_v17  ;;  %v2055_v39 = vmul.f32 %v4142_v12, %v4304_v17  ;;  %2497 = vst [vmem:[%s4137_s20 + $0x28] sm:$0xff] %v4307_v5  ;;  %v4316_v62 = vpop.f32.mrb[5].mxu0 }
 0x137   : > { %v2179_v16 = vsel %vm994_vm1, %v2177_v22, %v2178_v23  ;;  %v1204_v58 = vadd.f32 %v1172_v31, %v1136_v34  ;;  %v699_v28 = vmul.f32 %v3126_v46, %v4205_v25  ;;  %v825_v11 = vrot.slane %v698_v59, 1  ;;  %2496 = vst [vmem:[%s4137_s20 + $0x20] sm:$0xff] %v4316_v62 }
 0x138   : > { %v2003_v24 = vadd.f32 %v1935_v38, %v1759_v33  ;;  %v1728_v1 = vmul.f32 %v3149_v3, %v4290_v29  ;;  %v1936_v7 = vrot.slane %v1811_v21, 1  ;;  %v943_v42 = vmul.f32 %v3128_v47, %v4203_v9 }
 0x139   : > { %v1448_v63 = vadd.f32 %v1381_v0, %v1204_v58  ;;  %v2180_v6 = vrot.slane %v2055_v39, 2  ;;  %v826_v26 = vrot.slane %v699_v28, 1  ;;  %v944_v54 = vmul.f32 %v3128_v47, %v4205_v25 }
 0x13a   : > { %v2247_v57 = vadd.f32 %v2179_v16, %v2003_v24  ;;  %v1937_v49 = vsel %vm749_vm0, %v1934_v37, %v1936_v7  ;;  %v1070_v19 = vrot.slane %v943_v42, 2  ;;  %v1173_v20 = vmul.f32 %v3134_v51, %v573_v10 }
 0x13b   : > { %v1692_v13 = vadd.f32 %v1625_v15, %v1448_v63  ;;  %v827_v31 = vsel %vm749_vm0, %v825_v11, %v826_v26  ;;  %v1071_v50 = vrot.slane %v944_v54, 2  ;;  %v1256_v52 = vmul.f32 %v3140_v60, %v573_v10 }
 0x13c   : > { %2875 = vmatprep.mubr.f32.mxu1 %v2247_v57  ;;  %v892_v9 = vadd.f32 %v827_v31, %v615_v56  ;;  %v1257_v41 = vmul.f32 %v3140_v60, %v4290_v29  ;;  %v1500_v8 = vmul.f32 %v3146_v2, %v573_v10  ;;  %v1501_v40 = vmul.f32 %v3146_v2, %v4290_v29  ;;  %v2944_v56 = vld [vmem:[#allocation2] sm:$0xff] }
 0x13d   : > { %v1760_v55 = vadd.f32 %v1728_v1, %v1692_v13  ;;  %v2181_v27 = vsel %vm994_vm1, %v2178_v23, %v2180_v6  ;;  %v1072_v48 = vsel %vm994_vm1, %v1070_v19, %v1071_v50  ;;  %v1382_v36 = vrot.slane %v1256_v52, 1 }
 0x13e   : > { %v1137_v30 = vadd.f32 %v1072_v48, %v892_v9  ;;  %v1383_v4 = vrot.slane %v1257_v41, 1  ;;  %v1626_v59 = vrot.slane %v1500_v8, 2  ;;  %v1627_v32 = vrot.slane %v1501_v40, 2 }
 0x13f   : > { %v2004_v53 = vadd.f32 %v1937_v49, %v1760_v55  ;;  %v1812_v37 = vmul.f32 %v2944_v56, %v3160_v14  ;;  %v2056_v0 = vmul.f32 %v2944_v56, %v4142_v12  ;;  %v616_v34 = vmul.f32 %v3124_v45, %v4205_v25  ;;  %v578_v45 = vld [vmem:[#allocation2 + $0x1a8] sm:$0x3] }
 0x140   : > { %v1205_v10 = vadd.f32 %v1173_v20, %v1137_v30  ;;  %v1384_v22 = vsel %vm749_vm0, %v1382_v36, %v1383_v4  ;;  %v700_v23 = vmul.f32 %v3126_v46, %v4224_v18  ;;  %v1628_v33 = vsel %vm994_vm1, %v1626_v59, %v1627_v32 }
 0x141   : > { %v2248_v15 = vadd.f32 %v2181_v27, %v2004_v53  ;;  %v1938_v38 = vrot.slane %v1812_v37, 1  ;;  %v945_v21 = vmul.f32 %v3128_v47, %v4224_v18  ;;  %v1729_v16 = vmul.f32 %v2944_v56, %v3149_v3 }
 0x142   : > { %v1449_v39 = vadd.f32 %v1384_v22, %v1205_v10  ;;  %v828_v58 = vrot.slane %v700_v23, 1  ;;  %v1258_v28 = vmul.f32 %v3140_v60, %v4304_v17  ;;  %v2182_v11 = vrot.slane %v2056_v0, 2 }
 0x143   : > { %2876 = vmatmul.mubr.f32.gmra.mrb[12].mxu1 %v2248_v15  ;;  %v1073_v25 = vrot.slane %v945_v21, 2  ;;  %v1502_v46 = vmul.f32 %v3146_v2, %v4304_v17  ;;  %v1174_v18 = vmul.f32 %v3134_v51, %v4290_v29  ;;  %v1814_v63 = vmul.f32 %v3160_v14, %v578_v45 }
 0x144   : > { %v1693_v24 = vadd.f32 %v1628_v33, %v1449_v39  ;;  %v829_v1 = vsel %vm749_vm0, %v826_v26, %v828_v58  ;;  %v1385_v7 = vrot.slane %v1258_v28, 1  ;;  %v2563_v6 = vmul.f32 %v4150_v61, %v4150_v61 }
 0x145   : > { %v893_v47 = vadd.f32 %v829_v1, %v616_v34  ;;  %v1074_v3 = vsel %vm994_vm1, %v1071_v50, %v1073_v25  ;;  %v1629_v42 = vrot.slane %v1502_v46, 2  ;;  %v2524_v17 = vadd.f32 %v4150_v61, %v4158_v44 }
 0x146   : > { %v1761_v60 = vadd.f32 %v1729_v16, %v1693_v24  ;;  %v2844_v54 = vpop.f32.mrb[6].mxu0  ;;  %v1386_v49 = vsel %vm749_vm0, %v1383_v4, %v1385_v7  ;;  %v2058_v19 = vmul.f32 %v4142_v12, %v578_v45  ;;  %v2562_v51 = vmul.f32 %v4158_v44, %v4158_v44 }
 0x147   : > { %v1138_v2 = vadd.f32 %v1074_v3, %v893_v47  ;;  %2499 = vst [vmem:[%s4137_s20 + $0x38] sm:$0xff] %v2844_v54  ;;  %v2363_v26 = vpop.f32.mrb[7].mxu0  ;;  %v2525_v29 = vadd.f32 %v2524_v17, %v4246_v35  ;;  %v2564_v20 = vmul.f32 %v4246_v35, %v4246_v35  ;;  %v1630_v61 = vsel %vm994_vm1, %v1627_v32, %v1629_v42 }
 0x148   : > { %v2005_v57 = vadd.f32 %v1938_v38, %v1761_v60  ;;  %2498 = vst [vmem:[%s4137_s20 + $0x30] sm:$0xff] %v2363_v26  ;;  %v1941_v31 = vrot.slane %v1814_v63, 1  ;;  %v2594_v50 = vadd.f32 %v2563_v6, %v2562_v51  ;;  %v2185_v12 = vrot.slane %v2058_v19, 2 }
 0x149   : > { %v1206_v14 = vadd.f32 %v1174_v18, %v1138_v2  ;;  %v2526_v9 = vadd.f32 %v4240_v43, %v2525_v29  ;;  %v2565_v44 = vmul.f32 %v4240_v43, %v4240_v43  ;;  %v2566_v8 = vmul.f32 %v4316_v62, %v4316_v62 }
 0x14a   : > { %v2249_v13 = vadd.f32 %v2182_v11, %v2005_v57  ;;  %v2595_v41 = vadd.f32 %v2594_v50, %v2564_v20  ;;  %v1942_v55 = vsel %vm749_vm0, %v1938_v38, %v1941_v31  ;;  %v2186_v30 = vsel %vm994_vm1, %v2182_v11, %v2185_v12 }
 0x14b   : > { %v1450_v52 = vadd.f32 %v1386_v49, %v1206_v14  ;;  %v2527_v35 = vadd.f32 %v2526_v9, %v4316_v62  ;;  %v2567_v43 = vmul.f32 %v4307_v5, %v4307_v5  ;;  %v2568_v59 = vmul.f32 %v2363_v26, %v2363_v26 }
 0x14c   : > { %2878 = vmatprep.mubr.f32.mxu1 %v2249_v13  ;;  %v2596_v27 = vadd.f32 %v2595_v41, %v2565_v44  ;;  %v2569_v0 = vmul.f32 %v2844_v54, %v2844_v54 }
 0x14d   : > { %v1694_v40 = vadd.f32 %v1630_v61, %v1450_v52  ;;  %v2528_v36 = vadd.f32 %v4307_v5, %v2527_v35 }
 0x14e   : > { %v2597_v4 = vadd.f32 %v2596_v27, %v2566_v8 }
 0x14f   : > { %v1762_v48 = vadd.f32 %v1729_v16, %v1694_v40  ;;  %v2529_v53 = vadd.f32 %v2528_v36, %v2363_v26 }
 0x150   : > { %v2598_v56 = vadd.f32 %v2597_v4, %v2567_v43 }
 0x151   : > { %v2006_v32 = vadd.f32 %v1942_v55, %v1762_v48  ;;  %v2530_v62 = vadd.f32 %v2844_v54, %v2529_v53 }
 0x152   : > { %v2599_v10 = vadd.f32 %v2598_v56, %v2568_v59 }
 0x153   : > { %v2250_v37 = vadd.f32 %v2186_v30, %v2006_v32 }
 0x154   : > { %v2600_v22 = vadd.f32 %v2599_v10, %v2569_v0 }
 0x155   : > { %2879 = vmatmul.mubr.f32.gmra.mrb[14].mxu1 %v2250_v37 }
 0x159   : > { %v2847_v34 = vpop.f32.mrb[8].mxu0 }
 0x15a   : > { %2501 = vst [vmem:[%s4137_s20 + $0x48] sm:$0xff] %v2847_v34  ;;  %v2373_v23 = vpop.f32.mrb[9].mxu0  ;;  %v2571_v5 = vmul.f32 %v2847_v34, %v2847_v34 }
 0x15b   : > { %2500 = vst [vmem:[%s4137_s20 + $0x40] sm:$0xff] %v2373_v23  ;;  %v2531_v15 = vadd.f32 %v2530_v62, %v2373_v23  ;;  %v2570_v33 = vmul.f32 %v2373_v23, %v2373_v23 }
 0x15d   : > { %v2601_v38 = vadd.f32 %v2600_v22, %v2570_v33  ;;  %v2532_v21 = vadd.f32 %v2847_v34, %v2531_v15 }
 0x15f   : > { %v2602_v39 = vadd.f32 %v2601_v38, %v2571_v5 }
 0x16b   : > { %v2850_v16 = vpop.f32.mrb[10].mxu0 }
 0x16c   : > { %2503 = vst [vmem:[%s4137_s20 + $0x58] sm:$0xff] %v2850_v16  ;;  %v2383_v58 = vpop.f32.mrb[11].mxu0  ;;  %v2573_v45 = vmul.f32 %v2850_v16, %v2850_v16 }
 0x16d   : > { %2502 = vst [vmem:[%s4137_s20 + $0x50] sm:$0xff] %v2383_v58  ;;  %v2533_v28 = vadd.f32 %v2532_v21, %v2383_v58  ;;  %v2572_v11 = vmul.f32 %v2383_v58, %v2383_v58 }
 0x16f   : > { %v2603_v25 = vadd.f32 %v2602_v39, %v2572_v11  ;;  %v2534_v46 = vadd.f32 %v2850_v16, %v2533_v28 }
 0x171   : > { %v2604_v24 = vadd.f32 %v2603_v25, %v2573_v45 }
 0x17d   : > { %v2853_v1 = vpop.f32.mrb[12].mxu0 }
 0x17e   : > { %2505 = vst [vmem:[%s4137_s20 + $0x68] sm:$0xff] %v2853_v1  ;;  %v2393_v7 = vpop.f32.mrb[13].mxu0  ;;  %v2575_v18 = vmul.f32 %v2853_v1, %v2853_v1 }
 0x17f   : > { %2504 = vst [vmem:[%s4137_s20 + $0x60] sm:$0xff] %v2393_v7  ;;  %v2535_v47 = vadd.f32 %v2534_v46, %v2393_v7  ;;  %v2574_v3 = vmul.f32 %v2393_v7, %v2393_v7 }
 0x181   : > { %v2605_v60 = vadd.f32 %v2604_v24, %v2574_v3  ;;  %v2536_v42 = vadd.f32 %v2853_v1, %v2535_v47 }
 0x183   : > { %v2606_v63 = vadd.f32 %v2605_v60, %v2575_v18 }
 0x190   : > { %v2856_v6 = vpop.f32.mrb[14].mxu0 }
 0x191   : > { %2507 = vst [vmem:[%s4137_s20 + $0x78] sm:$0xff] %v2856_v6  ;;  %v2403_v54 = vpop.f32.mrb[15].mxu0  ;;  %v2577_v26 = vmul.f32 %v2856_v6, %v2856_v6 }
 0x192   : > { %2506 = vst [vmem:[%s4137_s20 + $0x70] sm:$0xff] %v2403_v54  ;;  %v2537_v2 = vadd.f32 %v2536_v42, %v2403_v54  ;;  %v2576_v17 = vmul.f32 %v2403_v54, %v2403_v54 }
 0x194   : > { %v2538_v57 = vadd.f32 %v2856_v6, %v2537_v2  ;;  %v2607_v49 = vadd.f32 %v2606_v63, %v2576_v17 }
 0x196   : > { %v2608_v19 = vadd.f32 %v2607_v49, %v2577_v26 }
 0x1a4   : > { %v2859_v51 = vpop.f32.mrb[0].mxu1 }
 0x1a5   : > { %2509 = vst [vmem:[%s4137_s20 + $0x88] sm:$0xff] %v2859_v51  ;;  %v2413_v14 = vpop.f32.mrb[1].mxu1  ;;  %v2579_v13 = vmul.f32 %v2859_v51, %v2859_v51 }
 0x1a6   : > { %2508 = vst [vmem:[%s4137_s20 + $0x80] sm:$0xff] %v2413_v14  ;;  %v2539_v29 = vadd.f32 %v2538_v57, %v2413_v14  ;;  %v2578_v20 = vmul.f32 %v2413_v14, %v2413_v14 }
 0x1a8   : > { %v2609_v61 = vadd.f32 %v2608_v19, %v2578_v20  ;;  %v2540_v31 = vadd.f32 %v2859_v51, %v2539_v29 }
 0x1aa   : > { %v2610_v50 = vadd.f32 %v2609_v61, %v2579_v13 }
 0x1b6   : > { %v2862_v52 = vpop.f32.mrb[2].mxu1 }
 0x1b7   : > { %2511 = vst [vmem:[%s4137_s20 + $0x98] sm:$0xff] %v2862_v52  ;;  %v2423_v9 = vpop.f32.mrb[3].mxu1  ;;  %v2581_v41 = vmul.f32 %v2862_v52, %v2862_v52 }
 0x1b8   : > { %2510 = vst [vmem:[%s4137_s20 + $0x90] sm:$0xff] %v2423_v9  ;;  %v2541_v12 = vadd.f32 %v2540_v31, %v2423_v9  ;;  %v2580_v44 = vmul.f32 %v2423_v9, %v2423_v9 }
 0x1ba   : > { %v2611_v8 = vadd.f32 %v2610_v50, %v2580_v44  ;;  %v2542_v40 = vadd.f32 %v2862_v52, %v2541_v12 }
 0x1bc   : > { %v2612_v35 = vadd.f32 %v2611_v8, %v2581_v41 }
 0x1ca   : > { %v2865_v55 = vpop.f32.mrb[4].mxu1 }
 0x1cb   : > { %2513 = vst [vmem:[%s4137_s20 + $0xa8] sm:$0xff] %v2865_v55  ;;  %v2433_v27 = vpop.f32.mrb[5].mxu1  ;;  %v2583_v30 = vmul.f32 %v2865_v55, %v2865_v55 }
 0x1cc   : > { %2512 = vst [vmem:[%s4137_s20 + $0xa0] sm:$0xff] %v2433_v27  ;;  %v2543_v48 = vadd.f32 %v2542_v40, %v2433_v27  ;;  %v2582_v36 = vmul.f32 %v2433_v27, %v2433_v27 }
 0x1ce   : > { %v2613_v43 = vadd.f32 %v2612_v35, %v2582_v36  ;;  %v2544_v4 = vadd.f32 %v2865_v55, %v2543_v48 }
 0x1d0   : > { %v2614_v59 = vadd.f32 %v2613_v43, %v2583_v30 }
 0x1dc   : > { %v2868_v32 = vpop.f32.mrb[6].mxu1 }
 0x1dd   : > { %2515 = vst [vmem:[%s4137_s20 + $0xb8] sm:$0xff] %v2868_v32  ;;  %v2443_v53 = vpop.f32.mrb[7].mxu1  ;;  %v2585_v62 = vmul.f32 %v2868_v32, %v2868_v32 }
 0x1de   : > { %2514 = vst [vmem:[%s4137_s20 + $0xb0] sm:$0xff] %v2443_v53  ;;  %v2545_v56 = vadd.f32 %v2544_v4, %v2443_v53  ;;  %v2584_v37 = vmul.f32 %v2443_v53, %v2443_v53 }
 0x1e0   : > { %v2615_v0 = vadd.f32 %v2614_v59, %v2584_v37  ;;  %v2546_v10 = vadd.f32 %v2868_v32, %v2545_v56 }
 0x1e2   : > { %v2616_v22 = vadd.f32 %v2615_v0, %v2585_v62 }
 0x1f0   : > { %v2871_v34 = vpop.f32.mrb[8].mxu1 }
 0x1f1   : > { %2517 = vst [vmem:[%s4137_s20 + $0xc8] sm:$0xff] %v2871_v34  ;;  %v2453_v23 = vpop.f32.mrb[9].mxu1  ;;  %v2587_v5 = vmul.f32 %v2871_v34, %v2871_v34 }
 0x1f2   : > { %2516 = vst [vmem:[%s4137_s20 + $0xc0] sm:$0xff] %v2453_v23  ;;  %v2547_v15 = vadd.f32 %v2546_v10, %v2453_v23  ;;  %v2586_v33 = vmul.f32 %v2453_v23, %v2453_v23 }
 0x1f4   : > { %v2617_v38 = vadd.f32 %v2616_v22, %v2586_v33  ;;  %v2548_v21 = vadd.f32 %v2871_v34, %v2547_v15 }
 0x1f6   : > { %v2618_v39 = vadd.f32 %v2617_v38, %v2587_v5 }
 0x202   : > { %v2874_v16 = vpop.f32.mrb[10].mxu1 }
 0x203   : > { %2519 = vst [vmem:[%s4137_s20 + $0xd8] sm:$0xff] %v2874_v16  ;;  %v2463_v58 = vpop.f32.mrb[11].mxu1  ;;  %v2589_v45 = vmul.f32 %v2874_v16, %v2874_v16 }
 0x204   : > { %2518 = vst [vmem:[%s4137_s20 + $0xd0] sm:$0xff] %v2463_v58  ;;  %v2549_v28 = vadd.f32 %v2548_v21, %v2463_v58  ;;  %v2588_v11 = vmul.f32 %v2463_v58, %v2463_v58 }
 0x206   : > { %v2619_v25 = vadd.f32 %v2618_v39, %v2588_v11  ;;  %v2550_v46 = vadd.f32 %v2874_v16, %v2549_v28 }
 0x208   : > { %v2620_v24 = vadd.f32 %v2619_v25, %v2589_v45 }
 0x216   : > { %v2877_v1 = vpop.f32.mrb[12].mxu1 }
 0x217   : > { %2521 = vst [vmem:[%s4137_s20 + $0xe8] sm:$0xff] %v2877_v1  ;;  %v2473_v7 = vpop.f32.mrb[13].mxu1  ;;  %v2591_v18 = vmul.f32 %v2877_v1, %v2877_v1 }
 0x218   : > { %2520 = vst [vmem:[%s4137_s20 + $0xe0] sm:$0xff] %v2473_v7  ;;  %v2551_v47 = vadd.f32 %v2550_v46, %v2473_v7  ;;  %v2590_v3 = vmul.f32 %v2473_v7, %v2473_v7 }
 0x21a   : > { %v2621_v60 = vadd.f32 %v2620_v24, %v2590_v3  ;;  %v2552_v42 = vadd.f32 %v2877_v1, %v2551_v47 }
 0x21c   : > { %v2622_v63 = vadd.f32 %v2621_v60, %v2591_v18 }
 0x228   : > { %v2880_v6 = vpop.f32.mrb[14].mxu1 }
 0x229   : > { %2523 = vst [vmem:[%s4137_s20 + $0xf8] sm:$0xff] %v2880_v6  ;;  %v2483_v54 = vpop.f32.mrb[15].mxu1  ;;  %v2593_v26 = vmul.f32 %v2880_v6, %v2880_v6 }
 0x22a   : > { %2522 = vst [vmem:[%s4137_s20 + $0xf0] sm:$0xff] %v2483_v54  ;;  %v2553_v2 = vadd.f32 %v2552_v42, %v2483_v54  ;;  %v2592_v17 = vmul.f32 %v2483_v54, %v2483_v54 }
 0x22c   : > { %v2554_v57 = vadd.f32 %v2880_v6, %v2553_v2  ;;  %v2623_v49 = vadd.f32 %v2622_v63, %v2592_v17 }
 0x22e   : > { %v2555_v19 = vrot.slane %v2554_v57, 4  ;;  %v2624_v51 = vadd.f32 %v2623_v49, %v2593_v26 }
 0x230   : > { %v2556_v14 = vadd.f32 %v2555_v19, %v2554_v57  ;;  %v2625_v29 = vrot.slane %v2624_v51, 4 }
 0x232   : > { %v2557_v20 = vrot.slane %v2556_v14, 2  ;;  %v2626_v13 = vadd.f32 %v2625_v29, %v2624_v51 }
 0x234   : > { %v2558_v61 = vadd.f32 %v2557_v20, %v2556_v14  ;;  %v2627_v31 = vrot.slane %v2626_v13, 2 }
 0x236   : > { %v2559_v50 = vrot.slane %v2558_v61, 1  ;;  %v2628_v52 = vadd.f32 %v2627_v31, %v2626_v13 }
 0x238   : > { %v2560_v9 = vadd.f32 %v2559_v50, %v2558_v61  ;;  %v2629_v12 = vrot.slane %v2628_v52, 1 }
 0x23a   : > { %2561 = vst [vmem:[%s292_s23] sm:$0x1] %v2560_v9  ;;  %v2630_v44 = vadd.f32 %v2629_v12, %v2628_v52 }
 0x23c   : > { %2631 = vst [vmem:[%s295_s28] sm:$0x1] %v2630_v44 }
 0x23d PF: > { %s18_s24 = sadd.s32 1, %s2951_s24  }
 0x23e   : > { %p15_p4 = scmp.ge.s32.totalorder %s18_s24, 4  }
 0x240   :  { %17 = sbr.rel (!%p15_p4) target bundleno = 1 (0x1), region = 95 }

</bundles_post_ra>
